<compile_context>
chip_gen: v7x
topology: tpu7x:2x2x1
jax: 0.10.0
libtpu: 0.0.40
codegen_flags: <defaults>
</compile_context>

<pallas_src>
import functools

import jax
import jax.numpy as jnp
from jax import lax
from jax.experimental import pallas as pl
from jax.experimental.pallas import tpu as pltpu


def _round_up(x, m):
    return (x + m - 1) // m * m


# ----------------------------------------------------------------------------
# Pallas kernels
# ----------------------------------------------------------------------------
def _make_gru_layer_kernel(T, Bp, Hp, unroll):
    """Bidirectional GRU layer kernel; grid axis 0 = direction (0 fwd, 1 bwd).

    x_ref    : (T*Bp, Din)   time-major flattened input (shared by both dirs)
    wih_ref  : (Din, 3*Hp)   packed input->hidden weights for this direction
    whh_ref  : (Hp, 3*Hp)    packed hidden->hidden weights
    bpre_ref : (1, 3*Hp)     b_ih+b_hh for r,z gates; b_ih for n gate
    bhhn_ref : (1, Hp)       b_hh for the n gate
    out_ref  : (T*Bp, Hp)    this direction's lane-half of (T*Bp, 2*Hp)
    gi_ref   : (T*Bp, 3*Hp)  VMEM scratch with the hoisted input projection
    """

    def kernel(x_ref, wih_ref, whh_ref, bpre_ref, bhhn_ref, out_ref, gi_ref):
        direction = pl.program_id(0)

        # Input projection for the whole sequence: one big MXU matmul,
        # hoisted out of the serial recurrence (M = T*Bp instead of Bp).
        gi_ref[...] = (
            jnp.dot(x_ref[...], wih_ref[...], preferred_element_type=jnp.float32)
            + bpre_ref[...]
        )

        # Loop-invariant loads hoisted out of the recurrent loop.
        whh = whh_ref[...]          # (Hp, 3*Hp)
        bhh_n = bhhn_ref[...]       # (1, Hp)

        def step(i, h):
            # forward walks t = 0..T-1, backward walks t = T-1..0
            t = jnp.where(direction == 0, i, T - 1 - i)
            row = pl.multiple_of(t * Bp, Bp)
            gi = gi_ref[pl.ds(row, Bp), :]                                # (Bp, 3Hp)
            gh = jnp.dot(h, whh, preferred_element_type=jnp.float32)     # (Bp, 3Hp)
            r = jax.nn.sigmoid(gi[:, 0:Hp] + gh[:, 0:Hp])
            z = jax.nn.sigmoid(gi[:, Hp:2 * Hp] + gh[:, Hp:2 * Hp])
            n = jnp.tanh(gi[:, 2 * Hp:3 * Hp] + r * (gh[:, 2 * Hp:3 * Hp] + bhh_n))
            h_new = (1.0 - z) * n + z * h
            out_ref[pl.ds(row, Bp), :] = h_new
            return h_new

        lax.fori_loop(0, T, step, jnp.zeros((Bp, Hp), jnp.float32), unroll=unroll)

    return kernel


def _fc_kernel(h_ref, w_ref, b_ref, o_ref):
    """Linear: (Bp, 2*Hp) @ (2*Hp, Dout) + (1, Dout)."""
    o_ref[...] = (
        jnp.dot(h_ref[...], w_ref[...], preferred_element_type=jnp.float32)
        + b_ref[...]
    )


# ----------------------------------------------------------------------------
# Wrappers
# ----------------------------------------------------------------------------
def gru_layer(h_flat, wih, whh, bpre, bhhn, *, T, Bp, Hp, unroll):
    Din = h_flat.shape[1]
    kernel = _make_gru_layer_kernel(T, Bp, Hp, unroll)
    return pl.pallas_call(
        kernel,
        out_shape=jax.ShapeDtypeStruct((T * Bp, 2 * Hp), jnp.float32),
        grid=(2,),
        in_specs=[
            pl.BlockSpec((T * Bp, Din), lambda d: (0, 0)),           # shared input
            pl.BlockSpec((None, Din, 3 * Hp), lambda d: (d, 0, 0)),  # per-dir weights
            pl.BlockSpec((None, Hp, 3 * Hp), lambda d: (d, 0, 0)),
            pl.BlockSpec((None, 1, 3 * Hp), lambda d: (d, 0, 0)),
            pl.BlockSpec((None, 1, Hp), lambda d: (d, 0, 0)),
        ],
        # fwd/bwd write disjoint lane-halves of the same output -> no concat.
        out_specs=pl.BlockSpec((T * Bp, Hp), lambda d: (0, d)),
        scratch_shapes=[pltpu.VMEM((T * Bp, 3 * Hp), jnp.float32)],
        compiler_params=pltpu.CompilerParams(
            dimension_semantics=("parallel",),  # fwd/bwd independent (2 TCs on v7x)
        ),
    )(h_flat, wih, whh, bpre, bhhn)


def fc_apply(h_flat, w_t, b, *, T, Bp):
    Dout = w_t.shape[1]
    two_hp = h_flat.shape[1]
    return pl.pallas_call(
        _fc_kernel,
        out_shape=jax.ShapeDtypeStruct((Bp, Dout), jnp.float32),
        grid=(1,),
        in_specs=[
            # pick the last timestep's rows straight out of HBM via the BlockSpec
            pl.BlockSpec((Bp, two_hp), lambda i: (T - 1, 0)),
            pl.BlockSpec(w_t.shape, lambda i: (0, 0)),
            pl.BlockSpec(b.shape, lambda i: (0, 0)),
        ],
        out_specs=pl.BlockSpec((Bp, Dout), lambda i: (0, 0)),
    )(h_flat, w_t, b)


def bigru_forward(x, params, *, seq_len, input_size, hidden_size, num_layers):
    """Mirrors biGRU.forward: bi-GRU over the sequence, take the last timestep
    of the bidirectional output, project with the Linear layer."""
    del hidden_size  # (padded) hidden size comes from the packed params
    T = seq_len
    x = x.reshape(-1, T, input_size).astype(jnp.float32)       # (B, T, D) batch-first
    B = x.shape[0]
    Bp = _round_up(max(B, 8), 8)
    Hp = params["layer0"][1].shape[1]                          # padded hidden size

    # time-major, batch padded to a sublane multiple, flattened to (T*Bp, D)
    xt = jnp.transpose(x, (1, 0, 2))                           # (T, B, D)
    xt = jnp.pad(xt, ((0, 0), (0, Bp - B), (0, 0)))
    h = xt.reshape(T * Bp, input_size)

    unroll = T <= 32
    for l in range(num_layers):
        wih, whh, bpre, bhhn = params[f"layer{l}"]
        h = gru_layer(h, wih, whh, bpre, bhhn, T=T, Bp=Bp, Hp=Hp, unroll=unroll)

    w_fc, b_fc = params["fc"]
    out = fc_apply(h, w_fc, b_fc, T=T, Bp=Bp)                  # (Bp, Dout)
    return out[:B]                                             # strip batch padding


# ----------------------------------------------------------------------------
# Parameter init (PyTorch nn.GRU / nn.Linear shapes & init dist) + packing
# ----------------------------------------------------------------------------
def init_params(key, input_size, hidden_size, num_layers):
    """PyTorch-shaped params, U(-1/sqrt(H), 1/sqrt(H)) init, gate order (r,z,n)."""
    raw = {}
    k = 1.0 / float(hidden_size) ** 0.5
    keys = jax.random.split(key, num_layers * 2 * 4 + 2)
    idx = 0
    for l in range(num_layers):
        din = input_size if l == 0 else 2 * hidden_size
        for tag in ("fwd", "bwd"):
            w_ih = jax.random.uniform(keys[idx], (3 * hidden_size, din),
                                      minval=-k, maxval=k); idx += 1
            w_hh = jax.random.uniform(keys[idx], (3 * hidden_size, hidden_size),
                                      minval=-k, maxval=k); idx += 1
            b_ih = jax.random.uniform(keys[idx], (3 * hidden_size,),
                                      minval=-k, maxval=k); idx += 1
            b_hh = jax.random.uniform(keys[idx], (3 * hidden_size,),
                                      minval=-k, maxval=k); idx += 1
            raw[f"l{l}_{tag}"] = (w_ih, w_hh, b_ih, b_hh)
    kf = 1.0 / float(2 * hidden_size) ** 0.5
    w_fc = jax.random.uniform(keys[idx], (input_size, 2 * hidden_size),
                              minval=-kf, maxval=kf); idx += 1
    b_fc = jax.random.uniform(keys[idx], (input_size,), minval=-kf, maxval=kf)
    raw["fc"] = (w_fc, b_fc)
    return raw


def pack_params(raw, input_size, hidden_size, num_layers):
    """Repack PyTorch-shaped params for the kernels.

    Hidden size is zero-padded to a multiple of 128 (lane-dense); the padded
    hidden units provably stay at 0 through the GRU recurrence, so results
    are unchanged.  r/z biases are pre-summed (b_ih + b_hh).
    """
    H = hidden_size
    Hp = _round_up(H, 128)
    packed = {}
    for l in range(num_layers):
        din_raw = input_size if l == 0 else 2 * H
        din_pad = input_size if l == 0 else 2 * Hp
        wih_d, whh_d, bpre_d, bhhn_d = [], [], [], []
        for tag in ("fwd", "bwd"):
            w_ih, w_hh, b_ih, b_hh = raw[f"l{l}_{tag}"]
            w_ih_g = w_ih.reshape(3, H, din_raw)     # (r|z|n, H, Din)
            w_hh_g = w_hh.reshape(3, H, H)
            b_ih_g = b_ih.reshape(3, H)
            b_hh_g = b_hh.reshape(3, H)

            wih_p = jnp.zeros((din_pad, 3 * Hp), jnp.float32)
            whh_p = jnp.zeros((Hp, 3 * Hp), jnp.float32)
            for g in range(3):
                wg = jnp.transpose(w_ih_g[g])        # (Din_raw, H)
                if l == 0:
                    wih_p = wih_p.at[:din_raw, g * Hp:g * Hp + H].set(wg)
                else:
                    # prev-layer output layout: [fwd 0:H | pad | bwd Hp:Hp+H | pad]
                    wih_p = wih_p.at[0:H, g * Hp:g * Hp + H].set(wg[0:H])
                    wih_p = wih_p.at[Hp:Hp + H, g * Hp:g * Hp + H].set(wg[H:2 * H])
                whh_p = whh_p.at[0:H, g * Hp:g * Hp + H].set(jnp.transpose(w_hh_g[g]))

            bpre = jnp.zeros((1, 3 * Hp), jnp.float32)
            bpre = bpre.at[0, 0 * Hp:0 * Hp + H].set(b_ih_g[0] + b_hh_g[0])   # r
            bpre = bpre.at[0, 1 * Hp:1 * Hp + H].set(b_ih_g[1] + b_hh_g[1])   # z
            bpre = bpre.at[0, 2 * Hp:2 * Hp + H].set(b_ih_g[2])               # n (input bias)
            bhhn = jnp.zeros((1, Hp), jnp.float32).at[0, :H].set(b_hh_g[2])   # n (hidden bias)

            wih_d.append(wih_p); whh_d.append(whh_p)
            bpre_d.append(bpre); bhhn_d.append(bhhn)

        packed[f"layer{l}"] = (jnp.stack(wih_d), jnp.stack(whh_d),
                               jnp.stack(bpre_d), jnp.stack(bhhn_d))

    w_fc, b_fc = raw["fc"]                           # (Dout, 2H), (Dout,)
    dout = w_fc.shape[0]
    w_fc_p = jnp.zeros((2 * Hp, dout), jnp.float32)
    w_fc_p = w_fc_p.at[0:H, :].set(jnp.transpose(w_fc[:, 0:H]))
    w_fc_p = w_fc_p.at[Hp:Hp + H, :].set(jnp.transpose(w_fc[:, H:2 * H]))
    packed["fc"] = (w_fc_p, b_fc.reshape(1, dout))
    return packed


# ----------------------------------------------------------------------------
# Demo
# ----------------------------------------------------------------------------
if __name__ == "__main__":
    B, T, D, H, L = 2, 8, 16, 32, 2   # batch, seq_len, input_size, hidden, layers

    key = jax.random.PRNGKey(0)
    kx, kp = jax.random.split(key)
    x = jax.random.normal(kx, (B, T, D), dtype=jnp.float32)

    raw_params = init_params(kp, input_size=D, hidden_size=H, num_layers=L)
    params = pack_params(raw_params, input_size=D, hidden_size=H, num_layers=L)

    fwd = jax.jit(functools.partial(bigru_forward, seq_len=T, input_size=D,
                                    hidden_size=H, num_layers=L))
    out = jax.block_until_ready(fwd(x, params))

    assert out.shape == (B, D), out.shape
    assert bool(jnp.all(jnp.isfinite(out)))
    print("KERNEL_OK")
</pallas_src>

<mosaic_0001>
module attributes {stable_mosaic.version = 11 : i64} {
  func.func @kernel(%arg0: i32, %arg1: memref<64x256xf32, #tpu.memory_space<vmem>>, %arg2: memref<1x256x384xf32, #tpu.memory_space<vmem>>, %arg3: memref<1x128x384xf32, #tpu.memory_space<vmem>>, %arg4: memref<1x1x384xf32, #tpu.memory_space<vmem>>, %arg5: memref<1x1x128xf32, #tpu.memory_space<vmem>>, %arg6: memref<64x128xf32, #tpu.memory_space<vmem>>, %arg7: memref<64x384xf32, #tpu.memory_space<vmem>>) attributes {dimension_semantics = [#tpu.dimension_semantics<parallel>], iteration_bounds = array<i64: 2>, scalar_prefetch = 0 : i64, scratch_operands = 1 : i64, tpu.core_type = #tpu.core_type<tc>, window_params = [{pipeline_mode = #tpu.pipeline_mode<synchronous>, transform_indices = @transform_0, window_bounds = array<i64: 64, 256>}, {transform_indices = @transform_1, window_bounds = array<i64: 1, 256, 384>}, {transform_indices = @transform_2, window_bounds = array<i64: 1, 128, 384>}, {transform_indices = @transform_3, window_bounds = array<i64: 1, 1, 384>}, {transform_indices = @transform_4, window_bounds = array<i64: 1, 1, 128>}, {transform_indices = @transform_5, window_bounds = array<i64: 64, 128>}]} {
    %c0 = arith.constant 0 : index
    %c0_0 = arith.constant 0 : index
    %0 = vector.load %arg1[%c0, %c0_0] : memref<64x256xf32, #tpu.memory_space<vmem>>, vector<64x256xf32>
    %c0_1 = arith.constant 0 : index
    %c0_2 = arith.constant 0 : index
    %c0_3 = arith.constant 0 : index
    %1 = vector.load %arg2[%c0_1, %c0_2, %c0_3] : memref<1x256x384xf32, #tpu.memory_space<vmem>>, vector<1x256x384xf32>
    %2 = vector.shape_cast %1 : vector<1x256x384xf32> to vector<256x384xf32>
    %cst = arith.constant dense<0.000000e+00> : vector<64x384xf32>
    %3 = tpu.matmul %0, %2, %cst {dimension_numbers = #tpu.dot_dimension_numbers<[1], [0], [0], [1], [0, 0, 1, 1], [], []>} : vector<64x256xf32>, vector<256x384xf32>, vector<64x384xf32> -> vector<64x384xf32>
    %c0_4 = arith.constant 0 : index
    %c0_5 = arith.constant 0 : index
    %c0_6 = arith.constant 0 : index
    %4 = vector.load %arg4[%c0_4, %c0_5, %c0_6] : memref<1x1x384xf32, #tpu.memory_space<vmem>>, vector<1x1x384xf32>
    %5 = vector.shape_cast %4 : vector<1x1x384xf32> to vector<1x384xf32>
    %6 = vector.broadcast %5 : vector<1x384xf32> to vector<64x384xf32>
    %7 = arith.addf %3, %6 : vector<64x384xf32>
    %c0_7 = arith.constant 0 : index
    %c0_8 = arith.constant 0 : index
    %8 = vector.load %arg7[%c0_7, %c0_8] : memref<64x384xf32, #tpu.memory_space<vmem>>, vector<64x384xf32>
    tpu.vector_store %arg7[%c0_7, %c0_8], %7 {strides = array<i32>} : memref<64x384xf32, #tpu.memory_space<vmem>>, vector<64x384xf32>,
    %c0_9 = arith.constant 0 : index
    %c0_10 = arith.constant 0 : index
    %c0_11 = arith.constant 0 : index
    %9 = vector.load %arg3[%c0_9, %c0_10, %c0_11] : memref<1x128x384xf32, #tpu.memory_space<vmem>>, vector<1x128x384xf32>
    %10 = vector.shape_cast %9 : vector<1x128x384xf32> to vector<128x384xf32>
    %c0_12 = arith.constant 0 : index
    %c0_13 = arith.constant 0 : index
    %c0_14 = arith.constant 0 : index
    %11 = vector.load %arg5[%c0_12, %c0_13, %c0_14] : memref<1x1x128xf32, #tpu.memory_space<vmem>>, vector<1x1x128xf32>
    %12 = vector.shape_cast %11 : vector<1x1x128xf32> to vector<1x128xf32>
    %cst_15 = arith.constant 0.000000e+00 : f32
    %13 = vector.broadcast %cst_15 : f32 to vector<8x128xf32>
    %c0_i32 = arith.constant 0 : i32
    %c0_i32_16 = arith.constant 0 : i32
    %14 = arith.cmpi eq, %arg0, %c0_i32_16 : i32
    %c7_i32 = arith.constant 7 : i32
    %15 = arith.subi %c7_i32, %c0_i32 : i32
    %16 = arith.select %14, %c0_i32, %15 : i32
    %c8_i32 = arith.constant 8 : i32
    %17 = arith.muli %16, %c8_i32 : i32
    %18 = tpu.assume_multiple %17, 8 : i32
    %19 = arith.index_cast %18 : i32 to index
    %c0_17 = arith.constant 0 : index
    %20 = vector.load %arg7[%19, %c0_17] : memref<64x384xf32, #tpu.memory_space<vmem>>, vector<8x384xf32>
    %cst_18 = arith.constant dense<0.000000e+00> : vector<8x384xf32>
    %21 = tpu.matmul %13, %10, %cst_18 {dimension_numbers = #tpu.dot_dimension_numbers<[1], [0], [0], [1], [0, 0, 1, 1], [], []>} : vector<8x128xf32>, vector<128x384xf32>, vector<8x384xf32> -> vector<8x384xf32>
    %22 = vector.extract_strided_slice %20 {offsets = [0, 0], sizes = [8, 128], strides = [1, 1]} : vector<8x384xf32> to vector<8x128xf32>
    %23 = vector.extract_strided_slice %21 {offsets = [0, 0], sizes = [8, 128], strides = [1, 1]} : vector<8x384xf32> to vector<8x128xf32>
    %24 = arith.addf %22, %23 : vector<8x128xf32>
    %25 = arith.negf %24 : vector<8x128xf32>
    %26 = math.exp %25 : vector<8x128xf32>
    %cst_19 = arith.constant 1.000000e+00 : f32
    %27 = vector.broadcast %cst_19 : f32 to vector<8x128xf32>
    %28 = arith.addf %27, %26 : vector<8x128xf32>
    %29 = arith.divf %27, %28 : vector<8x128xf32>
    %30 = vector.extract_strided_slice %20 {offsets = [0, 128], sizes = [8, 128], strides = [1, 1]} : vector<8x384xf32> to vector<8x128xf32>
    %31 = vector.extract_strided_slice %21 {offsets = [0, 128], sizes = [8, 128], strides = [1, 1]} : vector<8x384xf32> to vector<8x128xf32>
    %32 = arith.addf %30, %31 : vector<8x128xf32>
    %33 = arith.negf %32 : vector<8x128xf32>
    %34 = math.exp %33 : vector<8x128xf32>
    %cst_20 = arith.constant 1.000000e+00 : f32
    %35 = vector.broadcast %cst_20 : f32 to vector<8x128xf32>
    %36 = arith.addf %35, %34 : vector<8x128xf32>
    %37 = arith.divf %35, %36 : vector<8x128xf32>
    %38 = vector.extract_strided_slice %20 {offsets = [0, 256], sizes = [8, 128], strides = [1, 1]} : vector<8x384xf32> to vector<8x128xf32>
    %39 = vector.extract_strided_slice %21 {offsets = [0, 256], sizes = [8, 128], strides = [1, 1]} : vector<8x384xf32> to vector<8x128xf32>
    %40 = vector.broadcast %12 : vector<1x128xf32> to vector<8x128xf32>
    %41 = arith.addf %39, %40 : vector<8x128xf32>
    %42 = arith.mulf %29, %41 : vector<8x128xf32>
    %43 = arith.addf %38, %42 : vector<8x128xf32>
    %44 = math.tanh %43 : vector<8x128xf32>
    %cst_21 = arith.constant 1.000000e+00 : f32
    %45 = vector.broadcast %cst_21 : f32 to vector<8x128xf32>
    %46 = arith.subf %45, %37 : vector<8x128xf32>
    %47 = arith.mulf %46, %44 : vector<8x128xf32>
    %48 = arith.mulf %37, %13 : vector<8x128xf32>
    %49 = arith.addf %47, %48 : vector<8x128xf32>
    %50 = arith.index_cast %18 : i32 to index
    %c0_22 = arith.constant 0 : index
    %51 = vector.load %arg6[%50, %c0_22] : memref<64x128xf32, #tpu.memory_space<vmem>>, vector<8x128xf32>
    tpu.vector_store %arg6[%50, %c0_22], %49 {strides = array<i32>} : memref<64x128xf32, #tpu.memory_space<vmem>>, vector<8x128xf32>,
    %c1_i32 = arith.constant 1 : i32
    %c0_i32_23 = arith.constant 0 : i32
    %52 = arith.cmpi eq, %arg0, %c0_i32_23 : i32
    %c7_i32_24 = arith.constant 7 : i32
    %53 = arith.subi %c7_i32_24, %c1_i32 : i32
    %54 = arith.select %52, %c1_i32, %53 : i32
    %c8_i32_25 = arith.constant 8 : i32
    %55 = arith.muli %54, %c8_i32_25 : i32
    %56 = tpu.assume_multiple %55, 8 : i32
    %57 = arith.index_cast %56 : i32 to index
    %c0_26 = arith.constant 0 : index
    %58 = vector.load %arg7[%57, %c0_26] : memref<64x384xf32, #tpu.memory_space<vmem>>, vector<8x384xf32>
    %cst_27 = arith.constant dense<0.000000e+00> : vector<8x384xf32>
    %59 = tpu.matmul %49, %10, %cst_27 {dimension_numbers = #tpu.dot_dimension_numbers<[1], [0], [0], [1], [0, 0, 1, 1], [], []>} : vector<8x128xf32>, vector<128x384xf32>, vector<8x384xf32> -> vector<8x384xf32>
    %60 = vector.extract_strided_slice %58 {offsets = [0, 0], sizes = [8, 128], strides = [1, 1]} : vector<8x384xf32> to vector<8x128xf32>
    %61 = vector.extract_strided_slice %59 {offsets = [0, 0], sizes = [8, 128], strides = [1, 1]} : vector<8x384xf32> to vector<8x128xf32>
    %62 = arith.addf %60, %61 : vector<8x128xf32>
    %63 = arith.negf %62 : vector<8x128xf32>
    %64 = math.exp %63 : vector<8x128xf32>
    %cst_28 = arith.constant 1.000000e+00 : f32
    %65 = vector.broadcast %cst_28 : f32 to vector<8x128xf32>
    %66 = arith.addf %65, %64 : vector<8x128xf32>
    %67 = arith.divf %65, %66 : vector<8x128xf32>
    %68 = vector.extract_strided_slice %58 {offsets = [0, 128], sizes = [8, 128], strides = [1, 1]} : vector<8x384xf32> to vector<8x128xf32>
    %69 = vector.extract_strided_slice %59 {offsets = [0, 128], sizes = [8, 128], strides = [1, 1]} : vector<8x384xf32> to vector<8x128xf32>
    %70 = arith.addf %68, %69 : vector<8x128xf32>
    %71 = arith.negf %70 : vector<8x128xf32>
    %72 = math.exp %71 : vector<8x128xf32>
    %cst_29 = arith.constant 1.000000e+00 : f32
    %73 = vector.broadcast %cst_29 : f32 to vector<8x128xf32>
    %74 = arith.addf %73, %72 : vector<8x128xf32>
    %75 = arith.divf %73, %74 : vector<8x128xf32>
    %76 = vector.extract_strided_slice %58 {offsets = [0, 256], sizes = [8, 128], strides = [1, 1]} : vector<8x384xf32> to vector<8x128xf32>
    %77 = vector.extract_strided_slice %59 {offsets = [0, 256], sizes = [8, 128], strides = [1, 1]} : vector<8x384xf32> to vector<8x128xf32>
    %78 = vector.broadcast %12 : vector<1x128xf32> to vector<8x128xf32>
    %79 = arith.addf %77, %78 : vector<8x128xf32>
    %80 = arith.mulf %67, %79 : vector<8x128xf32>
    %81 = arith.addf %76, %80 : vector<8x128xf32>
    %82 = math.tanh %81 : vector<8x128xf32>
    %cst_30 = arith.constant 1.000000e+00 : f32
    %83 = vector.broadcast %cst_30 : f32 to vector<8x128xf32>
    %84 = arith.subf %83, %75 : vector<8x128xf32>
    %85 = arith.mulf %84, %82 : vector<8x128xf32>
    %86 = arith.mulf %75, %49 : vector<8x128xf32>
    %87 = arith.addf %85, %86 : vector<8x128xf32>
    %88 = arith.index_cast %56 : i32 to index
    %c0_31 = arith.constant 0 : index
    %89 = vector.load %arg6[%88, %c0_31] : memref<64x128xf32, #tpu.memory_space<vmem>>, vector<8x128xf32>
    tpu.vector_store %arg6[%88, %c0_31], %87 {strides = array<i32>} : memref<64x128xf32, #tpu.memory_space<vmem>>, vector<8x128xf32>,
    %c2_i32 = arith.constant 2 : i32
    %c0_i32_32 = arith.constant 0 : i32
    %90 = arith.cmpi eq, %arg0, %c0_i32_32 : i32
    %c7_i32_33 = arith.constant 7 : i32
    %91 = arith.subi %c7_i32_33, %c2_i32 : i32
    %92 = arith.select %90, %c2_i32, %91 : i32
    %c8_i32_34 = arith.constant 8 : i32
    %93 = arith.muli %92, %c8_i32_34 : i32
    %94 = tpu.assume_multiple %93, 8 : i32
    %95 = arith.index_cast %94 : i32 to index
    %c0_35 = arith.constant 0 : index
    %96 = vector.load %arg7[%95, %c0_35] : memref<64x384xf32, #tpu.memory_space<vmem>>, vector<8x384xf32>
    %cst_36 = arith.constant dense<0.000000e+00> : vector<8x384xf32>
    %97 = tpu.matmul %87, %10, %cst_36 {dimension_numbers = #tpu.dot_dimension_numbers<[1], [0], [0], [1], [0, 0, 1, 1], [], []>} : vector<8x128xf32>, vector<128x384xf32>, vector<8x384xf32> -> vector<8x384xf32>
    %98 = vector.extract_strided_slice %96 {offsets = [0, 0], sizes = [8, 128], strides = [1, 1]} : vector<8x384xf32> to vector<8x128xf32>
    %99 = vector.extract_strided_slice %97 {offsets = [0, 0], sizes = [8, 128], strides = [1, 1]} : vector<8x384xf32> to vector<8x128xf32>
    %100 = arith.addf %98, %99 : vector<8x128xf32>
    %101 = arith.negf %100 : vector<8x128xf32>
    %102 = math.exp %101 : vector<8x128xf32>
    %cst_37 = arith.constant 1.000000e+00 : f32
    %103 = vector.broadcast %cst_37 : f32 to vector<8x128xf32>
    %104 = arith.addf %103, %102 : vector<8x128xf32>
    %105 = arith.divf %103, %104 : vector<8x128xf32>
    %106 = vector.extract_strided_slice %96 {offsets = [0, 128], sizes = [8, 128], strides = [1, 1]} : vector<8x384xf32> to vector<8x128xf32>
    %107 = vector.extract_strided_slice %97 {offsets = [0, 128], sizes = [8, 128], strides = [1, 1]} : vector<8x384xf32> to vector<8x128xf32>
    %108 = arith.addf %106, %107 : vector<8x128xf32>
    %109 = arith.negf %108 : vector<8x128xf32>
    %110 = math.exp %109 : vector<8x128xf32>
    %cst_38 = arith.constant 1.000000e+00 : f32
    %111 = vector.broadcast %cst_38 : f32 to vector<8x128xf32>
    %112 = arith.addf %111, %110 : vector<8x128xf32>
    %113 = arith.divf %111, %112 : vector<8x128xf32>
    %114 = vector.extract_strided_slice %96 {offsets = [0, 256], sizes = [8, 128], strides = [1, 1]} : vector<8x384xf32> to vector<8x128xf32>
    %115 = vector.extract_strided_slice %97 {offsets = [0, 256], sizes = [8, 128], strides = [1, 1]} : vector<8x384xf32> to vector<8x128xf32>
    %116 = vector.broadcast %12 : vector<1x128xf32> to vector<8x128xf32>
    %117 = arith.addf %115, %116 : vector<8x128xf32>
    %118 = arith.mulf %105, %117 : vector<8x128xf32>
    %119 = arith.addf %114, %118 : vector<8x128xf32>
    %120 = math.tanh %119 : vector<8x128xf32>
    %cst_39 = arith.constant 1.000000e+00 : f32
    %121 = vector.broadcast %cst_39 : f32 to vector<8x128xf32>
    %122 = arith.subf %121, %113 : vector<8x128xf32>
    %123 = arith.mulf %122, %120 : vector<8x128xf32>
    %124 = arith.mulf %113, %87 : vector<8x128xf32>
    %125 = arith.addf %123, %124 : vector<8x128xf32>
    %126 = arith.index_cast %94 : i32 to index
    %c0_40 = arith.constant 0 : index
    %127 = vector.load %arg6[%126, %c0_40] : memref<64x128xf32, #tpu.memory_space<vmem>>, vector<8x128xf32>
    tpu.vector_store %arg6[%126, %c0_40], %125 {strides = array<i32>} : memref<64x128xf32, #tpu.memory_space<vmem>>, vector<8x128xf32>,
    %c3_i32 = arith.constant 3 : i32
    %c0_i32_41 = arith.constant 0 : i32
    %128 = arith.cmpi eq, %arg0, %c0_i32_41 : i32
    %c7_i32_42 = arith.constant 7 : i32
    %129 = arith.subi %c7_i32_42, %c3_i32 : i32
    %130 = arith.select %128, %c3_i32, %129 : i32
    %c8_i32_43 = arith.constant 8 : i32
    %131 = arith.muli %130, %c8_i32_43 : i32
    %132 = tpu.assume_multiple %131, 8 : i32
    %133 = arith.index_cast %132 : i32 to index
    %c0_44 = arith.constant 0 : index
    %134 = vector.load %arg7[%133, %c0_44] : memref<64x384xf32, #tpu.memory_space<vmem>>, vector<8x384xf32>
    %cst_45 = arith.constant dense<0.000000e+00> : vector<8x384xf32>
    %135 = tpu.matmul %125, %10, %cst_45 {dimension_numbers = #tpu.dot_dimension_numbers<[1], [0], [0], [1], [0, 0, 1, 1], [], []>} : vector<8x128xf32>, vector<128x384xf32>, vector<8x384xf32> -> vector<8x384xf32>
    %136 = vector.extract_strided_slice %134 {offsets = [0, 0], sizes = [8, 128], strides = [1, 1]} : vector<8x384xf32> to vector<8x128xf32>
    %137 = vector.extract_strided_slice %135 {offsets = [0, 0], sizes = [8, 128], strides = [1, 1]} : vector<8x384xf32> to vector<8x128xf32>
    %138 = arith.addf %136, %137 : vector<8x128xf32>
    %139 = arith.negf %138 : vector<8x128xf32>
    %140 = math.exp %139 : vector<8x128xf32>
    %cst_46 = arith.constant 1.000000e+00 : f32
    %141 = vector.broadcast %cst_46 : f32 to vector<8x128xf32>
    %142 = arith.addf %141, %140 : vector<8x128xf32>
    %143 = arith.divf %141, %142 : vector<8x128xf32>
    %144 = vector.extract_strided_slice %134 {offsets = [0, 128], sizes = [8, 128], strides = [1, 1]} : vector<8x384xf32> to vector<8x128xf32>
    %145 = vector.extract_strided_slice %135 {offsets = [0, 128], sizes = [8, 128], strides = [1, 1]} : vector<8x384xf32> to vector<8x128xf32>
    %146 = arith.addf %144, %145 : vector<8x128xf32>
    %147 = arith.negf %146 : vector<8x128xf32>
    %148 = math.exp %147 : vector<8x128xf32>
    %cst_47 = arith.constant 1.000000e+00 : f32
    %149 = vector.broadcast %cst_47 : f32 to vector<8x128xf32>
    %150 = arith.addf %149, %148 : vector<8x128xf32>
    %151 = arith.divf %149, %150 : vector<8x128xf32>
    %152 = vector.extract_strided_slice %134 {offsets = [0, 256], sizes = [8, 128], strides = [1, 1]} : vector<8x384xf32> to vector<8x128xf32>
    %153 = vector.extract_strided_slice %135 {offsets = [0, 256], sizes = [8, 128], strides = [1, 1]} : vector<8x384xf32> to vector<8x128xf32>
    %154 = vector.broadcast %12 : vector<1x128xf32> to vector<8x128xf32>
    %155 = arith.addf %153, %154 : vector<8x128xf32>
    %156 = arith.mulf %143, %155 : vector<8x128xf32>
    %157 = arith.addf %152, %156 : vector<8x128xf32>
    %158 = math.tanh %157 : vector<8x128xf32>
    %cst_48 = arith.constant 1.000000e+00 : f32
    %159 = vector.broadcast %cst_48 : f32 to vector<8x128xf32>
    %160 = arith.subf %159, %151 : vector<8x128xf32>
    %161 = arith.mulf %160, %158 : vector<8x128xf32>
    %162 = arith.mulf %151, %125 : vector<8x128xf32>
    %163 = arith.addf %161, %162 : vector<8x128xf32>
    %164 = arith.index_cast %132 : i32 to index
    %c0_49 = arith.constant 0 : index
    %165 = vector.load %arg6[%164, %c0_49] : memref<64x128xf32, #tpu.memory_space<vmem>>, vector<8x128xf32>
    tpu.vector_store %arg6[%164, %c0_49], %163 {strides = array<i32>} : memref<64x128xf32, #tpu.memory_space<vmem>>, vector<8x128xf32>,
    %c4_i32 = arith.constant 4 : i32
    %c0_i32_50 = arith.constant 0 : i32
    %166 = arith.cmpi eq, %arg0, %c0_i32_50 : i32
    %c7_i32_51 = arith.constant 7 : i32
    %167 = arith.subi %c7_i32_51, %c4_i32 : i32
    %168 = arith.select %166, %c4_i32, %167 : i32
    %c8_i32_52 = arith.constant 8 : i32
    %169 = arith.muli %168, %c8_i32_52 : i32
    %170 = tpu.assume_multiple %169, 8 : i32
    %171 = arith.index_cast %170 : i32 to index
    %c0_53 = arith.constant 0 : index
    %172 = vector.load %arg7[%171, %c0_53] : memref<64x384xf32, #tpu.memory_space<vmem>>, vector<8x384xf32>
    %cst_54 = arith.constant dense<0.000000e+00> : vector<8x384xf32>
    %173 = tpu.matmul %163, %10, %cst_54 {dimension_numbers = #tpu.dot_dimension_numbers<[1], [0], [0], [1], [0, 0, 1, 1], [], []>} : vector<8x128xf32>, vector<128x384xf32>, vector<8x384xf32> -> vector<8x384xf32>
    %174 = vector.extract_strided_slice %172 {offsets = [0, 0], sizes = [8, 128], strides = [1, 1]} : vector<8x384xf32> to vector<8x128xf32>
    %175 = vector.extract_strided_slice %173 {offsets = [0, 0], sizes = [8, 128], strides = [1, 1]} : vector<8x384xf32> to vector<8x128xf32>
    %176 = arith.addf %174, %175 : vector<8x128xf32>
    %177 = arith.negf %176 : vector<8x128xf32>
    %178 = math.exp %177 : vector<8x128xf32>
    %cst_55 = arith.constant 1.000000e+00 : f32
    %179 = vector.broadcast %cst_55 : f32 to vector<8x128xf32>
    %180 = arith.addf %179, %178 : vector<8x128xf32>
    %181 = arith.divf %179, %180 : vector<8x128xf32>
    %182 = vector.extract_strided_slice %172 {offsets = [0, 128], sizes = [8, 128], strides = [1, 1]} : vector<8x384xf32> to vector<8x128xf32>
    %183 = vector.extract_strided_slice %173 {offsets = [0, 128], sizes = [8, 128], strides = [1, 1]} : vector<8x384xf32> to vector<8x128xf32>
    %184 = arith.addf %182, %183 : vector<8x128xf32>
    %185 = arith.negf %184 : vector<8x128xf32>
    %186 = math.exp %185 : vector<8x128xf32>
    %cst_56 = arith.constant 1.000000e+00 : f32
    %187 = vector.broadcast %cst_56 : f32 to vector<8x128xf32>
    %188 = arith.addf %187, %186 : vector<8x128xf32>
    %189 = arith.divf %187, %188 : vector<8x128xf32>
    %190 = vector.extract_strided_slice %172 {offsets = [0, 256], sizes = [8, 128], strides = [1, 1]} : vector<8x384xf32> to vector<8x128xf32>
    %191 = vector.extract_strided_slice %173 {offsets = [0, 256], sizes = [8, 128], strides = [1, 1]} : vector<8x384xf32> to vector<8x128xf32>
    %192 = vector.broadcast %12 : vector<1x128xf32> to vector<8x128xf32>
    %193 = arith.addf %191, %192 : vector<8x128xf32>
    %194 = arith.mulf %181, %193 : vector<8x128xf32>
    %195 = arith.addf %190, %194 : vector<8x128xf32>
    %196 = math.tanh %195 : vector<8x128xf32>
    %cst_57 = arith.constant 1.000000e+00 : f32
    %197 = vector.broadcast %cst_57 : f32 to vector<8x128xf32>
    %198 = arith.subf %197, %189 : vector<8x128xf32>
    %199 = arith.mulf %198, %196 : vector<8x128xf32>
    %200 = arith.mulf %189, %163 : vector<8x128xf32>
    %201 = arith.addf %199, %200 : vector<8x128xf32>
    %202 = arith.index_cast %170 : i32 to index
    %c0_58 = arith.constant 0 : index
    %203 = vector.load %arg6[%202, %c0_58] : memref<64x128xf32, #tpu.memory_space<vmem>>, vector<8x128xf32>
    tpu.vector_store %arg6[%202, %c0_58], %201 {strides = array<i32>} : memref<64x128xf32, #tpu.memory_space<vmem>>, vector<8x128xf32>,
    %c5_i32 = arith.constant 5 : i32
    %c0_i32_59 = arith.constant 0 : i32
    %204 = arith.cmpi eq, %arg0, %c0_i32_59 : i32
    %c7_i32_60 = arith.constant 7 : i32
    %205 = arith.subi %c7_i32_60, %c5_i32 : i32
    %206 = arith.select %204, %c5_i32, %205 : i32
    %c8_i32_61 = arith.constant 8 : i32
    %207 = arith.muli %206, %c8_i32_61 : i32
    %208 = tpu.assume_multiple %207, 8 : i32
    %209 = arith.index_cast %208 : i32 to index
    %c0_62 = arith.constant 0 : index
    %210 = vector.load %arg7[%209, %c0_62] : memref<64x384xf32, #tpu.memory_space<vmem>>, vector<8x384xf32>
    %cst_63 = arith.constant dense<0.000000e+00> : vector<8x384xf32>
    %211 = tpu.matmul %201, %10, %cst_63 {dimension_numbers = #tpu.dot_dimension_numbers<[1], [0], [0], [1], [0, 0, 1, 1], [], []>} : vector<8x128xf32>, vector<128x384xf32>, vector<8x384xf32> -> vector<8x384xf32>
    %212 = vector.extract_strided_slice %210 {offsets = [0, 0], sizes = [8, 128], strides = [1, 1]} : vector<8x384xf32> to vector<8x128xf32>
    %213 = vector.extract_strided_slice %211 {offsets = [0, 0], sizes = [8, 128], strides = [1, 1]} : vector<8x384xf32> to vector<8x128xf32>
    %214 = arith.addf %212, %213 : vector<8x128xf32>
    %215 = arith.negf %214 : vector<8x128xf32>
    %216 = math.exp %215 : vector<8x128xf32>
    %cst_64 = arith.constant 1.000000e+00 : f32
    %217 = vector.broadcast %cst_64 : f32 to vector<8x128xf32>
    %218 = arith.addf %217, %216 : vector<8x128xf32>
    %219 = arith.divf %217, %218 : vector<8x128xf32>
    %220 = vector.extract_strided_slice %210 {offsets = [0, 128], sizes = [8, 128], strides = [1, 1]} : vector<8x384xf32> to vector<8x128xf32>
    %221 = vector.extract_strided_slice %211 {offsets = [0, 128], sizes = [8, 128], strides = [1, 1]} : vector<8x384xf32> to vector<8x128xf32>
    %222 = arith.addf %220, %221 : vector<8x128xf32>
    %223 = arith.negf %222 : vector<8x128xf32>
    %224 = math.exp %223 : vector<8x128xf32>
    %cst_65 = arith.constant 1.000000e+00 : f32
    %225 = vector.broadcast %cst_65 : f32 to vector<8x128xf32>
    %226 = arith.addf %225, %224 : vector<8x128xf32>
    %227 = arith.divf %225, %226 : vector<8x128xf32>
    %228 = vector.extract_strided_slice %210 {offsets = [0, 256], sizes = [8, 128], strides = [1, 1]} : vector<8x384xf32> to vector<8x128xf32>
    %229 = vector.extract_strided_slice %211 {offsets = [0, 256], sizes = [8, 128], strides = [1, 1]} : vector<8x384xf32> to vector<8x128xf32>
    %230 = vector.broadcast %12 : vector<1x128xf32> to vector<8x128xf32>
    %231 = arith.addf %229, %230 : vector<8x128xf32>
    %232 = arith.mulf %219, %231 : vector<8x128xf32>
    %233 = arith.addf %228, %232 : vector<8x128xf32>
    %234 = math.tanh %233 : vector<8x128xf32>
    %cst_66 = arith.constant 1.000000e+00 : f32
    %235 = vector.broadcast %cst_66 : f32 to vector<8x128xf32>
    %236 = arith.subf %235, %227 : vector<8x128xf32>
    %237 = arith.mulf %236, %234 : vector<8x128xf32>
    %238 = arith.mulf %227, %201 : vector<8x128xf32>
    %239 = arith.addf %237, %238 : vector<8x128xf32>
    %240 = arith.index_cast %208 : i32 to index
    %c0_67 = arith.constant 0 : index
    %241 = vector.load %arg6[%240, %c0_67] : memref<64x128xf32, #tpu.memory_space<vmem>>, vector<8x128xf32>
    tpu.vector_store %arg6[%240, %c0_67], %239 {strides = array<i32>} : memref<64x128xf32, #tpu.memory_space<vmem>>, vector<8x128xf32>,
    %c6_i32 = arith.constant 6 : i32
    %c0_i32_68 = arith.constant 0 : i32
    %242 = arith.cmpi eq, %arg0, %c0_i32_68 : i32
    %c7_i32_69 = arith.constant 7 : i32
    %243 = arith.subi %c7_i32_69, %c6_i32 : i32
    %244 = arith.select %242, %c6_i32, %243 : i32
    %c8_i32_70 = arith.constant 8 : i32
    %245 = arith.muli %244, %c8_i32_70 : i32
    %246 = tpu.assume_multiple %245, 8 : i32
    %247 = arith.index_cast %246 : i32 to index
    %c0_71 = arith.constant 0 : index
    %248 = vector.load %arg7[%247, %c0_71] : memref<64x384xf32, #tpu.memory_space<vmem>>, vector<8x384xf32>
    %cst_72 = arith.constant dense<0.000000e+00> : vector<8x384xf32>
    %249 = tpu.matmul %239, %10, %cst_72 {dimension_numbers = #tpu.dot_dimension_numbers<[1], [0], [0], [1], [0, 0, 1, 1], [], []>} : vector<8x128xf32>, vector<128x384xf32>, vector<8x384xf32> -> vector<8x384xf32>
    %250 = vector.extract_strided_slice %248 {offsets = [0, 0], sizes = [8, 128], strides = [1, 1]} : vector<8x384xf32> to vector<8x128xf32>
    %251 = vector.extract_strided_slice %249 {offsets = [0, 0], sizes = [8, 128], strides = [1, 1]} : vector<8x384xf32> to vector<8x128xf32>
    %252 = arith.addf %250, %251 : vector<8x128xf32>
    %253 = arith.negf %252 : vector<8x128xf32>
    %254 = math.exp %253 : vector<8x128xf32>
    %cst_73 = arith.constant 1.000000e+00 : f32
    %255 = vector.broadcast %cst_73 : f32 to vector<8x128xf32>
    %256 = arith.addf %255, %254 : vector<8x128xf32>
    %257 = arith.divf %255, %256 : vector<8x128xf32>
    %258 = vector.extract_strided_slice %248 {offsets = [0, 128], sizes = [8, 128], strides = [1, 1]} : vector<8x384xf32> to vector<8x128xf32>
    %259 = vector.extract_strided_slice %249 {offsets = [0, 128], sizes = [8, 128], strides = [1, 1]} : vector<8x384xf32> to vector<8x128xf32>
    %260 = arith.addf %258, %259 : vector<8x128xf32>
    %261 = arith.negf %260 : vector<8x128xf32>
    %262 = math.exp %261 : vector<8x128xf32>
    %cst_74 = arith.constant 1.000000e+00 : f32
    %263 = vector.broadcast %cst_74 : f32 to vector<8x128xf32>
    %264 = arith.addf %263, %262 : vector<8x128xf32>
    %265 = arith.divf %263, %264 : vector<8x128xf32>
    %266 = vector.extract_strided_slice %248 {offsets = [0, 256], sizes = [8, 128], strides = [1, 1]} : vector<8x384xf32> to vector<8x128xf32>
    %267 = vector.extract_strided_slice %249 {offsets = [0, 256], sizes = [8, 128], strides = [1, 1]} : vector<8x384xf32> to vector<8x128xf32>
    %268 = vector.broadcast %12 : vector<1x128xf32> to vector<8x128xf32>
    %269 = arith.addf %267, %268 : vector<8x128xf32>
    %270 = arith.mulf %257, %269 : vector<8x128xf32>
    %271 = arith.addf %266, %270 : vector<8x128xf32>
    %272 = math.tanh %271 : vector<8x128xf32>
    %cst_75 = arith.constant 1.000000e+00 : f32
    %273 = vector.broadcast %cst_75 : f32 to vector<8x128xf32>
    %274 = arith.subf %273, %265 : vector<8x128xf32>
    %275 = arith.mulf %274, %272 : vector<8x128xf32>
    %276 = arith.mulf %265, %239 : vector<8x128xf32>
    %277 = arith.addf %275, %276 : vector<8x128xf32>
    %278 = arith.index_cast %246 : i32 to index
    %c0_76 = arith.constant 0 : index
    %279 = vector.load %arg6[%278, %c0_76] : memref<64x128xf32, #tpu.memory_space<vmem>>, vector<8x128xf32>
    tpu.vector_store %arg6[%278, %c0_76], %277 {strides = array<i32>} : memref<64x128xf32, #tpu.memory_space<vmem>>, vector<8x128xf32>,
    %c7_i32_77 = arith.constant 7 : i32
    %c0_i32_78 = arith.constant 0 : i32
    %280 = arith.cmpi eq, %arg0, %c0_i32_78 : i32
    %c7_i32_79 = arith.constant 7 : i32
    %281 = arith.subi %c7_i32_79, %c7_i32_77 : i32
    %282 = arith.select %280, %c7_i32_77, %281 : i32
    %c8_i32_80 = arith.constant 8 : i32
    %283 = arith.muli %282, %c8_i32_80 : i32
    %284 = tpu.assume_multiple %283, 8 : i32
    %285 = arith.index_cast %284 : i32 to index
    %c0_81 = arith.constant 0 : index
    %286 = vector.load %arg7[%285, %c0_81] : memref<64x384xf32, #tpu.memory_space<vmem>>, vector<8x384xf32>
    %cst_82 = arith.constant dense<0.000000e+00> : vector<8x384xf32>
    %287 = tpu.matmul %277, %10, %cst_82 {dimension_numbers = #tpu.dot_dimension_numbers<[1], [0], [0], [1], [0, 0, 1, 1], [], []>} : vector<8x128xf32>, vector<128x384xf32>, vector<8x384xf32> -> vector<8x384xf32>
    %288 = vector.extract_strided_slice %286 {offsets = [0, 0], sizes = [8, 128], strides = [1, 1]} : vector<8x384xf32> to vector<8x128xf32>
    %289 = vector.extract_strided_slice %287 {offsets = [0, 0], sizes = [8, 128], strides = [1, 1]} : vector<8x384xf32> to vector<8x128xf32>
    %290 = arith.addf %288, %289 : vector<8x128xf32>
    %291 = arith.negf %290 : vector<8x128xf32>
    %292 = math.exp %291 : vector<8x128xf32>
    %cst_83 = arith.constant 1.000000e+00 : f32
    %293 = vector.broadcast %cst_83 : f32 to vector<8x128xf32>
    %294 = arith.addf %293, %292 : vector<8x128xf32>
    %295 = arith.divf %293, %294 : vector<8x128xf32>
    %296 = vector.extract_strided_slice %286 {offsets = [0, 128], sizes = [8, 128], strides = [1, 1]} : vector<8x384xf32> to vector<8x128xf32>
    %297 = vector.extract_strided_slice %287 {offsets = [0, 128], sizes = [8, 128], strides = [1, 1]} : vector<8x384xf32> to vector<8x128xf32>
    %298 = arith.addf %296, %297 : vector<8x128xf32>
    %299 = arith.negf %298 : vector<8x128xf32>
    %300 = math.exp %299 : vector<8x128xf32>
    %cst_84 = arith.constant 1.000000e+00 : f32
    %301 = vector.broadcast %cst_84 : f32 to vector<8x128xf32>
    %302 = arith.addf %301, %300 : vector<8x128xf32>
    %303 = arith.divf %301, %302 : vector<8x128xf32>
    %304 = vector.extract_strided_slice %286 {offsets = [0, 256], sizes = [8, 128], strides = [1, 1]} : vector<8x384xf32> to vector<8x128xf32>
    %305 = vector.extract_strided_slice %287 {offsets = [0, 256], sizes = [8, 128], strides = [1, 1]} : vector<8x384xf32> to vector<8x128xf32>
    %306 = vector.broadcast %12 : vector<1x128xf32> to vector<8x128xf32>
    %307 = arith.addf %305, %306 : vector<8x128xf32>
    %308 = arith.mulf %295, %307 : vector<8x128xf32>
    %309 = arith.addf %304, %308 : vector<8x128xf32>
    %310 = math.tanh %309 : vector<8x128xf32>
    %cst_85 = arith.constant 1.000000e+00 : f32
    %311 = vector.broadcast %cst_85 : f32 to vector<8x128xf32>
    %312 = arith.subf %311, %303 : vector<8x128xf32>
    %313 = arith.mulf %312, %310 : vector<8x128xf32>
    %314 = arith.mulf %303, %277 : vector<8x128xf32>
    %315 = arith.addf %313, %314 : vector<8x128xf32>
    %316 = arith.index_cast %284 : i32 to index
    %c0_86 = arith.constant 0 : index
    %317 = vector.load %arg6[%316, %c0_86] : memref<64x128xf32, #tpu.memory_space<vmem>>, vector<8x128xf32>
    tpu.vector_store %arg6[%316, %c0_86], %315 {strides = array<i32>} : memref<64x128xf32, #tpu.memory_space<vmem>>, vector<8x128xf32>,
    %c8_i32_87 = arith.constant 8 : i32
    return
  }
  func.func @transform_0(%arg0: i32) -> (i32, i32) {
    %c0_i32 = arith.constant 0 : i32
    %c0_i32_0 = arith.constant 0 : i32
    %c0_i32_1 = arith.constant 0 : i32
    return %c0_i32, %c0_i32_0 : i32, i32
  }
  func.func @transform_1(%arg0: i32) -> (i32, i32, i32) {
    %c0_i32 = arith.constant 0 : i32
    %c0_i32_0 = arith.constant 0 : i32
    %c0_i32_1 = arith.constant 0 : i32
    return %arg0, %c0_i32, %c0_i32_0 : i32, i32, i32
  }
  func.func @transform_2(%arg0: i32) -> (i32, i32, i32) {
    %c0_i32 = arith.constant 0 : i32
    %c0_i32_0 = arith.constant 0 : i32
    %c0_i32_1 = arith.constant 0 : i32
    return %arg0, %c0_i32, %c0_i32_0 : i32, i32, i32
  }
  func.func @transform_3(%arg0: i32) -> (i32, i32, i32) {
    %c0_i32 = arith.constant 0 : i32
    %c0_i32_0 = arith.constant 0 : i32
    %c0_i32_1 = arith.constant 0 : i32
    return %arg0, %c0_i32, %c0_i32_0 : i32, i32, i32
  }
  func.func @transform_4(%arg0: i32) -> (i32, i32, i32) {
    %c0_i32 = arith.constant 0 : i32
    %c0_i32_0 = arith.constant 0 : i32
    %c0_i32_1 = arith.constant 0 : i32
    return %arg0, %c0_i32, %c0_i32_0 : i32, i32, i32
  }
  func.func @transform_5(%arg0: i32) -> (i32, i32) {
    %c0_i32 = arith.constant 0 : i32
    %c0_i32_0 = arith.constant 0 : i32
    return %c0_i32, %arg0 : i32, i32
  }
}

module attributes {stable_mosaic.version = 11 : i64} {
  func.func @kernel(%arg0: i32, %arg1: memref<64x16xf32, #tpu.memory_space<vmem>>, %arg2: memref<1x16x384xf32, #tpu.memory_space<vmem>>, %arg3: memref<1x128x384xf32, #tpu.memory_space<vmem>>, %arg4: memref<1x1x384xf32, #tpu.memory_space<vmem>>, %arg5: memref<1x1x128xf32, #tpu.memory_space<vmem>>, %arg6: memref<64x128xf32, #tpu.memory_space<vmem>>, %arg7: memref<64x384xf32, #tpu.memory_space<vmem>>) attributes {dimension_semantics = [#tpu.dimension_semantics<parallel>], iteration_bounds = array<i64: 2>, scalar_prefetch = 0 : i64, scratch_operands = 1 : i64, tpu.core_type = #tpu.core_type<tc>, window_params = [{pipeline_mode = #tpu.pipeline_mode<synchronous>, transform_indices = @transform_0, window_bounds = array<i64: 64, 16>}, {transform_indices = @transform_1, window_bounds = array<i64: 1, 16, 384>}, {transform_indices = @transform_2, window_bounds = array<i64: 1, 128, 384>}, {transform_indices = @transform_3, window_bounds = array<i64: 1, 1, 384>}, {transform_indices = @transform_4, window_bounds = array<i64: 1, 1, 128>}, {transform_indices = @transform_5, window_bounds = array<i64: 64, 128>}]} {
    %c0 = arith.constant 0 : index
    %c0_0 = arith.constant 0 : index
    %0 = vector.load %arg1[%c0, %c0_0] : memref<64x16xf32, #tpu.memory_space<vmem>>, vector<64x16xf32>
    %c0_1 = arith.constant 0 : index
    %c0_2 = arith.constant 0 : index
    %c0_3 = arith.constant 0 : index
    %1 = vector.load %arg2[%c0_1, %c0_2, %c0_3] : memref<1x16x384xf32, #tpu.memory_space<vmem>>, vector<1x16x384xf32>
    %2 = vector.shape_cast %1 : vector<1x16x384xf32> to vector<16x384xf32>
    %cst = arith.constant dense<0.000000e+00> : vector<64x384xf32>
    %3 = tpu.matmul %0, %2, %cst {dimension_numbers = #tpu.dot_dimension_numbers<[1], [0], [0], [1], [0, 0, 1, 1], [], []>} : vector<64x16xf32>, vector<16x384xf32>, vector<64x384xf32> -> vector<64x384xf32>
    %c0_4 = arith.constant 0 : index
    %c0_5 = arith.constant 0 : index
    %c0_6 = arith.constant 0 : index
    %4 = vector.load %arg4[%c0_4, %c0_5, %c0_6] : memref<1x1x384xf32, #tpu.memory_space<vmem>>, vector<1x1x384xf32>
    %5 = vector.shape_cast %4 : vector<1x1x384xf32> to vector<1x384xf32>
    %6 = vector.broadcast %5 : vector<1x384xf32> to vector<64x384xf32>
    %7 = arith.addf %3, %6 : vector<64x384xf32>
    %c0_7 = arith.constant 0 : index
    %c0_8 = arith.constant 0 : index
    %8 = vector.load %arg7[%c0_7, %c0_8] : memref<64x384xf32, #tpu.memory_space<vmem>>, vector<64x384xf32>
    tpu.vector_store %arg7[%c0_7, %c0_8], %7 {strides = array<i32>} : memref<64x384xf32, #tpu.memory_space<vmem>>, vector<64x384xf32>,
    %c0_9 = arith.constant 0 : index
    %c0_10 = arith.constant 0 : index
    %c0_11 = arith.constant 0 : index
    %9 = vector.load %arg3[%c0_9, %c0_10, %c0_11] : memref<1x128x384xf32, #tpu.memory_space<vmem>>, vector<1x128x384xf32>
    %10 = vector.shape_cast %9 : vector<1x128x384xf32> to vector<128x384xf32>
    %c0_12 = arith.constant 0 : index
    %c0_13 = arith.constant 0 : index
    %c0_14 = arith.constant 0 : index
    %11 = vector.load %arg5[%c0_12, %c0_13, %c0_14] : memref<1x1x128xf32, #tpu.memory_space<vmem>>, vector<1x1x128xf32>
    %12 = vector.shape_cast %11 : vector<1x1x128xf32> to vector<1x128xf32>
    %cst_15 = arith.constant 0.000000e+00 : f32
    %13 = vector.broadcast %cst_15 : f32 to vector<8x128xf32>
    %c0_i32 = arith.constant 0 : i32
    %c0_i32_16 = arith.constant 0 : i32
    %14 = arith.cmpi eq, %arg0, %c0_i32_16 : i32
    %c7_i32 = arith.constant 7 : i32
    %15 = arith.subi %c7_i32, %c0_i32 : i32
    %16 = arith.select %14, %c0_i32, %15 : i32
    %c8_i32 = arith.constant 8 : i32
    %17 = arith.muli %16, %c8_i32 : i32
    %18 = tpu.assume_multiple %17, 8 : i32
    %19 = arith.index_cast %18 : i32 to index
    %c0_17 = arith.constant 0 : index
    %20 = vector.load %arg7[%19, %c0_17] : memref<64x384xf32, #tpu.memory_space<vmem>>, vector<8x384xf32>
    %cst_18 = arith.constant dense<0.000000e+00> : vector<8x384xf32>
    %21 = tpu.matmul %13, %10, %cst_18 {dimension_numbers = #tpu.dot_dimension_numbers<[1], [0], [0], [1], [0, 0, 1, 1], [], []>} : vector<8x128xf32>, vector<128x384xf32>, vector<8x384xf32> -> vector<8x384xf32>
    %22 = vector.extract_strided_slice %20 {offsets = [0, 0], sizes = [8, 128], strides = [1, 1]} : vector<8x384xf32> to vector<8x128xf32>
    %23 = vector.extract_strided_slice %21 {offsets = [0, 0], sizes = [8, 128], strides = [1, 1]} : vector<8x384xf32> to vector<8x128xf32>
    %24 = arith.addf %22, %23 : vector<8x128xf32>
    %25 = arith.negf %24 : vector<8x128xf32>
    %26 = math.exp %25 : vector<8x128xf32>
    %cst_19 = arith.constant 1.000000e+00 : f32
    %27 = vector.broadcast %cst_19 : f32 to vector<8x128xf32>
    %28 = arith.addf %27, %26 : vector<8x128xf32>
    %29 = arith.divf %27, %28 : vector<8x128xf32>
    %30 = vector.extract_strided_slice %20 {offsets = [0, 128], sizes = [8, 128], strides = [1, 1]} : vector<8x384xf32> to vector<8x128xf32>
    %31 = vector.extract_strided_slice %21 {offsets = [0, 128], sizes = [8, 128], strides = [1, 1]} : vector<8x384xf32> to vector<8x128xf32>
    %32 = arith.addf %30, %31 : vector<8x128xf32>
    %33 = arith.negf %32 : vector<8x128xf32>
    %34 = math.exp %33 : vector<8x128xf32>
    %cst_20 = arith.constant 1.000000e+00 : f32
    %35 = vector.broadcast %cst_20 : f32 to vector<8x128xf32>
    %36 = arith.addf %35, %34 : vector<8x128xf32>
    %37 = arith.divf %35, %36 : vector<8x128xf32>
    %38 = vector.extract_strided_slice %20 {offsets = [0, 256], sizes = [8, 128], strides = [1, 1]} : vector<8x384xf32> to vector<8x128xf32>
    %39 = vector.extract_strided_slice %21 {offsets = [0, 256], sizes = [8, 128], strides = [1, 1]} : vector<8x384xf32> to vector<8x128xf32>
    %40 = vector.broadcast %12 : vector<1x128xf32> to vector<8x128xf32>
    %41 = arith.addf %39, %40 : vector<8x128xf32>
    %42 = arith.mulf %29, %41 : vector<8x128xf32>
    %43 = arith.addf %38, %42 : vector<8x128xf32>
    %44 = math.tanh %43 : vector<8x128xf32>
    %cst_21 = arith.constant 1.000000e+00 : f32
    %45 = vector.broadcast %cst_21 : f32 to vector<8x128xf32>
    %46 = arith.subf %45, %37 : vector<8x128xf32>
    %47 = arith.mulf %46, %44 : vector<8x128xf32>
    %48 = arith.mulf %37, %13 : vector<8x128xf32>
    %49 = arith.addf %47, %48 : vector<8x128xf32>
    %50 = arith.index_cast %18 : i32 to index
    %c0_22 = arith.constant 0 : index
    %51 = vector.load %arg6[%50, %c0_22] : memref<64x128xf32, #tpu.memory_space<vmem>>, vector<8x128xf32>
    tpu.vector_store %arg6[%50, %c0_22], %49 {strides = array<i32>} : memref<64x128xf32, #tpu.memory_space<vmem>>, vector<8x128xf32>,
    %c1_i32 = arith.constant 1 : i32
    %c0_i32_23 = arith.constant 0 : i32
    %52 = arith.cmpi eq, %arg0, %c0_i32_23 : i32
    %c7_i32_24 = arith.constant 7 : i32
    %53 = arith.subi %c7_i32_24, %c1_i32 : i32
    %54 = arith.select %52, %c1_i32, %53 : i32
    %c8_i32_25 = arith.constant 8 : i32
    %55 = arith.muli %54, %c8_i32_25 : i32
    %56 = tpu.assume_multiple %55, 8 : i32
    %57 = arith.index_cast %56 : i32 to index
    %c0_26 = arith.constant 0 : index
    %58 = vector.load %arg7[%57, %c0_26] : memref<64x384xf32, #tpu.memory_space<vmem>>, vector<8x384xf32>
    %cst_27 = arith.constant dense<0.000000e+00> : vector<8x384xf32>
    %59 = tpu.matmul %49, %10, %cst_27 {dimension_numbers = #tpu.dot_dimension_numbers<[1], [0], [0], [1], [0, 0, 1, 1], [], []>} : vector<8x128xf32>, vector<128x384xf32>, vector<8x384xf32> -> vector<8x384xf32>
    %60 = vector.extract_strided_slice %58 {offsets = [0, 0], sizes = [8, 128], strides = [1, 1]} : vector<8x384xf32> to vector<8x128xf32>
    %61 = vector.extract_strided_slice %59 {offsets = [0, 0], sizes = [8, 128], strides = [1, 1]} : vector<8x384xf32> to vector<8x128xf32>
    %62 = arith.addf %60, %61 : vector<8x128xf32>
    %63 = arith.negf %62 : vector<8x128xf32>
    %64 = math.exp %63 : vector<8x128xf32>
    %cst_28 = arith.constant 1.000000e+00 : f32
    %65 = vector.broadcast %cst_28 : f32 to vector<8x128xf32>
    %66 = arith.addf %65, %64 : vector<8x128xf32>
    %67 = arith.divf %65, %66 : vector<8x128xf32>
    %68 = vector.extract_strided_slice %58 {offsets = [0, 128], sizes = [8, 128], strides = [1, 1]} : vector<8x384xf32> to vector<8x128xf32>
    %69 = vector.extract_strided_slice %59 {offsets = [0, 128], sizes = [8, 128], strides = [1, 1]} : vector<8x384xf32> to vector<8x128xf32>
    %70 = arith.addf %68, %69 : vector<8x128xf32>
    %71 = arith.negf %70 : vector<8x128xf32>
    %72 = math.exp %71 : vector<8x128xf32>
    %cst_29 = arith.constant 1.000000e+00 : f32
    %73 = vector.broadcast %cst_29 : f32 to vector<8x128xf32>
    %74 = arith.addf %73, %72 : vector<8x128xf32>
    %75 = arith.divf %73, %74 : vector<8x128xf32>
    %76 = vector.extract_strided_slice %58 {offsets = [0, 256], sizes = [8, 128], strides = [1, 1]} : vector<8x384xf32> to vector<8x128xf32>
    %77 = vector.extract_strided_slice %59 {offsets = [0, 256], sizes = [8, 128], strides = [1, 1]} : vector<8x384xf32> to vector<8x128xf32>
    %78 = vector.broadcast %12 : vector<1x128xf32> to vector<8x128xf32>
    %79 = arith.addf %77, %78 : vector<8x128xf32>
    %80 = arith.mulf %67, %79 : vector<8x128xf32>
    %81 = arith.addf %76, %80 : vector<8x128xf32>
    %82 = math.tanh %81 : vector<8x128xf32>
    %cst_30 = arith.constant 1.000000e+00 : f32
    %83 = vector.broadcast %cst_30 : f32 to vector<8x128xf32>
    %84 = arith.subf %83, %75 : vector<8x128xf32>
    %85 = arith.mulf %84, %82 : vector<8x128xf32>
    %86 = arith.mulf %75, %49 : vector<8x128xf32>
    %87 = arith.addf %85, %86 : vector<8x128xf32>
    %88 = arith.index_cast %56 : i32 to index
    %c0_31 = arith.constant 0 : index
    %89 = vector.load %arg6[%88, %c0_31] : memref<64x128xf32, #tpu.memory_space<vmem>>, vector<8x128xf32>
    tpu.vector_store %arg6[%88, %c0_31], %87 {strides = array<i32>} : memref<64x128xf32, #tpu.memory_space<vmem>>, vector<8x128xf32>,
    %c2_i32 = arith.constant 2 : i32
    %c0_i32_32 = arith.constant 0 : i32
    %90 = arith.cmpi eq, %arg0, %c0_i32_32 : i32
    %c7_i32_33 = arith.constant 7 : i32
    %91 = arith.subi %c7_i32_33, %c2_i32 : i32
    %92 = arith.select %90, %c2_i32, %91 : i32
    %c8_i32_34 = arith.constant 8 : i32
    %93 = arith.muli %92, %c8_i32_34 : i32
    %94 = tpu.assume_multiple %93, 8 : i32
    %95 = arith.index_cast %94 : i32 to index
    %c0_35 = arith.constant 0 : index
    %96 = vector.load %arg7[%95, %c0_35] : memref<64x384xf32, #tpu.memory_space<vmem>>, vector<8x384xf32>
    %cst_36 = arith.constant dense<0.000000e+00> : vector<8x384xf32>
    %97 = tpu.matmul %87, %10, %cst_36 {dimension_numbers = #tpu.dot_dimension_numbers<[1], [0], [0], [1], [0, 0, 1, 1], [], []>} : vector<8x128xf32>, vector<128x384xf32>, vector<8x384xf32> -> vector<8x384xf32>
    %98 = vector.extract_strided_slice %96 {offsets = [0, 0], sizes = [8, 128], strides = [1, 1]} : vector<8x384xf32> to vector<8x128xf32>
    %99 = vector.extract_strided_slice %97 {offsets = [0, 0], sizes = [8, 128], strides = [1, 1]} : vector<8x384xf32> to vector<8x128xf32>
    %100 = arith.addf %98, %99 : vector<8x128xf32>
    %101 = arith.negf %100 : vector<8x128xf32>
    %102 = math.exp %101 : vector<8x128xf32>
    %cst_37 = arith.constant 1.000000e+00 : f32
    %103 = vector.broadcast %cst_37 : f32 to vector<8x128xf32>
    %104 = arith.addf %103, %102 : vector<8x128xf32>
    %105 = arith.divf %103, %104 : vector<8x128xf32>
    %106 = vector.extract_strided_slice %96 {offsets = [0, 128], sizes = [8, 128], strides = [1, 1]} : vector<8x384xf32> to vector<8x128xf32>
    %107 = vector.extract_strided_slice %97 {offsets = [0, 128], sizes = [8, 128], strides = [1, 1]} : vector<8x384xf32> to vector<8x128xf32>
    %108 = arith.addf %106, %107 : vector<8x128xf32>
    %109 = arith.negf %108 : vector<8x128xf32>
    %110 = math.exp %109 : vector<8x128xf32>
    %cst_38 = arith.constant 1.000000e+00 : f32
    %111 = vector.broadcast %cst_38 : f32 to vector<8x128xf32>
    %112 = arith.addf %111, %110 : vector<8x128xf32>
    %113 = arith.divf %111, %112 : vector<8x128xf32>
    %114 = vector.extract_strided_slice %96 {offsets = [0, 256], sizes = [8, 128], strides = [1, 1]} : vector<8x384xf32> to vector<8x128xf32>
    %115 = vector.extract_strided_slice %97 {offsets = [0, 256], sizes = [8, 128], strides = [1, 1]} : vector<8x384xf32> to vector<8x128xf32>
    %116 = vector.broadcast %12 : vector<1x128xf32> to vector<8x128xf32>
    %117 = arith.addf %115, %116 : vector<8x128xf32>
    %118 = arith.mulf %105, %117 : vector<8x128xf32>
    %119 = arith.addf %114, %118 : vector<8x128xf32>
    %120 = math.tanh %119 : vector<8x128xf32>
    %cst_39 = arith.constant 1.000000e+00 : f32
    %121 = vector.broadcast %cst_39 : f32 to vector<8x128xf32>
    %122 = arith.subf %121, %113 : vector<8x128xf32>
    %123 = arith.mulf %122, %120 : vector<8x128xf32>
    %124 = arith.mulf %113, %87 : vector<8x128xf32>
    %125 = arith.addf %123, %124 : vector<8x128xf32>
    %126 = arith.index_cast %94 : i32 to index
    %c0_40 = arith.constant 0 : index
    %127 = vector.load %arg6[%126, %c0_40] : memref<64x128xf32, #tpu.memory_space<vmem>>, vector<8x128xf32>
    tpu.vector_store %arg6[%126, %c0_40], %125 {strides = array<i32>} : memref<64x128xf32, #tpu.memory_space<vmem>>, vector<8x128xf32>,
    %c3_i32 = arith.constant 3 : i32
    %c0_i32_41 = arith.constant 0 : i32
    %128 = arith.cmpi eq, %arg0, %c0_i32_41 : i32
    %c7_i32_42 = arith.constant 7 : i32
    %129 = arith.subi %c7_i32_42, %c3_i32 : i32
    %130 = arith.select %128, %c3_i32, %129 : i32
    %c8_i32_43 = arith.constant 8 : i32
    %131 = arith.muli %130, %c8_i32_43 : i32
    %132 = tpu.assume_multiple %131, 8 : i32
    %133 = arith.index_cast %132 : i32 to index
    %c0_44 = arith.constant 0 : index
    %134 = vector.load %arg7[%133, %c0_44] : memref<64x384xf32, #tpu.memory_space<vmem>>, vector<8x384xf32>
    %cst_45 = arith.constant dense<0.000000e+00> : vector<8x384xf32>
    %135 = tpu.matmul %125, %10, %cst_45 {dimension_numbers = #tpu.dot_dimension_numbers<[1], [0], [0], [1], [0, 0, 1, 1], [], []>} : vector<8x128xf32>, vector<128x384xf32>, vector<8x384xf32> -> vector<8x384xf32>
    %136 = vector.extract_strided_slice %134 {offsets = [0, 0], sizes = [8, 128], strides = [1, 1]} : vector<8x384xf32> to vector<8x128xf32>
    %137 = vector.extract_strided_slice %135 {offsets = [0, 0], sizes = [8, 128], strides = [1, 1]} : vector<8x384xf32> to vector<8x128xf32>
    %138 = arith.addf %136, %137 : vector<8x128xf32>
    %139 = arith.negf %138 : vector<8x128xf32>
    %140 = math.exp %139 : vector<8x128xf32>
    %cst_46 = arith.constant 1.000000e+00 : f32
    %141 = vector.broadcast %cst_46 : f32 to vector<8x128xf32>
    %142 = arith.addf %141, %140 : vector<8x128xf32>
    %143 = arith.divf %141, %142 : vector<8x128xf32>
    %144 = vector.extract_strided_slice %134 {offsets = [0, 128], sizes = [8, 128], strides = [1, 1]} : vector<8x384xf32> to vector<8x128xf32>
    %145 = vector.extract_strided_slice %135 {offsets = [0, 128], sizes = [8, 128], strides = [1, 1]} : vector<8x384xf32> to vector<8x128xf32>
    %146 = arith.addf %144, %145 : vector<8x128xf32>
    %147 = arith.negf %146 : vector<8x128xf32>
    %148 = math.exp %147 : vector<8x128xf32>
    %cst_47 = arith.constant 1.000000e+00 : f32
    %149 = vector.broadcast %cst_47 : f32 to vector<8x128xf32>
    %150 = arith.addf %149, %148 : vector<8x128xf32>
    %151 = arith.divf %149, %150 : vector<8x128xf32>
    %152 = vector.extract_strided_slice %134 {offsets = [0, 256], sizes = [8, 128], strides = [1, 1]} : vector<8x384xf32> to vector<8x128xf32>
    %153 = vector.extract_strided_slice %135 {offsets = [0, 256], sizes = [8, 128], strides = [1, 1]} : vector<8x384xf32> to vector<8x128xf32>
    %154 = vector.broadcast %12 : vector<1x128xf32> to vector<8x128xf32>
    %155 = arith.addf %153, %154 : vector<8x128xf32>
    %156 = arith.mulf %143, %155 : vector<8x128xf32>
    %157 = arith.addf %152, %156 : vector<8x128xf32>
    %158 = math.tanh %157 : vector<8x128xf32>
    %cst_48 = arith.constant 1.000000e+00 : f32
    %159 = vector.broadcast %cst_48 : f32 to vector<8x128xf32>
    %160 = arith.subf %159, %151 : vector<8x128xf32>
    %161 = arith.mulf %160, %158 : vector<8x128xf32>
    %162 = arith.mulf %151, %125 : vector<8x128xf32>
    %163 = arith.addf %161, %162 : vector<8x128xf32>
    %164 = arith.index_cast %132 : i32 to index
    %c0_49 = arith.constant 0 : index
    %165 = vector.load %arg6[%164, %c0_49] : memref<64x128xf32, #tpu.memory_space<vmem>>, vector<8x128xf32>
    tpu.vector_store %arg6[%164, %c0_49], %163 {strides = array<i32>} : memref<64x128xf32, #tpu.memory_space<vmem>>, vector<8x128xf32>,
    %c4_i32 = arith.constant 4 : i32
    %c0_i32_50 = arith.constant 0 : i32
    %166 = arith.cmpi eq, %arg0, %c0_i32_50 : i32
    %c7_i32_51 = arith.constant 7 : i32
    %167 = arith.subi %c7_i32_51, %c4_i32 : i32
    %168 = arith.select %166, %c4_i32, %167 : i32
    %c8_i32_52 = arith.constant 8 : i32
    %169 = arith.muli %168, %c8_i32_52 : i32
    %170 = tpu.assume_multiple %169, 8 : i32
    %171 = arith.index_cast %170 : i32 to index
    %c0_53 = arith.constant 0 : index
    %172 = vector.load %arg7[%171, %c0_53] : memref<64x384xf32, #tpu.memory_space<vmem>>, vector<8x384xf32>
    %cst_54 = arith.constant dense<0.000000e+00> : vector<8x384xf32>
    %173 = tpu.matmul %163, %10, %cst_54 {dimension_numbers = #tpu.dot_dimension_numbers<[1], [0], [0], [1], [0, 0, 1, 1], [], []>} : vector<8x128xf32>, vector<128x384xf32>, vector<8x384xf32> -> vector<8x384xf32>
    %174 = vector.extract_strided_slice %172 {offsets = [0, 0], sizes = [8, 128], strides = [1, 1]} : vector<8x384xf32> to vector<8x128xf32>
    %175 = vector.extract_strided_slice %173 {offsets = [0, 0], sizes = [8, 128], strides = [1, 1]} : vector<8x384xf32> to vector<8x128xf32>
    %176 = arith.addf %174, %175 : vector<8x128xf32>
    %177 = arith.negf %176 : vector<8x128xf32>
    %178 = math.exp %177 : vector<8x128xf32>
    %cst_55 = arith.constant 1.000000e+00 : f32
    %179 = vector.broadcast %cst_55 : f32 to vector<8x128xf32>
    %180 = arith.addf %179, %178 : vector<8x128xf32>
    %181 = arith.divf %179, %180 : vector<8x128xf32>
    %182 = vector.extract_strided_slice %172 {offsets = [0, 128], sizes = [8, 128], strides = [1, 1]} : vector<8x384xf32> to vector<8x128xf32>
    %183 = vector.extract_strided_slice %173 {offsets = [0, 128], sizes = [8, 128], strides = [1, 1]} : vector<8x384xf32> to vector<8x128xf32>
    %184 = arith.addf %182, %183 : vector<8x128xf32>
    %185 = arith.negf %184 : vector<8x128xf32>
    %186 = math.exp %185 : vector<8x128xf32>
    %cst_56 = arith.constant 1.000000e+00 : f32
    %187 = vector.broadcast %cst_56 : f32 to vector<8x128xf32>
    %188 = arith.addf %187, %186 : vector<8x128xf32>
    %189 = arith.divf %187, %188 : vector<8x128xf32>
    %190 = vector.extract_strided_slice %172 {offsets = [0, 256], sizes = [8, 128], strides = [1, 1]} : vector<8x384xf32> to vector<8x128xf32>
    %191 = vector.extract_strided_slice %173 {offsets = [0, 256], sizes = [8, 128], strides = [1, 1]} : vector<8x384xf32> to vector<8x128xf32>
    %192 = vector.broadcast %12 : vector<1x128xf32> to vector<8x128xf32>
    %193 = arith.addf %191, %192 : vector<8x128xf32>
    %194 = arith.mulf %181, %193 : vector<8x128xf32>
    %195 = arith.addf %190, %194 : vector<8x128xf32>
    %196 = math.tanh %195 : vector<8x128xf32>
    %cst_57 = arith.constant 1.000000e+00 : f32
    %197 = vector.broadcast %cst_57 : f32 to vector<8x128xf32>
    %198 = arith.subf %197, %189 : vector<8x128xf32>
    %199 = arith.mulf %198, %196 : vector<8x128xf32>
    %200 = arith.mulf %189, %163 : vector<8x128xf32>
    %201 = arith.addf %199, %200 : vector<8x128xf32>
    %202 = arith.index_cast %170 : i32 to index
    %c0_58 = arith.constant 0 : index
    %203 = vector.load %arg6[%202, %c0_58] : memref<64x128xf32, #tpu.memory_space<vmem>>, vector<8x128xf32>
    tpu.vector_store %arg6[%202, %c0_58], %201 {strides = array<i32>} : memref<64x128xf32, #tpu.memory_space<vmem>>, vector<8x128xf32>,
    %c5_i32 = arith.constant 5 : i32
    %c0_i32_59 = arith.constant 0 : i32
    %204 = arith.cmpi eq, %arg0, %c0_i32_59 : i32
    %c7_i32_60 = arith.constant 7 : i32
    %205 = arith.subi %c7_i32_60, %c5_i32 : i32
    %206 = arith.select %204, %c5_i32, %205 : i32
    %c8_i32_61 = arith.constant 8 : i32
    %207 = arith.muli %206, %c8_i32_61 : i32
    %208 = tpu.assume_multiple %207, 8 : i32
    %209 = arith.index_cast %208 : i32 to index
    %c0_62 = arith.constant 0 : index
    %210 = vector.load %arg7[%209, %c0_62] : memref<64x384xf32, #tpu.memory_space<vmem>>, vector<8x384xf32>
    %cst_63 = arith.constant dense<0.000000e+00> : vector<8x384xf32>
    %211 = tpu.matmul %201, %10, %cst_63 {dimension_numbers = #tpu.dot_dimension_numbers<[1], [0], [0], [1], [0, 0, 1, 1], [], []>} : vector<8x128xf32>, vector<128x384xf32>, vector<8x384xf32> -> vector<8x384xf32>
    %212 = vector.extract_strided_slice %210 {offsets = [0, 0], sizes = [8, 128], strides = [1, 1]} : vector<8x384xf32> to vector<8x128xf32>
    %213 = vector.extract_strided_slice %211 {offsets = [0, 0], sizes = [8, 128], strides = [1, 1]} : vector<8x384xf32> to vector<8x128xf32>
    %214 = arith.addf %212, %213 : vector<8x128xf32>
    %215 = arith.negf %214 : vector<8x128xf32>
    %216 = math.exp %215 : vector<8x128xf32>
    %cst_64 = arith.constant 1.000000e+00 : f32
    %217 = vector.broadcast %cst_64 : f32 to vector<8x128xf32>
    %218 = arith.addf %217, %216 : vector<8x128xf32>
    %219 = arith.divf %217, %218 : vector<8x128xf32>
    %220 = vector.extract_strided_slice %210 {offsets = [0, 128], sizes = [8, 128], strides = [1, 1]} : vector<8x384xf32> to vector<8x128xf32>
    %221 = vector.extract_strided_slice %211 {offsets = [0, 128], sizes = [8, 128], strides = [1, 1]} : vector<8x384xf32> to vector<8x128xf32>
    %222 = arith.addf %220, %221 : vector<8x128xf32>
    %223 = arith.negf %222 : vector<8x128xf32>
    %224 = math.exp %223 : vector<8x128xf32>
    %cst_65 = arith.constant 1.000000e+00 : f32
    %225 = vector.broadcast %cst_65 : f32 to vector<8x128xf32>
    %226 = arith.addf %225, %224 : vector<8x128xf32>
    %227 = arith.divf %225, %226 : vector<8x128xf32>
    %228 = vector.extract_strided_slice %210 {offsets = [0, 256], sizes = [8, 128], strides = [1, 1]} : vector<8x384xf32> to vector<8x128xf32>
    %229 = vector.extract_strided_slice %211 {offsets = [0, 256], sizes = [8, 128], strides = [1, 1]} : vector<8x384xf32> to vector<8x128xf32>
    %230 = vector.broadcast %12 : vector<1x128xf32> to vector<8x128xf32>
    %231 = arith.addf %229, %230 : vector<8x128xf32>
    %232 = arith.mulf %219, %231 : vector<8x128xf32>
    %233 = arith.addf %228, %232 : vector<8x128xf32>
    %234 = math.tanh %233 : vector<8x128xf32>
    %cst_66 = arith.constant 1.000000e+00 : f32
    %235 = vector.broadcast %cst_66 : f32 to vector<8x128xf32>
    %236 = arith.subf %235, %227 : vector<8x128xf32>
    %237 = arith.mulf %236, %234 : vector<8x128xf32>
    %238 = arith.mulf %227, %201 : vector<8x128xf32>
    %239 = arith.addf %237, %238 : vector<8x128xf32>
    %240 = arith.index_cast %208 : i32 to index
    %c0_67 = arith.constant 0 : index
    %241 = vector.load %arg6[%240, %c0_67] : memref<64x128xf32, #tpu.memory_space<vmem>>, vector<8x128xf32>
    tpu.vector_store %arg6[%240, %c0_67], %239 {strides = array<i32>} : memref<64x128xf32, #tpu.memory_space<vmem>>, vector<8x128xf32>,
    %c6_i32 = arith.constant 6 : i32
    %c0_i32_68 = arith.constant 0 : i32
    %242 = arith.cmpi eq, %arg0, %c0_i32_68 : i32
    %c7_i32_69 = arith.constant 7 : i32
    %243 = arith.subi %c7_i32_69, %c6_i32 : i32
    %244 = arith.select %242, %c6_i32, %243 : i32
    %c8_i32_70 = arith.constant 8 : i32
    %245 = arith.muli %244, %c8_i32_70 : i32
    %246 = tpu.assume_multiple %245, 8 : i32
    %247 = arith.index_cast %246 : i32 to index
    %c0_71 = arith.constant 0 : index
    %248 = vector.load %arg7[%247, %c0_71] : memref<64x384xf32, #tpu.memory_space<vmem>>, vector<8x384xf32>
    %cst_72 = arith.constant dense<0.000000e+00> : vector<8x384xf32>
    %249 = tpu.matmul %239, %10, %cst_72 {dimension_numbers = #tpu.dot_dimension_numbers<[1], [0], [0], [1], [0, 0, 1, 1], [], []>} : vector<8x128xf32>, vector<128x384xf32>, vector<8x384xf32> -> vector<8x384xf32>
    %250 = vector.extract_strided_slice %248 {offsets = [0, 0], sizes = [8, 128], strides = [1, 1]} : vector<8x384xf32> to vector<8x128xf32>
    %251 = vector.extract_strided_slice %249 {offsets = [0, 0], sizes = [8, 128], strides = [1, 1]} : vector<8x384xf32> to vector<8x128xf32>
    %252 = arith.addf %250, %251 : vector<8x128xf32>
    %253 = arith.negf %252 : vector<8x128xf32>
    %254 = math.exp %253 : vector<8x128xf32>
    %cst_73 = arith.constant 1.000000e+00 : f32
    %255 = vector.broadcast %cst_73 : f32 to vector<8x128xf32>
    %256 = arith.addf %255, %254 : vector<8x128xf32>
    %257 = arith.divf %255, %256 : vector<8x128xf32>
    %258 = vector.extract_strided_slice %248 {offsets = [0, 128], sizes = [8, 128], strides = [1, 1]} : vector<8x384xf32> to vector<8x128xf32>
    %259 = vector.extract_strided_slice %249 {offsets = [0, 128], sizes = [8, 128], strides = [1, 1]} : vector<8x384xf32> to vector<8x128xf32>
    %260 = arith.addf %258, %259 : vector<8x128xf32>
    %261 = arith.negf %260 : vector<8x128xf32>
    %262 = math.exp %261 : vector<8x128xf32>
    %cst_74 = arith.constant 1.000000e+00 : f32
    %263 = vector.broadcast %cst_74 : f32 to vector<8x128xf32>
    %264 = arith.addf %263, %262 : vector<8x128xf32>
    %265 = arith.divf %263, %264 : vector<8x128xf32>
    %266 = vector.extract_strided_slice %248 {offsets = [0, 256], sizes = [8, 128], strides = [1, 1]} : vector<8x384xf32> to vector<8x128xf32>
    %267 = vector.extract_strided_slice %249 {offsets = [0, 256], sizes = [8, 128], strides = [1, 1]} : vector<8x384xf32> to vector<8x128xf32>
    %268 = vector.broadcast %12 : vector<1x128xf32> to vector<8x128xf32>
    %269 = arith.addf %267, %268 : vector<8x128xf32>
    %270 = arith.mulf %257, %269 : vector<8x128xf32>
    %271 = arith.addf %266, %270 : vector<8x128xf32>
    %272 = math.tanh %271 : vector<8x128xf32>
    %cst_75 = arith.constant 1.000000e+00 : f32
    %273 = vector.broadcast %cst_75 : f32 to vector<8x128xf32>
    %274 = arith.subf %273, %265 : vector<8x128xf32>
    %275 = arith.mulf %274, %272 : vector<8x128xf32>
    %276 = arith.mulf %265, %239 : vector<8x128xf32>
    %277 = arith.addf %275, %276 : vector<8x128xf32>
    %278 = arith.index_cast %246 : i32 to index
    %c0_76 = arith.constant 0 : index
    %279 = vector.load %arg6[%278, %c0_76] : memref<64x128xf32, #tpu.memory_space<vmem>>, vector<8x128xf32>
    tpu.vector_store %arg6[%278, %c0_76], %277 {strides = array<i32>} : memref<64x128xf32, #tpu.memory_space<vmem>>, vector<8x128xf32>,
    %c7_i32_77 = arith.constant 7 : i32
    %c0_i32_78 = arith.constant 0 : i32
    %280 = arith.cmpi eq, %arg0, %c0_i32_78 : i32
    %c7_i32_79 = arith.constant 7 : i32
    %281 = arith.subi %c7_i32_79, %c7_i32_77 : i32
    %282 = arith.select %280, %c7_i32_77, %281 : i32
    %c8_i32_80 = arith.constant 8 : i32
    %283 = arith.muli %282, %c8_i32_80 : i32
    %284 = tpu.assume_multiple %283, 8 : i32
    %285 = arith.index_cast %284 : i32 to index
    %c0_81 = arith.constant 0 : index
    %286 = vector.load %arg7[%285, %c0_81] : memref<64x384xf32, #tpu.memory_space<vmem>>, vector<8x384xf32>
    %cst_82 = arith.constant dense<0.000000e+00> : vector<8x384xf32>
    %287 = tpu.matmul %277, %10, %cst_82 {dimension_numbers = #tpu.dot_dimension_numbers<[1], [0], [0], [1], [0, 0, 1, 1], [], []>} : vector<8x128xf32>, vector<128x384xf32>, vector<8x384xf32> -> vector<8x384xf32>
    %288 = vector.extract_strided_slice %286 {offsets = [0, 0], sizes = [8, 128], strides = [1, 1]} : vector<8x384xf32> to vector<8x128xf32>
    %289 = vector.extract_strided_slice %287 {offsets = [0, 0], sizes = [8, 128], strides = [1, 1]} : vector<8x384xf32> to vector<8x128xf32>
    %290 = arith.addf %288, %289 : vector<8x128xf32>
    %291 = arith.negf %290 : vector<8x128xf32>
    %292 = math.exp %291 : vector<8x128xf32>
    %cst_83 = arith.constant 1.000000e+00 : f32
    %293 = vector.broadcast %cst_83 : f32 to vector<8x128xf32>
    %294 = arith.addf %293, %292 : vector<8x128xf32>
    %295 = arith.divf %293, %294 : vector<8x128xf32>
    %296 = vector.extract_strided_slice %286 {offsets = [0, 128], sizes = [8, 128], strides = [1, 1]} : vector<8x384xf32> to vector<8x128xf32>
    %297 = vector.extract_strided_slice %287 {offsets = [0, 128], sizes = [8, 128], strides = [1, 1]} : vector<8x384xf32> to vector<8x128xf32>
    %298 = arith.addf %296, %297 : vector<8x128xf32>
    %299 = arith.negf %298 : vector<8x128xf32>
    %300 = math.exp %299 : vector<8x128xf32>
    %cst_84 = arith.constant 1.000000e+00 : f32
    %301 = vector.broadcast %cst_84 : f32 to vector<8x128xf32>
    %302 = arith.addf %301, %300 : vector<8x128xf32>
    %303 = arith.divf %301, %302 : vector<8x128xf32>
    %304 = vector.extract_strided_slice %286 {offsets = [0, 256], sizes = [8, 128], strides = [1, 1]} : vector<8x384xf32> to vector<8x128xf32>
    %305 = vector.extract_strided_slice %287 {offsets = [0, 256], sizes = [8, 128], strides = [1, 1]} : vector<8x384xf32> to vector<8x128xf32>
    %306 = vector.broadcast %12 : vector<1x128xf32> to vector<8x128xf32>
    %307 = arith.addf %305, %306 : vector<8x128xf32>
    %308 = arith.mulf %295, %307 : vector<8x128xf32>
    %309 = arith.addf %304, %308 : vector<8x128xf32>
    %310 = math.tanh %309 : vector<8x128xf32>
    %cst_85 = arith.constant 1.000000e+00 : f32
    %311 = vector.broadcast %cst_85 : f32 to vector<8x128xf32>
    %312 = arith.subf %311, %303 : vector<8x128xf32>
    %313 = arith.mulf %312, %310 : vector<8x128xf32>
    %314 = arith.mulf %303, %277 : vector<8x128xf32>
    %315 = arith.addf %313, %314 : vector<8x128xf32>
    %316 = arith.index_cast %284 : i32 to index
    %c0_86 = arith.constant 0 : index
    %317 = vector.load %arg6[%316, %c0_86] : memref<64x128xf32, #tpu.memory_space<vmem>>, vector<8x128xf32>
    tpu.vector_store %arg6[%316, %c0_86], %315 {strides = array<i32>} : memref<64x128xf32, #tpu.memory_space<vmem>>, vector<8x128xf32>,
    %c8_i32_87 = arith.constant 8 : i32
    return
  }
  func.func @transform_0(%arg0: i32) -> (i32, i32) {
    %c0_i32 = arith.constant 0 : i32
    %c0_i32_0 = arith.constant 0 : i32
    %c0_i32_1 = arith.constant 0 : i32
    return %c0_i32, %c0_i32_0 : i32, i32
  }
  func.func @transform_1(%arg0: i32) -> (i32, i32, i32) {
    %c0_i32 = arith.constant 0 : i32
    %c0_i32_0 = arith.constant 0 : i32
    %c0_i32_1 = arith.constant 0 : i32
    return %arg0, %c0_i32, %c0_i32_0 : i32, i32, i32
  }
  func.func @transform_2(%arg0: i32) -> (i32, i32, i32) {
    %c0_i32 = arith.constant 0 : i32
    %c0_i32_0 = arith.constant 0 : i32
    %c0_i32_1 = arith.constant 0 : i32
    return %arg0, %c0_i32, %c0_i32_0 : i32, i32, i32
  }
  func.func @transform_3(%arg0: i32) -> (i32, i32, i32) {
    %c0_i32 = arith.constant 0 : i32
    %c0_i32_0 = arith.constant 0 : i32
    %c0_i32_1 = arith.constant 0 : i32
    return %arg0, %c0_i32, %c0_i32_0 : i32, i32, i32
  }
  func.func @transform_4(%arg0: i32) -> (i32, i32, i32) {
    %c0_i32 = arith.constant 0 : i32
    %c0_i32_0 = arith.constant 0 : i32
    %c0_i32_1 = arith.constant 0 : i32
    return %arg0, %c0_i32, %c0_i32_0 : i32, i32, i32
  }
  func.func @transform_5(%arg0: i32) -> (i32, i32) {
    %c0_i32 = arith.constant 0 : i32
    %c0_i32_0 = arith.constant 0 : i32
    return %c0_i32, %arg0 : i32, i32
  }
}

module attributes {stable_mosaic.version = 11 : i64} {
  func.func @_fc_kernel(%arg0: i32, %arg1: memref<8x256xf32, #tpu.memory_space<vmem>>, %arg2: memref<256x16xf32, #tpu.memory_space<vmem>>, %arg3: memref<1x16xf32, #tpu.memory_space<vmem>>, %arg4: memref<8x16xf32, #tpu.memory_space<vmem>>) attributes {dimension_semantics = [#tpu.dimension_semantics<arbitrary>], iteration_bounds = array<i64: 1>, scalar_prefetch = 0 : i64, scratch_operands = 0 : i64, tpu.core_type = #tpu.core_type<tc>, window_params = [{transform_indices = @transform_0, window_bounds = array<i64: 8, 256>}, {pipeline_mode = #tpu.pipeline_mode<synchronous>, transform_indices = @transform_1, window_bounds = array<i64: 256, 16>}, {pipeline_mode = #tpu.pipeline_mode<synchronous>, transform_indices = @transform_2, window_bounds = array<i64: 1, 16>}, {pipeline_mode = #tpu.pipeline_mode<synchronous>, transform_indices = @transform_3, window_bounds = array<i64: 8, 16>}]} {
    %c0 = arith.constant 0 : index
    %c0_0 = arith.constant 0 : index
    %0 = vector.load %arg1[%c0, %c0_0] : memref<8x256xf32, #tpu.memory_space<vmem>>, vector<8x256xf32>
    %c0_1 = arith.constant 0 : index
    %c0_2 = arith.constant 0 : index
    %1 = vector.load %arg2[%c0_1, %c0_2] : memref<256x16xf32, #tpu.memory_space<vmem>>, vector<256x16xf32>
    %cst = arith.constant dense<0.000000e+00> : vector<8x16xf32>
    %2 = tpu.matmul %0, %1, %cst {dimension_numbers = #tpu.dot_dimension_numbers<[1], [0], [0], [1], [0, 0, 1, 1], [], []>} : vector<8x256xf32>, vector<256x16xf32>, vector<8x16xf32> -> vector<8x16xf32>
    %c0_3 = arith.constant 0 : index
    %c0_4 = arith.constant 0 : index
    %3 = vector.load %arg3[%c0_3, %c0_4] : memref<1x16xf32, #tpu.memory_space<vmem>>, vector<1x16xf32>
    %4 = vector.broadcast %3 : vector<1x16xf32> to vector<8x16xf32>
    %5 = arith.addf %2, %4 : vector<8x16xf32>
    %c0_5 = arith.constant 0 : index
    %c0_6 = arith.constant 0 : index
    %6 = vector.load %arg4[%c0_5, %c0_6] : memref<8x16xf32, #tpu.memory_space<vmem>>, vector<8x16xf32>
    tpu.vector_store %arg4[%c0_5, %c0_6], %5 {strides = array<i32>} : memref<8x16xf32, #tpu.memory_space<vmem>>, vector<8x16xf32>,
    return
  }
  func.func @transform_0(%arg0: i32) -> (i32, i32) {
    %c7_i32 = arith.constant 7 : i32
    %c0_i32 = arith.constant 0 : i32
    %c0_i32_0 = arith.constant 0 : i32
    return %c7_i32, %c0_i32 : i32, i32
  }
  func.func @transform_1(%arg0: i32) -> (i32, i32) {
    %c0_i32 = arith.constant 0 : i32
    %c0_i32_0 = arith.constant 0 : i32
    %c0_i32_1 = arith.constant 0 : i32
    return %c0_i32, %c0_i32_0 : i32, i32
  }
  func.func @transform_2(%arg0: i32) -> (i32, i32) {
    %c0_i32 = arith.constant 0 : i32
    %c0_i32_0 = arith.constant 0 : i32
    %c0_i32_1 = arith.constant 0 : i32
    return %c0_i32, %c0_i32_0 : i32, i32
  }
  func.func @transform_3(%arg0: i32) -> (i32, i32) {
    %c0_i32 = arith.constant 0 : i32
    %c0_i32_0 = arith.constant 0 : i32
    %c0_i32_1 = arith.constant 0 : i32
    return %c0_i32, %c0_i32_0 : i32, i32
  }
}

</mosaic_0001>

<bundles_post_ra>
// kernel: bigru_forward.5
= control target key start
LH: loop header
LB: loop body
LE: loop exit
PB: predicated region body
PF: predicated region fallthrough
CT: control target
= control target key end

     0   :  { %vm128_vm0 = vcmask 130048   ;;  %s332_s1 = inlined_call_operand.vmem [shape: f32[256,16], index: 1, kind: input, shape index: {}]   ;;  %s333_s0 = inlined_call_operand.vmem [shape: f32[64,256], index: 0, kind: input, shape index: {}]   ;;  %s334_s2 = inlined_call_operand.vmem [shape: f32[1,16], index: 2, kind: input, shape index: {}]   ;;  %s335_s3 = inlined_call_operand.vmem [shape: f32[8,16], index: 3, kind: output, shape index: {}]  }
   0x1   :  { %v35_v0 = vld [vmem:[%s332_s1 + $0x80] sm:$0xff]  ;;  %v36_v1 = vld [vmem:[%s332_s1 + $0x88] sm:$0xff]  ;;  %v37_v5 = vld [vmem:[%s332_s1 + $0x90] sm:$0xff] }
   0x2   :  { %v19_v2 = vld [vmem:[%s332_s1] sm:$0xff]  ;;  %v172_v3 = vpack.c.bf16 %v36_v1, %v35_v0  ;;  %v20_v4 = vld [vmem:[%s332_s1 + $0x8] sm:$0xff]  ;;  %v38_v6 = vld [vmem:[%s332_s1 + $0x98] sm:$0xff] }
   0x3   :  { %v174_v7 = vpack.c.bf16 %v20_v4, %v19_v2  ;;  %v176_v8 = vpack.c.bf16 %v38_v6, %v37_v5  ;;  %v21_v9 = vld [vmem:[%s332_s1 + $0x10] sm:$0xff]  ;;  %v22_v10 = vld [vmem:[%s332_s1 + $0x18] sm:$0xff]  ;;  %v39_v11 = vld [vmem:[%s332_s1 + $0xa0] sm:$0xff] }
   0x4   :  { %173 = vmatprep.subr.bf16.mxu0 %v172_v3  ;;  %v40_v12 = vld [vmem:[%s332_s1 + $0xa8] sm:$0xff]  ;;  %v178_v13 = vpack.c.bf16 %v22_v10, %v21_v9  ;;  %v23_v15 = vld [vmem:[%s332_s1 + $0x20] sm:$0xff]  ;;  %v41_v17 = vld [vmem:[%s332_s1 + $0xb0] sm:$0xff] }
   0x5   :  { %175 = vmatpush3.bf16.msra.mxu0 %v174_v7  ;;  %v180_v14 = vpack.c.bf16 %v40_v12, %v39_v11  ;;  %v24_v16 = vld [vmem:[%s332_s1 + $0x28] sm:$0xff]  ;;  %v42_v18 = vld [vmem:[%s332_s1 + $0xb8] sm:$0xff]  ;;  %v25_v21 = vld [vmem:[%s332_s1 + $0x30] sm:$0xff] }
   0x6   :  { %177 = vmatprep.subr.bf16.mxu0 %v176_v8  ;;  %v182_v19 = vpack.c.bf16 %v24_v16, %v23_v15  ;;  %v184_v20 = vpack.c.bf16 %v42_v18, %v41_v17  ;;  %v26_v22 = vld [vmem:[%s332_s1 + $0x38] sm:$0xff]  ;;  %v43_v23 = vld [vmem:[%s332_s1 + $0xc0] sm:$0xff]  ;;  %v44_v24 = vld [vmem:[%s332_s1 + $0xc8] sm:$0xff] }
   0x7   :  { %v135_v25 = vld [vmem:[%s333_s0 + $0x78] sm:$0xff]  ;;  %v186_v26 = vpack.c.bf16 %v26_v22, %v25_v21  ;;  %v188_v27 = vpack.c.bf16 %v44_v24, %v43_v23  ;;  %v27_v28 = vld [vmem:[%s332_s1 + $0x40] sm:$0xff]  ;;  %v28_v29 = vld [vmem:[%s332_s1 + $0x48] sm:$0xff] }
   0x8   :  { %122 = vmatprep.mubr.f32.mxu0 %v135_v25  ;;  %v45_v30 = vld [vmem:[%s332_s1 + $0xd0] sm:$0xff]  ;;  %v46_v31 = vld [vmem:[%s332_s1 + $0xd8] sm:$0xff]  ;;  %v190_v32 = vpack.c.bf16 %v28_v29, %v27_v28  ;;  %v47_v36 = vld [vmem:[%s332_s1 + $0xe0] sm:$0xff] }
   0x9   :  { %179 = vmatpush3.bf16.msra.mxu0 %v178_v13  ;;  %v192_v33 = vpack.c.bf16 %v46_v31, %v45_v30  ;;  %v29_v34 = vld [vmem:[%s332_s1 + $0x50] sm:$0xff]  ;;  %v30_v35 = vld [vmem:[%s332_s1 + $0x58] sm:$0xff]  ;;  %v48_v37 = vld [vmem:[%s332_s1 + $0xe8] sm:$0xff] }
   0xa   :  { %181 = vmatprep.subr.bf16.mxu0 %v180_v14  ;;  %v194_v38 = vpack.c.bf16 %v30_v35, %v29_v34  ;;  %v196_v39 = vpack.c.bf16 %v48_v37, %v47_v36  ;;  %v31_v40 = vld [vmem:[%s332_s1 + $0x60] sm:$0xff]  ;;  %v32_v41 = vld [vmem:[%s332_s1 + $0x68] sm:$0xff]  ;;  %v49_v42 = vld [vmem:[%s332_s1 + $0xf0] sm:$0xff] }
   0xb   :  { %v50_v43 = vld [vmem:[%s332_s1 + $0xf8] sm:$0xff]  ;;  %v198_v44 = vpack.c.bf16 %v32_v41, %v31_v40  ;;  %v33_v46 = vld [vmem:[%s332_s1 + $0x70] sm:$0xff]  ;;  %v136_v51 = vld [vmem:[%s334_s2] ss:$0 sm:$0xff] }
   0xc   :  { %v200_v45 = vpack.c.bf16 %v50_v43, %v49_v42  ;;  %v34_v47 = vld [vmem:[%s332_s1 + $0x78] sm:$0xff]  ;;  %v134_v49 = vld [vmem:[%s333_s0 + $0x70] sm:$0xff] }
   0xd   :  { %183 = vmatpush3.bf16.msra.mxu0 %v182_v19  ;;  %v202_v48 = vpack.c.bf16 %v34_v47, %v33_v46 }
   0xe   :  { %185 = vmatprep.subr.bf16.mxu0 %v184_v20 }
  0x11   :  { %187 = vmatpush3.bf16.msra.mxu0 %v186_v26 }
  0x12   :  { %189 = vmatprep.subr.bf16.mxu0 %v188_v27 }
  0x15   :  { %191 = vmatpush3.bf16.msra.mxu0 %v190_v32 }
  0x16   :  { %193 = vmatprep.subr.bf16.mxu0 %v192_v33 }
  0x19   :  { %195 = vmatpush3.bf16.msra.mxu0 %v194_v38 }
  0x1a   :  { %197 = vmatprep.subr.bf16.mxu0 %v196_v39 }
  0x1d   :  { %199 = vmatpush3.bf16.msra.mxu0 %v198_v44 }
  0x1e   :  { %201 = vmatprep.subr.bf16.mxu0 %v200_v45 }
  0x21   :  { %203 = vmatpush3.bf16.msra.mxu0 %v202_v48 }
  0x24   :  { %123 = vmatmul.mubr.f32.vlgmr.msra.gmra.mrb[0].mxu0 %v134_v49 }
  0xf7   :  { %v169_v50 = vpop.f32.mrb[0].mxu0 }
  0xf8   :  { %v170_v52 = vpop.f32.mrb[1].mxu0 }
  0xf9   :  { %v171_v53 = vadd.f32 %v170_v52, %v169_v50 }
  0xfb   :  { %v125_v54 = vadd.f32 %v171_v53, %v136_v51 }
  0xfd   :  { %129 = vst.msk [vmem:[%s335_s3] sm:$0xff] %vm128_vm0, %v125_v54 }

// kernel: bigru_forward.3
= control target key start
LH: loop header
LB: loop body
LE: loop exit
PB: predicated region body
PF: predicated region fallthrough
CT: control target
= control target key end

     0   :  { %s4478_s0 = inlined_call_operand.vmem [shape: f32[64,16], index: 0, kind: input, shape index: {}]   ;;  %s4479_s1 = inlined_call_operand.hbm [shape: f32[2,16,384], index: 1, kind: input, shape index: {}]   ;;  %s4480_s2 = inlined_call_operand.hbm [shape: f32[2,128,384], index: 2, kind: input, shape index: {}]   ;;  %s4481_s3 = inlined_call_operand.hbm [shape: f32[2,1,384], index: 3, kind: input, shape index: {}]   ;;  %s4482_s4 = inlined_call_operand.hbm [shape: f32[2,1,128], index: 4, kind: input, shape index: {}]   ;;  %s4483_s5 = inlined_call_operand.vmem [shape: f32[64,256], index: 5, kind: output, shape index: {}]  }
   0x1   :  { %4490 = sst [smem:[#allocation17_spill]] %s4479_s1 }
   0x2   :  { %4491 = sst [smem:[#allocation18_spill]] %s4480_s2 }
   0x3   :  { %10 = vsyncpa [#allocation4], 0 }
   0x4   :  { %12 = vsyncpa [#allocation4 + $0x1], 0 }
   0x5   :  { %13 = vsyncpa [#allocation6], 0 }
   0x6   :  { %15 = vsyncpa [#allocation6 + $0x1], 0 }
   0x7   :  { %16 = vsyncpa [#allocation9], 0 }
   0x8   :  { %18 = vsyncpa [#allocation9 + $0x1], 0  ;;  %s3647_s18 = smov 0   ;;  %s3649_s19 = smov 0  }
   0x9   :  { %s3651_s20 = smov 0   ;;  %s3653_s21 = smov 0  }
   0xa LB: > { %4492 = sst [smem:[#allocation14_spill]] %s3602_s20  ;;  %s3666_s22 = sadd.s32 4294967295, %s3606_s21   ;;  %s3606_s21 = sphi %s3653_s21, %s4514_s21   ;;  %s3602_s20 = sphi %s3651_s20, %s4516_s20   ;;  %s3598_s19 = sphi %s3649_s19, %s4518_s19   ;;  %s3594_s18 = sphi %s3647_s18, %s4517_s18  }
   0xb   : > { %s3669_s23 = sadd.s32 1, %s3606_s21   ;;  %s52_s25 = sadd.s32 1, %s3602_s20 }
   0xc   : > { %4493 = sst [smem:[#allocation15_spill]] %s3669_s23  ;;  %s49_s24 = ssub.s32 %s3606_s21, %s3669_s23 }
   0xd   : > { %p50_p0 = scmp.eq.s32.totalorder %s49_s24, 0  ;;  %p59_p1 = scmp.ne.s32.totalorder %s3602_s20, %s3598_s19 }
   0xe   : > { %p60_p2 = scmp.eq.s32.totalorder %s3606_s21, 0  ;;  %p65_p3 = scmp.ne.s32.totalorder %s3598_s19, %s3594_s18 }
   0xf   : > { %s3679_s26 = scalar_select %p50_p0, %s3602_s20, %s52_s25  }
  0x10   : > { %p61_p4 = por %p60_p2, %p59_p1  ;;  %p4484_p5 = scmp.eq.s32.totalorder %s3666_s22, 0 }
  0x11   : > { %4494 = sst [smem:[#allocation16_spill]] %s3679_s26  ;;  %p167_p6 = scmp.eq.s32.totalorder %s3666_s22, 1 }
  0x12   : > { %p3685_p7 = por %p4484_p5, %p65_p3  ;;  %p3326_p8 = scmp.lt.s32.totalorder %s3606_s21, 2 }
  0x13   : > { %p3690_p9 = por %p167_p6, %p59_p1  ;;  %s3695_s29 = sand.u32 1, %s3602_s20  }
  0x14   : > { %s4495_s27 = scalar_select %p3685_p7, 1, 0 }
  0x15   : > { %s4496_s28 = scalar_select %p3690_p9, 1, 0 }
  0x16   : > { %p3697_p10 = pnand %p3326_p8, %p61_p4  ;;  %s217_s6 = sand.u32 1, %s3606_s21  }
  0x17   : > { %s3298_s7 = smul.u32 384, %s3695_s29  ;;  %p2335_p11 = scmp.ge.s32.totalorder %s3606_s21, 1 }
  0x18   : > { %s4497_s30 = scalar_select %p3697_p10, 1, 0 }
  0x19   : > { %s3299_s8 = smul.u32 6144, %s3606_s21  ;;  %p272_p12 = scmp.lt.s32.totalorder %s3606_s21, 3 }
  0x1a   : > { %s4498_s2 = sld [smem:[#allocation18_spill]]  ;;  %s221_s12 = scalar_lea.vmem [#allocation5], %s3298_s7 }
  0x1b   : > { %s228_s13 = sshll.u32 %s221_s12, 4  ;;  %p3713_p13 = pnand %p2335_p11, %p272_p12  ;;  %s3711_s13 = int_to_ptr.vmem [resolvable:$true] %s228_s13 }
  0x1c   : > { %s3717_s15 = scalar_lea.sflag [#allocation6], %s217_s6  ;;  %p3723_p1 = pneg %p3697_p10 }
  0x1d   : > { %s4499_s14 = scalar_select %p3713_p13, 1, 0 }
  0x20   : > { %s3709_s11 = scalar_lea.hbm %s4498_s2, %s3299_s8  ;;  %s3449_s25 = scalar_lea.hbm %s4498_s2, 12288 }
  0x21   : > { %s3444_s16 = scalar_lea.hbm %s3709_s11, 6144  ;;  %p3450_p4 = scmp.lt.u32.totalorder %s3709_s11, %s4498_s2 }
  0x22   : > { %p3445_p0 = scmp.ne.s32.totalorder %s3709_s11, %s3444_s16  ;;  %p3451_p6 = scmp.lt.u32.totalorder %s3449_s25, %s3444_s16 }
  0x23   : > { %p3453_p11 = scmp.lt.u32.totalorder %s3444_s16, %s3709_s11 }
  0x24   : > { %p3447_p2 = pnand %p3723_p1, %p3445_p0  ;;  %p3452_p8 = por %p3451_p6, %p3450_p4 }
  0x26   : > { %p3448_p3 = pneg %p3447_p2  ;;  %p3454_p12 = por %p3453_p11, %p3452_p8 }
  0x28   : > { %p3455_p5 = pnand %p3454_p12, %p3448_p3 }
  0x2a   : > { %3458 = shalt.err (!%p3455_p5)
}
  0x2b   : > { %s3459_s6 = scalar_lea.vmem %s3711_s13, 6144  ;;  %s3608_s9 = smov [#allocation5]  }
  0x2c   : > { %p3460_p0 = scmp.ne.s32.totalorder %s3711_s13, %s3459_s6  ;;  %s3464_s10 = sshll.u32 %s3608_s9, 4  ;;  %s3465_s10 = int_to_ptr.vmem [resolvable:$false] %s3464_s10 }
  0x2d   : > { %s3466_s12 = scalar_lea.vmem %s3465_s10, 12288  ;;  %p3467_p7 = scmp.lt.s32.totalorder %s3711_s13, %s3465_s10 }
  0x2e   : > { %p3462_p2 = pnand %p3460_p0, %p3723_p1  ;;  %p3468_p13 = scmp.lt.s32.totalorder %s3466_s12, %s3459_s6 }
  0x30   : > { %p3463_p9 = pneg %p3462_p2  ;;  %p3469_p4 = por %p3468_p13, %p3467_p7 }
  0x32   : > { %p3470_p6 = pnand %p3469_p4, %p3463_p9 }
  0x34   : > { %3473 = shalt.err (!%p3470_p6)
}
  0x35   : > { %s3609_s16 = smov 384   ;;  %s3610_s18 = smov 24  }
  0x36   : > { %3319 = dma.hbm_to_vmem [thread:$0]  (!%p3697_p10), %s3709_s11, 6144, %s3711_s13, %s3717_s15, %s3609_s16, %s3609_s16, %s3610_s18  }
  0x37   : > { %s3296_s24 = smul.u32 48, %s3695_s29  ;;  %s4501_s1 = sld [smem:[#allocation17_spill]] }
  0x38   : > { %s3297_s25 = smul.u32 768, %s3606_s21  ;;  %s197_s2 = scalar_lea.sflag [#allocation4], %s3695_s29 }
  0x39   : > { %s3300_s7 = smul.u32 3, %s3695_s29  ;;  %s200_s10 = scalar_lea.vmem [#allocation3], %s3296_s24 }
  0x3a   : > { %s207_s12 = sshll.u32 %s200_s10, 4  ;;  %s3758_s12 = int_to_ptr.vmem [resolvable:$true] %s207_s12 }
  0x3d   : > { %s3756_s9 = scalar_lea.hbm %s4501_s1, %s3297_s25  ;;  %s3479_s8 = scalar_lea.hbm %s4501_s1, 1536 }
  0x3e   : > { %s3474_s26 = scalar_lea.hbm %s3756_s9, 768  ;;  %p3480_p13 = scmp.lt.u32.totalorder %s3756_s9, %s4501_s1 }
  0x3f   : > { %p3475_p5 = scmp.ne.s32.totalorder %s3756_s9, %s3474_s26  ;;  %p3481_p3 = scmp.lt.u32.totalorder %s3479_s8, %s3474_s26 }
  0x40   : > { %p3483_p11 = scmp.lt.u32.totalorder %s3474_s26, %s3756_s9 }
  0x41   : > { %p3477_p7 = pnand %p3475_p5, %p3723_p1  ;;  %p3482_p8 = por %p3481_p3, %p3480_p13 }
  0x43   : > { %p3478_p9 = pneg %p3477_p7  ;;  %p3484_p12 = por %p3483_p11, %p3482_p8 }
  0x45   : > { %p3485_p0 = pnand %p3484_p12, %p3478_p9 }
  0x47   : > { %3488 = shalt.err (!%p3485_p0)
}
  0x48   : > { %s3489_s24 = scalar_lea.vmem %s3758_s12, 768  ;;  %s3611_s10 = smov [#allocation3]  }
  0x49   : > { %p3490_p2 = scmp.ne.s32.totalorder %s3758_s12, %s3489_s24  ;;  %s3494_s11 = sshll.u32 %s3611_s10, 4  ;;  %s3495_s11 = int_to_ptr.vmem [resolvable:$false] %s3494_s11 }
  0x4a   : > { %s3496_s13 = scalar_lea.vmem %s3495_s11, 1536  ;;  %p3497_p5 = scmp.lt.s32.totalorder %s3758_s12, %s3495_s11 }
  0x4b   : > { %p3492_p4 = pnand %p3490_p2, %p3723_p1  ;;  %p3498_p7 = scmp.lt.s32.totalorder %s3496_s13, %s3489_s24 }
  0x4d   : > { %p3493_p6 = pneg %p3492_p4  ;;  %p3499_p13 = por %p3498_p7, %p3497_p5 }
  0x4f   : > { %p3500_p3 = pnand %p3499_p13, %p3493_p6 }
  0x51   : > { %3503 = shalt.err (!%p3500_p3)
}
  0x52   : > { %3316 = dma.hbm_to_vmem [thread:$0]  (!%p3697_p10), %s3756_s9, 768, %s3758_s12, %s197_s2, %s3609_s16, %s3609_s16, %s3610_s18  }
  0x53   : > { %s3301_s26 = smul.u32 48, %s3606_s21  ;;  %s242_s8 = scalar_lea.vmem [#allocation7], %s3300_s7 }
  0x54   : > { %s250_s25 = sshll.u32 %s242_s8, 4  ;;  %s2334_s6 = sshll.u32 %s3606_s21, 4  ;;  %s3790_s25 = int_to_ptr.vmem [resolvable:$true] %s250_s25 }
  0x55   : > { %s248_s11 = scalar_lea.hbm %s4481_s3, %s3301_s26  ;;  %s3799_s20 = scalar_lea.hbm %s4482_s4, %s2334_s6 }
  0x56   : > { %s3504_s23 = scalar_lea.hbm %s248_s11, 48  ;;  %s3509_s18 = scalar_lea.hbm %s4481_s3, 96 }
  0x57   : > { %p3505_p9 = scmp.ne.s32.totalorder %s248_s11, %s3504_s23  ;;  %p3510_p12 = scmp.lt.u32.totalorder %s248_s11, %s4481_s3 }
  0x58   : > { %p3511_p0 = scmp.lt.u32.totalorder %s3509_s18, %s3504_s23  ;;  %p3513_p4 = scmp.lt.u32.totalorder %s3504_s23, %s248_s11 }
  0x59   : > { %p3507_p8 = pnand %p3505_p9, %p3723_p1 }
  0x5a   : > { %p3512_p2 = por %p3511_p0, %p3510_p12 }
  0x5b   : > { %p3508_p11 = pneg %p3507_p8 }
  0x5c   : > { %p3514_p6 = por %p3513_p4, %p3512_p2 }
  0x5e   : > { %p3515_p5 = pnand %p3514_p6, %p3508_p11 }
  0x60   : > { %3518 = shalt.err (!%p3515_p5)
}
  0x61   : > { %s3519_s1 = scalar_lea.vmem %s3790_s25, 48  ;;  %s3612_s9 = smov [#allocation7]  }
  0x62   : > { %p3520_p7 = scmp.ne.s32.totalorder %s3790_s25, %s3519_s1  ;;  %s3524_s12 = sshll.u32 %s3612_s9, 4  ;;  %s3525_s12 = int_to_ptr.vmem [resolvable:$false] %s3524_s12 }
  0x63   : > { %s3526_s26 = scalar_lea.vmem %s3525_s12, 96  ;;  %p3527_p9 = scmp.lt.s32.totalorder %s3790_s25, %s3525_s12 }
  0x64   : > { %p3522_p13 = pnand %p3520_p7, %p3723_p1  ;;  %p3528_p8 = scmp.lt.s32.totalorder %s3526_s26, %s3519_s1 }
  0x66   : > { %p3523_p3 = pneg %p3522_p13  ;;  %p3529_p12 = por %p3528_p8, %p3527_p9 }
  0x68   : > { %p3530_p0 = pnand %p3529_p12, %p3523_p3 }
  0x6a   : > { %3533 = shalt.err (!%p3530_p0)
}
  0x6b   : > { %3322 = dma.hbm_to_vmem [thread:$0]  (!%p3697_p10), %s248_s11, 48, %s3790_s25, %s3717_s15  }
  0x6c   : > { %s260_s23 = scalar_lea.vmem [#allocation8], %s3695_s29  ;;  %s258_s6 = scalar_lea.sflag [#allocation9], %s3695_s29 }
  0x6d   : > { %s267_s8 = sshll.u32 %s260_s23, 4  ;;  %s3534_s24 = scalar_lea.hbm %s3799_s20, 16  ;;  %s268_s8 = int_to_ptr.vmem [resolvable:$true] %s267_s8 }
  0x6e   : > { %p3535_p11 = scmp.ne.s32.totalorder %s3799_s20, %s3534_s24  ;;  %s3539_s2 = scalar_lea.hbm %s4482_s4, 32 }
  0x6f   : > { %p3540_p6 = scmp.lt.u32.totalorder %s3799_s20, %s4482_s4  ;;  %p3541_p5 = scmp.lt.u32.totalorder %s3539_s2, %s3534_s24 }
  0x70   : > { %p3537_p2 = pnand %p3535_p11, %p3723_p1  ;;  %p3543_p13 = scmp.lt.u32.totalorder %s3534_s24, %s3799_s20 }
  0x71   : > { %p3542_p7 = por %p3541_p5, %p3540_p6 }
  0x72   : > { %p3538_p4 = pneg %p3537_p2 }
  0x73   : > { %p3544_p3 = por %p3543_p13, %p3542_p7 }
  0x75   : > { %p3545_p9 = pnand %p3544_p3, %p3538_p4 }
  0x77   : > { %3548 = shalt.err (!%p3545_p9)
}
  0x78   : > { %s3549_s29 = scalar_lea.vmem %s268_s8, 16  ;;  %s3613_s15 = smov [#allocation8]  }
  0x79   : > { %p3550_p8 = scmp.ne.s32.totalorder %s268_s8, %s3549_s29  ;;  %s3554_s25 = sshll.u32 %s3613_s15, 4  ;;  %s3555_s25 = int_to_ptr.vmem [resolvable:$false] %s3554_s25 }
  0x7a   : > { %s3556_s11 = scalar_lea.vmem %s3555_s25, 32  ;;  %p3557_p11 = scmp.lt.s32.totalorder %s268_s8, %s3555_s25 }
  0x7b   : > { %p3552_p12 = pnand %p3550_p8, %p3723_p1  ;;  %p3558_p2 = scmp.lt.s32.totalorder %s3556_s11, %s3549_s29 }
  0x7d   : > { %p3553_p0 = pneg %p3552_p12  ;;  %p3559_p10 = por %p3558_p2, %p3557_p11 }
  0x7f   : > { %p3560_p5 = pnand %p3559_p10, %p3553_p0 }
  0x81   : > { %3563 = shalt.err (!%p3560_p5)
}
  0x82   : > { %p4502_p6 = scmp.ne.s32.totalorder %s4497_s30, 0  ;;  %p4503_p4 = scmp.ne.s32.totalorder %s4499_s14, 0 }
  0x83   : > { %s3840_s17 = sand.u32 (!%p4503_p4), 1, %s3598_s19   ;;  %p4504_p1 = scmp.ne.s32.totalorder (!%p4503_p4), %s4495_s27, 0 }
  0x84   : > { %3325 = dma.hbm_to_vmem [thread:$0]  (!%p4502_p6), %s3799_s20, 16, %s268_s8, %s258_s6  }
  0x85   : > { %276 = sbr.rel (%p4503_p4) target bundleno = 2280 (0x8e8), region = 40  ;;  %s279_s21 = scalar_lea.sflag (!%p4503_p4), [#allocation4], %s3840_s17 }
  0x86   : > { %s3302_s7 = smul.u32 (!%p4503_p4), 48, %s3840_s17 }
  0x88   : > { %s3844_s1 = scalar_lea.vmem (!%p4503_p4), [#allocation3], %s3302_s7 }
  0x8c   : > { %3581 = dma.done.wait (%p4504_p1), %s279_s21, 768  }
  0x8d   : > { %3583 = vsyncadd (%p4504_p1), %s279_s21, 4294966528  ;;  %s287_s20 = sand.u32 1, %s3666_s22   ;;  %s3303_s30 = smul.u32 384, %s3840_s17 }
  0x8e   : > { %s288_s14 = scalar_lea.sflag [#allocation6], %s287_s20 }
  0x8f   : > { %s3852_s9 = scalar_lea.vmem [#allocation5], %s3303_s30 }
  0x90   : > { %3585 = dma.done.wait (%p4504_p1), %s288_s14, 6192  }
  0x91   : > { %3587 = vsyncadd (%p4504_p1), %s288_s14, 4294961104  ;;  %s3304_s12 = smul.u32 3, %s3840_s17  ;;  %s306_s23 = scalar_lea.sflag [#allocation9], %s3840_s17 }
  0x92   : > { %s308_s8 = scalar_lea.vmem [#allocation8], %s3840_s17 }
  0x93   : > { %s3859_s26 = scalar_lea.vmem [#allocation7], %s3304_s12 }
  0x94   : > { %3589 = dma.done.wait (%p4504_p1), %s306_s23, 16  }
  0x95   : > { %3591 = vsyncadd (%p4504_p1), %s306_s23, 4294967280  ;;  %v3614_v0 = vmov 0.0   ;;  %v357_v1 = vld [vmem:[%s3844_s1 + $0x8] sm:$0xff]  ;;  %v360_v2 = vld [vmem:[%s3844_s1 + $0x20] sm:$0xff]  ;;  %vm379_vm0 = vcmask 130048   ;;  %v3615_v37 = vmov 0.0|0.0  }
  0x96   : > { %468 = vmatprep.mubr.f32.mxu0 %v3614_v0  ;;  %v356_v3 = vld [vmem:[%s3844_s1] sm:$0xff]  ;;  %v2840_v4 = vpack.c.bf16 %v360_v2, %v357_v1  ;;  %v359_v5 = vld [vmem:[%s3844_s1 + $0x18] sm:$0xff]  ;;  %v358_v21 = vld [vmem:[%s3844_s1 + $0x10] sm:$0xff]  ;;  %vm3616_vm1 = vmmov 0   ;;  %p4505_p10 = scmp.eq.s32.totalorder %s3666_s22, 0  ;;  %s2336_s23 = sshll.u32 %s3840_s17, 6 }
  0x97   : > { %v348_v6 = vld [vmem:[%s4478_s0] sm:$0xff]  ;;  %v2842_v7 = vpack.c.bf16 %v359_v5, %v356_v3  ;;  %v647_v8 = vld [vmem:[%s3852_s9 + $0x8] sm:$0xff]  ;;  %v649_v12 = vld [vmem:[%s3852_s9 + $0x18] sm:$0xff]  ;;  %s4125_s27 = scalar_lea.vmem [#allocation10], %s2336_s23  ;;  %p4513_p11 = scmp.ne.s32.totalorder %s4496_s28, 0 }
  0x98   : > { %v650_v9 = vld [vmem:[%s3852_s9 + $0x20] sm:$0xff]  ;;  %2548 = vmatprep.mubr.msk.f32.mxu1 %vm379_vm0, %v348_v6  ;;  %2841 = vmatprep.subr.bf16.mxu0 %v2840_v4  ;;  %v653_v13 = vld [vmem:[%s3852_s9 + $0x38] sm:$0xff]  ;;  %v656_v15 = vld [vmem:[%s3852_s9 + $0x50] sm:$0xff]  ;;  %s4109_s30 = scalar_select %p4505_p10, 0, 7 }
  0x99   : > { %v646_v10 = vld [vmem:[%s3852_s9] sm:$0xff]  ;;  %v3879_v11 = vpack.c.bf16 %v650_v9, %v647_v8  ;;  %2843 = vmatpush1.bf16.msra.mxu0 %v2842_v7  ;;  %v3887_v16 = vpack.c.bf16 %v656_v15, %v653_v13  ;;  %v652_v17 = vld [vmem:[%s3852_s9 + $0x30] sm:$0xff]  ;;  %v655_v18 = vld [vmem:[%s3852_s9 + $0x48] sm:$0xff]  ;;  %p4506_p7 = pmov %p4505_p10 }
  0x9a   : > { %v3883_v14 = vpack.c.bf16 %v649_v12, %v646_v10  ;;  %v659_v19 = vld [vmem:[%s3852_s9 + $0x68] sm:$0xff]  ;;  %v662_v20 = vld [vmem:[%s3852_s9 + $0x80] sm:$0xff]  ;;  %v3901_v24 = vpack.c.bf16 %v655_v18, %v652_v17  ;;  %v661_v28 = vld [vmem:[%s3852_s9 + $0x78] sm:$0xff]  ;;  %s2353_s14 = sshll.u32 %s4109_s30, 3 }
  0x9b   : > { %2849 = vmatprep.subr.bf16.mxu0 %v3879_v11  ;;  %v361_v22 = vld [vmem:[%s3844_s1 + $0x28] sm:$0xff]  ;;  %v3904_v26 = vpack.c.bf16 %v662_v20, %v659_v19  ;;  %v658_v27 = vld [vmem:[%s3852_s9 + $0x60] sm:$0xff]  ;;  %v668_v30 = vld [vmem:[%s3852_s9 + $0xb0] sm:$0xff]  ;;  %s4172_s17 = scalar_select %p4506_p7, 1, 6 }
  0x9c   : > { %2337 = vmatmul.mubr.msk.f32.vlgmr.msra.gmra.mrb[0].mxu0 %vm379_vm0, %v348_v6  ;;  %v349_v23 = vld [vmem:[%s4478_s0 + $0x8] sm:$0xff]  ;;  %v2844_v25 = vpack.c.bf16 %v361_v22, %v358_v21  ;;  %v665_v29 = vld [vmem:[%s3852_s9 + $0x98] sm:$0xff]  ;;  %v350_v31 = vld [vmem:[%s4478_s0 + $0x10] sm:$0xff]  ;;  %v3916_v32 = vpack.c.bf16 %v661_v28, %v658_v27  ;;  %p4507_p13 = pmov %p4506_p7  ;;  %p4508_p3 = pmov %p4506_p7 }
  0x9d   : > { %474 = vmatprep.mubr.f32.mxu0 %v3614_v0  ;;  %2851 = vmatpush1.bf16.msra.mxu0 %v3883_v14  ;;  %v3919_v33 = vpack.c.bf16 %v668_v30, %v665_v29  ;;  %v664_v34 = vld [vmem:[%s3852_s9 + $0x90] sm:$0xff]  ;;  %v667_v35 = vld [vmem:[%s3852_s9 + $0xa8] sm:$0xff]  ;;  %v674_v38 = vld [vmem:[%s3852_s9 + $0xe0] sm:$0xff]  ;;  %s2358_s6 = sshll.u32 %s4172_s17, 3 }
  0x9e   : > { %2853 = vmatprep.subr.bf16.mxu0 %v3887_v16  ;;  %2845 = vmatprep.subr.bf16.mxu1 %v2844_v25  ;;  %v671_v36 = vld [vmem:[%s3852_s9 + $0xc8] sm:$0xff]  ;;  %v648_v39 = vld [vmem:[%s3852_s9 + $0x10] sm:$0xff]  ;;  %v351_v41 = vld [vmem:[%s4478_s0 + $0x18] sm:$0xff]  ;;  %v3941_v44 = vpack.c.bf16 %v667_v35, %v664_v34  ;;  %v364_v35 = vlaneseq  ;;  %s879_s24 = sshra.s32 %s2358_s6, 3  ;;  %s1050_s2 = scalar_lea.vmem %s4125_s27, %s2358_s6 [#allocation10] }
  0x9f   : > { %2847 = vmatpush3.bf16.msra.mxu1 %v2844_v25  ;;  %v651_v40 = vld [vmem:[%s3852_s9 + $0x28] sm:$0xff]  ;;  %v352_v43 = vld [vmem:[%s4478_s0 + $0x20] sm:$0xff]  ;;  %v657_v46 = vld [vmem:[%s3852_s9 + $0x58] sm:$0xff]  ;;  %v3946_v47 = vpack.c.bf16 %v674_v38, %v671_v36  ;;  %s2391_s10 = smul.u32 24, %s879_s24  ;;  %p4509_p9 = pmov %p4508_p3 }
  0xa0   : > { %2338 = vmatmul.mubr.msk.f32.gmra.mrb[2].mxu0 %vm379_vm0, %v349_v23  ;;  %2880 = vmatprep.subr.bf16.mxu1 %v3615_v37  ;;  %v3934_v42 = vpack.c.bf16 %v651_v40, %v648_v39  ;;  %v654_v45 = vld [vmem:[%s3852_s9 + $0x40] sm:$0xff]  ;;  %v673_v49 = vld [vmem:[%s3852_s9 + $0xd8] sm:$0xff]  ;;  %v680_v52 = vld [vmem:[%s3852_s9 + $0x110] sm:$0xff]  ;;  %v365_v36 = vshrl.u32 %v364_v35, 7  ;;  %s4224_s16 = scalar_select %p4507_p13, 2, 5 }
  0xa1   : > { %480 = vmatprep.mubr.f32.mxu0 %v3614_v0  ;;  %2855 = vmatpush1.bf16.msra.mxu0 %v3901_v24  ;;  %v670_v48 = vld [vmem:[%s3852_s9 + $0xc0] sm:$0xff]  ;;  %v677_v50 = vld [vmem:[%s3852_s9 + $0xf8] sm:$0xff]  ;;  %v3952_v51 = vpack.c.bf16 %v657_v46, %v654_v45  ;;  %v660_v53 = vld [vmem:[%s3852_s9 + $0x70] sm:$0xff]  ;;  %s883_s13 = scalar_lea.vmem [#allocation2], %s2391_s10  ;;  %p4510_p8 = pmov %p4508_p3 }
  0xa2   : > { %2857 = vmatprep.subr.bf16.mxu0 %v3904_v26  ;;  %2549 = vmatmul.mubr.msk.f32.vlgmr.msra.gmra.mrb[0].mxu1 %vm379_vm0, %v349_v23  ;;  %v663_v54 = vld [vmem:[%s3852_s9 + $0x88] sm:$0xff]  ;;  %v3966_v56 = vpack.c.bf16 %v673_v49, %v670_v48  ;;  %v354_v57 = vld [vmem:[%s4478_s0 + $0x30] sm:$0xff]  ;;  %v3972_v58 = vpack.c.bf16 %v680_v52, %v677_v50  ;;  %v686_v63 = vld [vmem:[%s3852_s9 + $0x140] sm:$0xff]  ;;  %v366_v38 = vsub.s32 0, %v365_v36  ;;  %v370_v40 = vsub.s32 1, %v365_v36  ;;  %s2362_s18 = sshll.u32 %s4224_s16, 3  ;;  %p4511_p12 = pmov %p4508_p3 }
  0xa3   : > { %2551 = vmatprep.mubr.msk.f32.mxu1 %vm379_vm0, %v350_v31  ;;  %2882 = vmatpush3.bf16.msra.mxu1 %v3934_v42  ;;  %v353_v55 = vld [vmem:[%s4478_s0 + $0x28] sm:$0xff]  ;;  %v676_v59 = vld [vmem:[%s3852_s9 + $0xf0] sm:$0xff]  ;;  %v3978_v62 = vpack.c.bf16 %v663_v54, %v660_v53  ;;  %v666_v1 = vld [vmem:[%s3852_s9 + $0xa0] sm:$0xff]  ;;  %v374_v46 = vsub.s32 2, %v365_v36  ;;  %s1054_s29 = sshra.s32 %s2362_s18, 3  ;;  %s1225_s11 = scalar_lea.vmem %s4125_s27, %s2362_s18 [#allocation10] }
  0xa4   : > { %2339 = vmatmul.mubr.msk.f32.gmra.mrb[4].mxu0 %vm379_vm0, %v350_v31  ;;  %2883 = vmatprep.subr.bf16.mxu1 %v3615_v37  ;;  %v679_v60 = vld [vmem:[%s3852_s9 + $0x108] sm:$0xff]  ;;  %v669_v2 = vld [vmem:[%s3852_s9 + $0xb8] sm:$0xff]  ;;  %v682_v6 = vld [vmem:[%s3852_s9 + $0x120] sm:$0xff]  ;;  %s2392_s15 = smul.u32 24, %s1054_s29  ;;  %p4512_p0 = pmov %p4508_p3 }
  0xa5   : > { %486 = vmatprep.mubr.f32.mxu0 %v3614_v0  ;;  %2859 = vmatpush1.bf16.msra.mxu0 %v3916_v32  ;;  %v683_v61 = vld [vmem:[%s3852_s9 + $0x128] sm:$0xff]  ;;  %v3989_v3 = vpack.c.bf16 %v679_v60, %v676_v59  ;;  %v355_v4 = vld [vmem:[%s4478_s0 + $0x38] sm:$0xff]  ;;  %v4001_v9 = vpack.c.bf16 %v669_v2, %v666_v1  ;;  %v692_v10 = vld [vmem:[%s3852_s9 + $0x170] sm:$0xff]  ;;  %s4276_s7 = scalar_select %p4508_p3, 3, 4 }
  0xa6   : > { %2861 = vmatprep.subr.bf16.mxu0 %v3919_v33  ;;  %2552 = vmatmul.mubr.msk.f32.gmra.mrb[2].mxu1 %vm379_vm0, %v351_v41  ;;  %v3995_v5 = vpack.c.bf16 %v686_v63, %v683_v61  ;;  %v685_v7 = vld [vmem:[%s3852_s9 + $0x138] sm:$0xff]  ;;  %v672_v12 = vld [vmem:[%s3852_s9 + $0xd0] sm:$0xff]  ;;  %v675_v13 = vld [vmem:[%s3852_s9 + $0xe8] sm:$0xff]  ;;  %s1058_s25 = scalar_lea.vmem [#allocation2], %s2392_s15 }
  0xa7   : > { %2554 = vmatprep.mubr.msk.f32.mxu1 %vm379_vm0, %v352_v43  ;;  %2885 = vmatpush3.bf16.msra.mxu1 %v3952_v51  ;;  %v689_v8 = vld [vmem:[%s3852_s9 + $0x158] sm:$0xff]  ;;  %v4013_v15 = vpack.c.bf16 %v685_v7, %v682_v6  ;;  %v688_v18 = vld [vmem:[%s3852_s9 + $0x150] sm:$0xff]  ;;  %v691_v19 = vld [vmem:[%s3852_s9 + $0x168] sm:$0xff]  ;;  %v4021_v20 = vpack.c.bf16 %v675_v13, %v672_v12  ;;  %s2366_s21 = sshll.u32 %s4276_s7, 3 }
  0xa8   : > { %2340 = vmatmul.mubr.msk.f32.gmra.mrb[6].mxu0 %vm379_vm0, %v351_v41  ;;  %2886 = vmatprep.subr.bf16.mxu1 %v3615_v37  ;;  %v4016_v17 = vpack.c.bf16 %v692_v10, %v689_v8  ;;  %v678_v21 = vld [vmem:[%s3852_s9 + $0x100] sm:$0xff]  ;;  %v681_v22 = vld [vmem:[%s3852_s9 + $0x118] sm:$0xff]  ;;  %v4029_v23 = vpack.c.bf16 %v691_v19, %v688_v18  ;;  %v684_v27 = vld [vmem:[%s3852_s9 + $0x130] sm:$0xff]  ;;  %s1229_s1 = sshra.s32 %s2366_s21, 3 }
  0xa9   : > { %492 = vmatprep.mubr.f32.mxu0 %v3614_v0  ;;  %2863 = vmatpush1.bf16.msra.mxu0 %v3941_v44  ;;  %v4033_v25 = vpack.c.bf16 %v681_v22, %v678_v21  ;;  %v687_v28 = vld [vmem:[%s3852_s9 + $0x148] sm:$0xff]  ;;  %v690_v30 = vld [vmem:[%s3852_s9 + $0x160] sm:$0xff]  ;;  %v693_v31 = vld [vmem:[%s3852_s9 + $0x178] sm:$0xff]  ;;  %s698_s9 = sshra.s32 %s2353_s14, 3  ;;  %s2393_s20 = smul.u32 24, %s1229_s1 }
  0xaa   : > { %2865 = vmatprep.subr.bf16.mxu0 %v3946_v47  ;;  %2555 = vmatmul.mubr.msk.f32.gmra.mrb[4].mxu1 %vm379_vm0, %v353_v55  ;;  %v4042_v29 = vpack.c.bf16 %v687_v28, %v684_v27  ;;  %v4052_v34 = vpack.c.bf16 %v693_v31, %v690_v30  ;;  %v362_v39 = vld [vmem:[%s3859_s26] sm:$0x7]  ;;  %s2390_s12 = smul.u32 24, %s698_s9 }
  0xab   : > { %2557 = vmatprep.mubr.msk.f32.mxu1 %vm379_vm0, %v354_v57  ;;  %2888 = vmatpush3.bf16.msra.mxu1 %v3978_v62  ;;  %v4092_v41 = vrot.slane %v362_v39, %v366_v38  ;;  %v375_v53 = vrot.slane %v362_v39, %v374_v46  ;;  %s1233_s30 = scalar_lea.vmem [#allocation2], %s2393_s20 }
  0xac   : > { %2341 = vmatmul.mubr.msk.f32.gmra.mrb[8].mxu0 %vm379_vm0, %v352_v43  ;;  %2889 = vmatprep.subr.bf16.mxu1 %v3615_v37  ;;  %v4094_v43 = vrot.slane %v362_v39, %v370_v40  ;;  %s702_s26 = scalar_lea.vmem [#allocation2], %s2390_s12 }
  0xad   : > { %498 = vmatprep.mubr.f32.mxu0 %v3614_v0  ;;  %2867 = vmatpush1.bf16.msra.mxu0 %v3966_v56  ;;  %s4328_s9 = scalar_select %p4509_p9, 4, 3 }
  0xae   : > { %2869 = vmatprep.subr.bf16.mxu0 %v3972_v58  ;;  %2558 = vmatmul.mubr.msk.f32.gmra.mrb[6].mxu1 %vm379_vm0, %v355_v4  ;;  %s4380_s6 = scalar_select %p4510_p8, 5, 2 }
  0xaf   : > { %2592 = vmatprep.mubr.msk.f32.mxu1 %vm3616_vm1, %v3614_v0  ;;  %2891 = vmatpush3.bf16.msra.mxu1 %v4001_v9  ;;  %s2370_s12 = sshll.u32 %s4328_s9, 3 }
  0xb0   : > { %2342 = vmatmul.mubr.msk.f32.gmra.mrb[10].mxu0 %vm379_vm0, %v353_v55  ;;  %2892 = vmatprep.subr.bf16.mxu1 %v3615_v37  ;;  %s1575_s17 = scalar_lea.vmem %s4125_s27, %s2370_s12 [#allocation10]  ;;  %s2374_s24 = sshll.u32 %s4380_s6, 3 }
  0xb1   : > { %504 = vmatprep.mubr.f32.mxu0 %v3614_v0  ;;  %2871 = vmatpush1.bf16.msra.mxu0 %v3989_v3  ;;  %s1579_s10 = sshra.s32 %s2374_s24, 3  ;;  %s1750_s16 = scalar_lea.vmem %s4125_s27, %s2374_s24 [#allocation10] }
  0xb2   : > { %2873 = vmatprep.subr.bf16.mxu0 %v3995_v5  ;;  %s4430_s18 = scalar_select %p4511_p12, 6, 1 }
  0xb3   : > { %2894 = vmatpush3.bf16.msra.mxu1 %v4021_v20 }
  0xb4   : > { %2343 = vmatmul.mubr.msk.f32.gmra.mrb[12].mxu0 %vm379_vm0, %v354_v57  ;;  %2895 = vmatprep.subr.bf16.mxu1 %v3615_v37  ;;  %s2378_s29 = sshll.u32 %s4430_s18, 3 }
  0xb5   : > { %510 = vmatprep.mubr.f32.mxu0 %v3614_v0  ;;  %2875 = vmatpush1.bf16.msra.mxu0 %v4013_v15  ;;  %s1754_s15 = sshra.s32 %s2378_s29, 3  ;;  %s1925_s7 = scalar_lea.vmem %s4125_s27, %s2378_s29 [#allocation10] }
  0xb6   : > { %2877 = vmatprep.subr.bf16.mxu0 %v4016_v17 }
  0xb7   : > { %2897 = vmatpush3.bf16.msra.mxu1 %v4033_v25 }
  0xb8   : > { %2344 = vmatmul.mubr.msk.f32.gmra.mrb[14].mxu0 %vm379_vm0, %v355_v4  ;;  %2898 = vmatprep.subr.bf16.mxu1 %v3615_v37 }
  0xb9   : > { %2879 = vmatpush1.bf16.msra.mxu0 %v4029_v23  ;;  %770 = vmatprep.mubr.f32.mxu0 %v3614_v0 }
  0xba   : > { %2905 = vmatprep.subr.bf16.mxu0 %v3879_v11 }
  0xbb   : > { %2900 = vmatpush3.bf16.msra.mxu1 %v4042_v29 }
  0xbc   : > { %771 = vmatmul.mubr.f32.vlgmr.msra.gmra.mrb[16].mxu0 %v3614_v0  ;;  %2901 = vmatprep.subr.bf16.mxu1 %v3615_v37 }
  0xbd   : > { %2907 = vmatpush1.bf16.msra.mxu0 %v3883_v14  ;;  %951 = vmatprep.mubr.f32.mxu0 %v3614_v0 }
  0xbe   : > { %2909 = vmatprep.subr.bf16.mxu0 %v3887_v16 }
  0xbf   : > { %2903 = vmatpush3.bf16.msra.mxu1 %v4052_v34 }
  0xc0   : > { %2936 = vmatprep.subr.bf16.mxu1 %v3615_v37 }
  0xc1   : > { %2911 = vmatpush1.bf16.msra.mxu0 %v3901_v24 }
  0xc2   : > { %2913 = vmatprep.subr.bf16.mxu0 %v3904_v26  ;;  %2593 = vmatmul.mubr.f32.vlgmr.msra.gmra.mrb[8].mxu1 %v3614_v0 }
  0xc3   : > { %2938 = vmatpush3.bf16.msra.mxu1 %v3934_v42  ;;  %2627 = vmatprep.mubr.msk.f32.mxu1 %vm3616_vm1, %v3614_v0 }
  0xc4   : > { %2939 = vmatprep.subr.bf16.mxu1 %v3615_v37 }
  0xc5   : > { %2915 = vmatpush1.bf16.msra.mxu0 %v3916_v32 }
  0xc6   : > { %2917 = vmatprep.subr.bf16.mxu0 %v3919_v33 }
  0xc7   : > { %2941 = vmatpush3.bf16.msra.mxu1 %v3952_v51 }
  0xc8   : > { %2942 = vmatprep.subr.bf16.mxu1 %v3615_v37 }
  0xc9   : > { %2919 = vmatpush1.bf16.msra.mxu0 %v3941_v44 }
  0xca   : > { %2921 = vmatprep.subr.bf16.mxu0 %v3946_v47 }
  0xcb   : > { %2944 = vmatpush3.bf16.msra.mxu1 %v3978_v62 }
  0xcc   : > { %2945 = vmatprep.subr.bf16.mxu1 %v3615_v37 }
  0xcd   : > { %2923 = vmatpush1.bf16.msra.mxu0 %v3966_v56 }
  0xce   : > { %2925 = vmatprep.subr.bf16.mxu0 %v3972_v58 }
  0xcf   : > { %2947 = vmatpush3.bf16.msra.mxu1 %v4001_v9 }
  0xd0   : > { %2948 = vmatprep.subr.bf16.mxu1 %v3615_v37 }
  0xd1   : > { %2927 = vmatpush1.bf16.msra.mxu0 %v3989_v3 }
  0xd2   : > { %2929 = vmatprep.subr.bf16.mxu0 %v3995_v5 }
  0xd3   : > { %2950 = vmatpush3.bf16.msra.mxu1 %v4021_v20 }
  0xd4   : > { %2951 = vmatprep.subr.bf16.mxu1 %v3615_v37 }
  0xd5   : > { %2931 = vmatpush1.bf16.msra.mxu0 %v4013_v15 }
  0xd6   : > { %2933 = vmatprep.subr.bf16.mxu0 %v4016_v17 }
  0xd7   : > { %2953 = vmatpush3.bf16.msra.mxu1 %v4033_v25 }
  0xd8   : > { %2954 = vmatprep.subr.bf16.mxu1 %v3615_v37 }
  0xd9   : > { %2935 = vmatpush1.bf16.msra.mxu0 %v4029_v23 }
  0xda   : > { %2961 = vmatprep.subr.bf16.mxu0 %v3879_v11 }
  0xdb   : > { %2956 = vmatpush3.bf16.msra.mxu1 %v4042_v29 }
  0xdc   : > { %2957 = vmatprep.subr.bf16.mxu1 %v3615_v37 }
  0xdf   : > { %2959 = vmatpush3.bf16.msra.mxu1 %v4052_v34 }
  0xe0   : > { %2992 = vmatprep.subr.bf16.mxu1 %v3615_v37 }
 0x16f   : > { %v470_v45 = vpop.f32.mrb[0].mxu0 }
 0x170   : > { %v471_v48 = vadd.f32 %v470_v45, %v4092_v41  ;;  %v472_v49 = vpop.f32.mrb[1].mxu0 }
 0x171   : > { %v473_v50 = vadd.f32 %v472_v49, %v4094_v43 }
 0x172   : > { %622 = vst [vmem:[#allocation2] sm:$0xff] %v471_v48 }
 0x173   : > { %623 = vst [vmem:[#allocation2 + $0x8] sm:$0xff] %v473_v50  ;;  %v476_v52 = vpop.f32.mrb[2].mxu0 }
 0x174   : > { %v477_v54 = vadd.f32 %v476_v52, %v4092_v41  ;;  %v478_v55 = vpop.f32.mrb[3].mxu0 }
 0x175   : > { %v479_v57 = vadd.f32 %v478_v55, %v4094_v43  ;;  %v2550_v59 = vpop.f32.mrb[0].mxu1 }
 0x176   : > { %625 = vst [vmem:[#allocation2 + $0x18] sm:$0xff] %v477_v54  ;;  %v589_v61 = vadd.f32 %v2550_v59, %v375_v53  ;;  %v583_v63 = vpop.f32.mrb[1].mxu1 }
 0x177   : > { %626 = vst [vmem:[#allocation2 + $0x20] sm:$0xff] %v479_v57  ;;  %v482_v60 = vpop.f32.mrb[4].mxu0  ;;  %v584_v4 = vadd.f32 %v583_v63, %v375_v53 }
 0x178   : > { %v483_v1 = vadd.f32 %v482_v60, %v4092_v41  ;;  %v484_v2 = vpop.f32.mrb[5].mxu0  ;;  %627 = vst [vmem:[#allocation2 + $0x28] sm:$0xff] %v589_v61 }
 0x179   : > { %v485_v6 = vadd.f32 %v484_v2, %v4094_v43  ;;  %624 = vst [vmem:[#allocation2 + $0x10] sm:$0xff] %v584_v4  ;;  %v2553_v7 = vpop.f32.mrb[2].mxu1 }
 0x17a   : > { %628 = vst [vmem:[#allocation2 + $0x30] sm:$0xff] %v483_v1  ;;  %v599_v10 = vadd.f32 %v2553_v7, %v375_v53  ;;  %v593_v12 = vpop.f32.mrb[3].mxu1 }
 0x17b   : > { %629 = vst [vmem:[#allocation2 + $0x38] sm:$0xff] %v485_v6  ;;  %v488_v8 = vpop.f32.mrb[6].mxu0  ;;  %v594_v19 = vadd.f32 %v593_v12, %v375_v53 }
 0x17c   : > { %v489_v13 = vadd.f32 %v488_v8, %v4092_v41  ;;  %v490_v18 = vpop.f32.mrb[7].mxu0  ;;  %633 = vst [vmem:[#allocation2 + $0x58] sm:$0xff] %v599_v10 }
 0x17d   : > { %v491_v21 = vadd.f32 %v490_v18, %v4094_v43  ;;  %630 = vst [vmem:[#allocation2 + $0x40] sm:$0xff] %v594_v19  ;;  %v2556_v22 = vpop.f32.mrb[4].mxu1 }
 0x17e   : > { %631 = vst [vmem:[#allocation2 + $0x48] sm:$0xff] %v489_v13  ;;  %v609_v28 = vadd.f32 %v2556_v22, %v375_v53  ;;  %v603_v30 = vpop.f32.mrb[5].mxu1 }
 0x17f   : > { %632 = vst [vmem:[#allocation2 + $0x50] sm:$0xff] %v491_v21  ;;  %v494_v27 = vpop.f32.mrb[8].mxu0  ;;  %v604_v36 = vadd.f32 %v603_v30, %v375_v53  ;;  %v4121_v21 = vld [vmem:[%s308_s8] ss:$0 sm:$0xff]  ;;  %s875_s8 = scalar_lea.vmem %s4125_s27, %s2353_s14 [#allocation10]  ;;  %s1400_s14 = scalar_lea.vmem %s4125_s27, %s2366_s21 [#allocation10] }
 0x180   : > { %v495_v31 = vadd.f32 %v494_v27, %v4092_v41  ;;  %v496_v35 = vpop.f32.mrb[9].mxu0  ;;  %639 = vst [vmem:[#allocation2 + $0x88] sm:$0xff] %v609_v28  ;;  %s4442_s21 = scalar_select %p4512_p0, 7, 0 }
 0x181   : > { %v497_v38 = vadd.f32 %v496_v35, %v4094_v43  ;;  %636 = vst [vmem:[#allocation2 + $0x70] sm:$0xff] %v604_v36  ;;  %v2559_v39 = vpop.f32.mrb[6].mxu1 }
 0x182   : > { %634 = vst [vmem:[#allocation2 + $0x60] sm:$0xff] %v495_v31  ;;  %v619_v45 = vadd.f32 %v2559_v39, %v375_v53  ;;  %v613_v46 = vpop.f32.mrb[7].mxu1  ;;  %s2382_s1 = sshll.u32 %s4442_s21, 3 }
 0x183   : > { %635 = vst [vmem:[#allocation2 + $0x68] sm:$0xff] %v497_v38  ;;  %v500_v40 = vpop.f32.mrb[10].mxu0  ;;  %v614_v50 = vadd.f32 %v613_v46, %v375_v53  ;;  %s1929_s20 = sshra.s32 %s2382_s1, 3  ;;  %s2100_s9 = scalar_lea.vmem %s4125_s27, %s2382_s1 [#allocation10] }
 0x184   : > { %v501_v48 = vadd.f32 %v500_v40, %v4092_v41  ;;  %v502_v49 = vpop.f32.mrb[11].mxu0  ;;  %645 = vst [vmem:[#allocation2 + $0xb8] sm:$0xff] %v619_v45 }
 0x185   : > { %v503_v52 = vadd.f32 %v502_v49, %v4094_v43  ;;  %642 = vst [vmem:[#allocation2 + $0xa0] sm:$0xff] %v614_v50 }
 0x186   : > { %637 = vst [vmem:[#allocation2 + $0x78] sm:$0xff] %v501_v48 }
 0x187   : > { %638 = vst [vmem:[#allocation2 + $0x80] sm:$0xff] %v503_v52  ;;  %v506_v54 = vpop.f32.mrb[12].mxu0 }
 0x188   : > { %v507_v55 = vadd.f32 %v506_v54, %v4092_v41  ;;  %v508_v57 = vpop.f32.mrb[13].mxu0 }
 0x189   : > { %v509_v59 = vadd.f32 %v508_v57, %v4094_v43 }
 0x18a   : > { %640 = vst [vmem:[#allocation2 + $0x90] sm:$0xff] %v507_v55 }
 0x18b   : > { %641 = vst [vmem:[#allocation2 + $0x98] sm:$0xff] %v509_v59  ;;  %v512_v53 = vpop.f32.mrb[14].mxu0 }
 0x18c   : > { %v513_v60 = vadd.f32 %v512_v53, %v4092_v41  ;;  %v514_v61 = vpop.f32.mrb[15].mxu0 }
 0x18d   : > { %v515_v63 = vadd.f32 %v514_v61, %v4094_v43 }
 0x18e   : > { %643 = vst [vmem:[#allocation2 + $0xa8] sm:$0xff] %v513_v60 }
 0x18f   : > { %644 = vst [vmem:[#allocation2 + $0xb0] sm:$0xff] %v515_v63  ;;  %v772_v1 = vpop.f32.mrb[16].mxu0 }
 0x190   : > { %v774_v2 = vpop.f32.mrb[17].mxu0 }
 0x195   : > { %v843_v10 = vpop.f32.mrb[8].mxu1 }
 0x196   : > { %v703_v4 = vld [vmem:[%s702_s26] sm:$0xff]  ;;  %v704_v7 = vld [vmem:[%s702_s26 + $0x8] sm:$0xff]  ;;  %v2594_v13 = vpop.f32.mrb[9].mxu1  ;;  %v867_v27 = vadd.f32 %v4121_v21, %v843_v10  ;;  %v705_v31 = vld [vmem:[%s702_s26 + $0x10] sm:$0xff]  ;;  %s1404_s26 = sshra.s32 %s2370_s12, 3  ;;  %s2387_s12 = sshll.u32 (%p4513_p11), %s3666_s22, 3 }
 0x197   : > { %v847_v6 = vadd.f32 %v772_v1, %v703_v4  ;;  %v854_v12 = vadd.f32 %v774_v2, %v704_v7  ;;  %v884_v48 = vld [vmem:[%s883_s13] sm:$0xff]  ;;  %v885_v59 = vld [vmem:[%s883_s13 + $0x8] sm:$0xff]  ;;  %s2394_s23 = smul.u32 24, %s1404_s26 }
 0x199   : > { %v2355_v8 = vmul.f32 -1.442695, %v847_v6  ;;  %v2356_v18 = vmul.f32 -1.442695, %v854_v12 }
 0x19b   : > { %3364 = vpow2.f32 %v2355_v8  ;;  %v886_v8 = vld [vmem:[%s883_s13 + $0x10] sm:$0xff]  ;;  %s2395_s13 = smul.u32 24, %s1579_s10 }
 0x19c   : > { %3366 = vpow2.f32 %v2356_v18 }
 0x1a5   : > { %v3365_v41 = vpop.eup %3364 }
 0x1a6   : > { %v851_v43 = vadd.f32 1.0, %v3365_v41  ;;  %v3367_v19 = vpop.eup %3366 }
 0x1a7   : > { %v858_v22 = vadd.f32 1.0, %v3367_v19 }
 0x1a8   : > { %3368 = vrcp.f32 %v851_v43 }
 0x1a9   : > { %3370 = vrcp.f32 %v858_v22  ;;  %v1059_v22 = vld [vmem:[%s1058_s25] sm:$0xff] }
 0x1b2   : > { %v3369_v28 = vpop.eup %3368 }
 0x1b3   : > { %v868_v30 = vmul.f32 %v3369_v28, %v867_v27  ;;  %v3371_v36 = vpop.eup %3370 }
 0x1b4   : > { %v871_v38 = vsub.f32 1.0, %v3371_v36  ;;  %v873_v45 = vmul.f32 0.0, %v3371_v36 }
 0x1b5   : > { %v869_v35 = vadd.f32 %v868_v30, %v705_v31 }
 0x1b7   : > { %3372 = vtanh.f32 %v869_v35 }
 0x1c1   : > { %v3373_v39 = vpop.eup %3372 }
 0x1c2   : > { %v872_v40 = vmul.f32 %v3373_v39, %v871_v38  ;;  %v1060_v38 = vld [vmem:[%s1058_s25 + $0x8] sm:$0xff] }
 0x1c4   : > { %v4130_v46 = vadd.f32 %v873_v45, %v872_v40 }
 0x1c6   : > { %876 = vst [vmem:[%s875_s8] sm:$0xff] %v4130_v46  ;;  %952 = vmatmul.mubr.f32.vlgmr.msra.gmra.mrb[18].mxu0 %v4130_v46  ;;  %2628 = vmatmul.mubr.f32.vlgmr.msra.gmra.mrb[10].mxu1 %v4130_v46  ;;  %s1408_s8 = scalar_lea.vmem [#allocation2], %s2394_s23 }
 0x1c7   : > { %2963 = vmatpush1.bf16.msra.mxu0 %v3883_v14  ;;  %2994 = vmatpush3.bf16.msra.mxu1 %v3934_v42 }
 0x1c8   : > { %2965 = vmatprep.subr.bf16.mxu0 %v3887_v16  ;;  %2995 = vmatprep.subr.bf16.mxu1 %v3615_v37 }
 0x1c9   : > { %1126 = vmatprep.mubr.f32.mxu0 %v3614_v0  ;;  %2662 = vmatprep.mubr.msk.f32.mxu1 %vm3616_vm1, %v3614_v0 }
 0x1cb   : > { %2967 = vmatpush1.bf16.msra.mxu0 %v3901_v24  ;;  %2997 = vmatpush3.bf16.msra.mxu1 %v3952_v51 }
 0x1cc   : > { %2969 = vmatprep.subr.bf16.mxu0 %v3904_v26  ;;  %2998 = vmatprep.subr.bf16.mxu1 %v3615_v37 }
 0x1cf   : > { %2971 = vmatpush1.bf16.msra.mxu0 %v3916_v32  ;;  %3000 = vmatpush3.bf16.msra.mxu1 %v3978_v62 }
 0x1d0   : > { %2973 = vmatprep.subr.bf16.mxu0 %v3919_v33  ;;  %3001 = vmatprep.subr.bf16.mxu1 %v3615_v37 }
 0x1d3   : > { %2975 = vmatpush1.bf16.msra.mxu0 %v3941_v44  ;;  %3003 = vmatpush3.bf16.msra.mxu1 %v4001_v9 }
 0x1d4   : > { %2977 = vmatprep.subr.bf16.mxu0 %v3946_v47  ;;  %3004 = vmatprep.subr.bf16.mxu1 %v3615_v37 }
 0x1d7   : > { %2979 = vmatpush1.bf16.msra.mxu0 %v3966_v56  ;;  %3006 = vmatpush3.bf16.msra.mxu1 %v4021_v20 }
 0x1d8   : > { %2981 = vmatprep.subr.bf16.mxu0 %v3972_v58  ;;  %3007 = vmatprep.subr.bf16.mxu1 %v3615_v37 }
 0x1db   : > { %2983 = vmatpush1.bf16.msra.mxu0 %v3989_v3  ;;  %3009 = vmatpush3.bf16.msra.mxu1 %v4033_v25 }
 0x1dc   : > { %2985 = vmatprep.subr.bf16.mxu0 %v3995_v5  ;;  %3010 = vmatprep.subr.bf16.mxu1 %v3615_v37 }
 0x1df   : > { %2987 = vmatpush1.bf16.msra.mxu0 %v4013_v15  ;;  %3012 = vmatpush3.bf16.msra.mxu1 %v4042_v29 }
 0x1e0   : > { %2989 = vmatprep.subr.bf16.mxu0 %v4016_v17  ;;  %3013 = vmatprep.subr.bf16.mxu1 %v3615_v37 }
 0x1e3   : > { %2991 = vmatpush1.bf16.msra.mxu0 %v4029_v23  ;;  %3015 = vmatpush3.bf16.msra.mxu1 %v4052_v34 }
 0x1e4   : > { %3017 = vmatprep.subr.bf16.mxu0 %v3879_v11  ;;  %3048 = vmatprep.subr.bf16.mxu1 %v3615_v37 }
 0x299   : > { %v953_v49 = vpop.f32.mrb[18].mxu0  ;;  %v1024_v50 = vpop.f32.mrb[10].mxu1 }
 0x29a   : > { %v1028_v52 = vadd.f32 %v953_v49, %v884_v48  ;;  %v955_v54 = vpop.f32.mrb[19].mxu0  ;;  %v2629_v55 = vpop.f32.mrb[11].mxu1  ;;  %v1042_v4 = vadd.f32 %v4121_v21, %v1024_v50 }
 0x29b   : > { %v1035_v53 = vadd.f32 %v955_v54, %v885_v59  ;;  %v1061_v55 = vld [vmem:[%s1058_s25 + $0x10] sm:$0xff]  ;;  %s2396_s25 = smul.u32 24, %s1754_s15 }
 0x29c   : > { %v2360_v57 = vmul.f32 -1.442695, %v1028_v52 }
 0x29d   : > { %v2361_v60 = vmul.f32 -1.442695, %v1035_v53 }
 0x29e   : > { %3374 = vpow2.f32 %v2360_v57 }
 0x29f   : > { %3376 = vpow2.f32 %v2361_v60 }
 0x2a8   : > { %v3375_v61 = vpop.eup %3374 }
 0x2a9   : > { %v1032_v63 = vadd.f32 1.0, %v3375_v61  ;;  %v3377_v1 = vpop.eup %3376 }
 0x2aa   : > { %v1039_v2 = vadd.f32 1.0, %v3377_v1 }
 0x2ab   : > { %3378 = vrcp.f32 %v1032_v63 }
 0x2ac   : > { %3380 = vrcp.f32 %v1039_v2  ;;  %v1234_v2 = vld [vmem:[%s1233_s30] sm:$0xff] }
 0x2b5   : > { %v3379_v6 = vpop.eup %3378 }
 0x2b6   : > { %v1043_v7 = vmul.f32 %v3379_v6, %v1042_v4  ;;  %v3381_v12 = vpop.eup %3380 }
 0x2b7   : > { %v1046_v13 = vsub.f32 1.0, %v3381_v12  ;;  %v1048_v43 = vmul.f32 %v3381_v12, %v4130_v46 }
 0x2b8   : > { %v1044_v10 = vadd.f32 %v1043_v7, %v886_v8 }
 0x2ba   : > { %3382 = vtanh.f32 %v1044_v10 }
 0x2c4   : > { %v3383_v18 = vpop.eup %3382 }
 0x2c5   : > { %v1047_v41 = vmul.f32 %v3383_v18, %v1046_v13  ;;  %v1235_v13 = vld [vmem:[%s1233_s30 + $0x8] sm:$0xff] }
 0x2c7   : > { %v4182_v19 = vadd.f32 %v1048_v43, %v1047_v41 }
 0x2c9   : > { %1051 = vst [vmem:[%s1050_s2] sm:$0xff] %v4182_v19  ;;  %1127 = vmatmul.mubr.f32.vlgmr.msra.gmra.mrb[20].mxu0 %v4182_v19  ;;  %2663 = vmatmul.mubr.f32.vlgmr.msra.gmra.mrb[12].mxu1 %v4182_v19  ;;  %s1583_s2 = scalar_lea.vmem [#allocation2], %s2395_s13 }
 0x2ca   : > { %3019 = vmatpush1.bf16.msra.mxu0 %v3883_v14  ;;  %3050 = vmatpush3.bf16.msra.mxu1 %v3934_v42 }
 0x2cb   : > { %3021 = vmatprep.subr.bf16.mxu0 %v3887_v16  ;;  %3051 = vmatprep.subr.bf16.mxu1 %v3615_v37 }
 0x2cc   : > { %1301 = vmatprep.mubr.f32.mxu0 %v3614_v0  ;;  %2697 = vmatprep.mubr.msk.f32.mxu1 %vm3616_vm1, %v3614_v0 }
 0x2ce   : > { %3023 = vmatpush1.bf16.msra.mxu0 %v3901_v24  ;;  %3053 = vmatpush3.bf16.msra.mxu1 %v3952_v51 }
 0x2cf   : > { %3025 = vmatprep.subr.bf16.mxu0 %v3904_v26  ;;  %3054 = vmatprep.subr.bf16.mxu1 %v3615_v37 }
 0x2d2   : > { %3027 = vmatpush1.bf16.msra.mxu0 %v3916_v32  ;;  %3056 = vmatpush3.bf16.msra.mxu1 %v3978_v62 }
 0x2d3   : > { %3029 = vmatprep.subr.bf16.mxu0 %v3919_v33  ;;  %3057 = vmatprep.subr.bf16.mxu1 %v3615_v37 }
 0x2d6   : > { %3031 = vmatpush1.bf16.msra.mxu0 %v3941_v44  ;;  %3059 = vmatpush3.bf16.msra.mxu1 %v4001_v9 }
 0x2d7   : > { %3033 = vmatprep.subr.bf16.mxu0 %v3946_v47  ;;  %3060 = vmatprep.subr.bf16.mxu1 %v3615_v37 }
 0x2da   : > { %3035 = vmatpush1.bf16.msra.mxu0 %v3966_v56  ;;  %3062 = vmatpush3.bf16.msra.mxu1 %v4021_v20 }
 0x2db   : > { %3037 = vmatprep.subr.bf16.mxu0 %v3972_v58  ;;  %3063 = vmatprep.subr.bf16.mxu1 %v3615_v37 }
 0x2de   : > { %3039 = vmatpush1.bf16.msra.mxu0 %v3989_v3  ;;  %3065 = vmatpush3.bf16.msra.mxu1 %v4033_v25 }
 0x2df   : > { %3041 = vmatprep.subr.bf16.mxu0 %v3995_v5  ;;  %3066 = vmatprep.subr.bf16.mxu1 %v3615_v37 }
 0x2e2   : > { %3043 = vmatpush1.bf16.msra.mxu0 %v4013_v15  ;;  %3068 = vmatpush3.bf16.msra.mxu1 %v4042_v29 }
 0x2e3   : > { %3045 = vmatprep.subr.bf16.mxu0 %v4016_v17  ;;  %3069 = vmatprep.subr.bf16.mxu1 %v3615_v37 }
 0x2e6   : > { %3047 = vmatpush1.bf16.msra.mxu0 %v4029_v23  ;;  %3071 = vmatpush3.bf16.msra.mxu1 %v4052_v34 }
 0x2e7   : > { %3073 = vmatprep.subr.bf16.mxu0 %v3879_v11  ;;  %3104 = vmatprep.subr.bf16.mxu1 %v3615_v37 }
 0x39c   : > { %v1128_v27 = vpop.f32.mrb[20].mxu0  ;;  %v1199_v28 = vpop.f32.mrb[12].mxu1 }
 0x39d   : > { %v1203_v30 = vadd.f32 %v1128_v27, %v1059_v22  ;;  %v1130_v31 = vpop.f32.mrb[21].mxu0  ;;  %v2664_v35 = vpop.f32.mrb[13].mxu1  ;;  %v1217_v50 = vadd.f32 %v4121_v21, %v1199_v28 }
 0x39e   : > { %v1210_v39 = vadd.f32 %v1130_v31, %v1060_v38  ;;  %v1236_v35 = vld [vmem:[%s1233_s30 + $0x10] sm:$0xff]  ;;  %s2397_s30 = smul.u32 24, %s1929_s20 }
 0x39f   : > { %v2364_v36 = vmul.f32 -1.442695, %v1203_v30 }
 0x3a0   : > { %v2365_v40 = vmul.f32 -1.442695, %v1210_v39 }
 0x3a1   : > { %3384 = vpow2.f32 %v2364_v36 }
 0x3a2   : > { %3386 = vpow2.f32 %v2365_v40 }
 0x3ab   : > { %v3385_v45 = vpop.eup %3384 }
 0x3ac   : > { %v1207_v46 = vadd.f32 1.0, %v3385_v45  ;;  %v3387_v48 = vpop.eup %3386 }
 0x3ad   : > { %v1214_v49 = vadd.f32 1.0, %v3387_v48 }
 0x3ae   : > { %3388 = vrcp.f32 %v1207_v46 }
 0x3af   : > { %3390 = vrcp.f32 %v1214_v49  ;;  %v1409_v49 = vld [vmem:[%s1408_s8] sm:$0xff] }
 0x3b8   : > { %v3389_v52 = vpop.eup %3388 }
 0x3b9   : > { %v1218_v54 = vmul.f32 %v3389_v52, %v1217_v50  ;;  %v3391_v59 = vpop.eup %3390 }
 0x3ba   : > { %v1221_v53 = vsub.f32 1.0, %v3391_v59  ;;  %v1223_v63 = vmul.f32 %v3391_v59, %v4182_v19 }
 0x3bb   : > { %v1219_v57 = vadd.f32 %v1218_v54, %v1061_v55 }
 0x3bd   : > { %3392 = vtanh.f32 %v1219_v57 }
 0x3c7   : > { %v3393_v60 = vpop.eup %3392 }
 0x3c8   : > { %v1222_v61 = vmul.f32 %v3393_v60, %v1221_v53  ;;  %v1410_v53 = vld [vmem:[%s1408_s8 + $0x8] sm:$0xff] }
 0x3ca   : > { %v4234_v1 = vadd.f32 %v1223_v63, %v1222_v61 }
 0x3cc   : > { %1226 = vst [vmem:[%s1225_s11] sm:$0xff] %v4234_v1  ;;  %1302 = vmatmul.mubr.f32.vlgmr.msra.gmra.mrb[22].mxu0 %v4234_v1  ;;  %2698 = vmatmul.mubr.f32.vlgmr.msra.gmra.mrb[14].mxu1 %v4234_v1  ;;  %s1758_s11 = scalar_lea.vmem [#allocation2], %s2396_s25 }
 0x3cd   : > { %3075 = vmatpush1.bf16.msra.mxu0 %v3883_v14  ;;  %3106 = vmatpush3.bf16.msra.mxu1 %v3934_v42 }
 0x3ce   : > { %3077 = vmatprep.subr.bf16.mxu0 %v3887_v16  ;;  %3107 = vmatprep.subr.bf16.mxu1 %v3615_v37 }
 0x3cf   : > { %1476 = vmatprep.mubr.f32.mxu0 %v3614_v0  ;;  %2732 = vmatprep.mubr.msk.f32.mxu1 %vm3616_vm1, %v3614_v0 }
 0x3d1   : > { %3079 = vmatpush1.bf16.msra.mxu0 %v3901_v24  ;;  %3109 = vmatpush3.bf16.msra.mxu1 %v3952_v51 }
 0x3d2   : > { %3081 = vmatprep.subr.bf16.mxu0 %v3904_v26  ;;  %3110 = vmatprep.subr.bf16.mxu1 %v3615_v37 }
 0x3d5   : > { %3083 = vmatpush1.bf16.msra.mxu0 %v3916_v32  ;;  %3112 = vmatpush3.bf16.msra.mxu1 %v3978_v62 }
 0x3d6   : > { %3085 = vmatprep.subr.bf16.mxu0 %v3919_v33  ;;  %3113 = vmatprep.subr.bf16.mxu1 %v3615_v37 }
 0x3d9   : > { %3087 = vmatpush1.bf16.msra.mxu0 %v3941_v44  ;;  %3115 = vmatpush3.bf16.msra.mxu1 %v4001_v9 }
 0x3da   : > { %3089 = vmatprep.subr.bf16.mxu0 %v3946_v47  ;;  %3116 = vmatprep.subr.bf16.mxu1 %v3615_v37 }
 0x3dd   : > { %3091 = vmatpush1.bf16.msra.mxu0 %v3966_v56  ;;  %3118 = vmatpush3.bf16.msra.mxu1 %v4021_v20 }
 0x3de   : > { %3093 = vmatprep.subr.bf16.mxu0 %v3972_v58  ;;  %3119 = vmatprep.subr.bf16.mxu1 %v3615_v37 }
 0x3e1   : > { %3095 = vmatpush1.bf16.msra.mxu0 %v3989_v3  ;;  %3121 = vmatpush3.bf16.msra.mxu1 %v4033_v25 }
 0x3e2   : > { %3097 = vmatprep.subr.bf16.mxu0 %v3995_v5  ;;  %3122 = vmatprep.subr.bf16.mxu1 %v3615_v37 }
 0x3e5   : > { %3099 = vmatpush1.bf16.msra.mxu0 %v4013_v15  ;;  %3124 = vmatpush3.bf16.msra.mxu1 %v4042_v29 }
 0x3e6   : > { %3101 = vmatprep.subr.bf16.mxu0 %v4016_v17  ;;  %3125 = vmatprep.subr.bf16.mxu1 %v3615_v37 }
 0x3e9   : > { %3103 = vmatpush1.bf16.msra.mxu0 %v4029_v23  ;;  %3127 = vmatpush3.bf16.msra.mxu1 %v4052_v34 }
 0x3ea   : > { %3129 = vmatprep.subr.bf16.mxu0 %v3879_v11  ;;  %3160 = vmatprep.subr.bf16.mxu1 %v3615_v37 }
 0x49f   : > { %v1303_v4 = vpop.f32.mrb[22].mxu0  ;;  %v1374_v6 = vpop.f32.mrb[14].mxu1 }
 0x4a0   : > { %v1378_v7 = vadd.f32 %v1303_v4, %v1234_v2  ;;  %v1305_v8 = vpop.f32.mrb[23].mxu0  ;;  %v2699_v10 = vpop.f32.mrb[15].mxu1  ;;  %v1392_v28 = vadd.f32 %v4121_v21, %v1374_v6 }
 0x4a1   : > { %v1385_v18 = vadd.f32 %v1305_v8, %v1235_v13  ;;  %v1411_v10 = vld [vmem:[%s1408_s8 + $0x10] sm:$0xff]  ;;  %s2110_s8 = scalar_lea.vmem (%p4513_p11), %s4483_s5, %s2387_s12 }
 0x4a2   : > { %v2368_v12 = vmul.f32 -1.442695, %v1378_v7 }
 0x4a3   : > { %v2369_v41 = vmul.f32 -1.442695, %v1385_v18 }
 0x4a4   : > { %3394 = vpow2.f32 %v2368_v12 }
 0x4a5   : > { %3396 = vpow2.f32 %v2369_v41 }
 0x4ae   : > { %v3395_v43 = vpop.eup %3394 }
 0x4af   : > { %v1382_v19 = vadd.f32 1.0, %v3395_v43  ;;  %v3397_v22 = vpop.eup %3396 }
 0x4b0   : > { %v1389_v27 = vadd.f32 1.0, %v3397_v22 }
 0x4b1   : > { %3398 = vrcp.f32 %v1382_v19 }
 0x4b2   : > { %3400 = vrcp.f32 %v1389_v27  ;;  %v1584_v27 = vld [vmem:[%s1583_s2] sm:$0xff] }
 0x4bb   : > { %v3399_v30 = vpop.eup %3398 }
 0x4bc   : > { %v1393_v31 = vmul.f32 %v3399_v30, %v1392_v28  ;;  %v3401_v38 = vpop.eup %3400 }
 0x4bd   : > { %v1396_v39 = vsub.f32 1.0, %v3401_v38  ;;  %v1398_v46 = vmul.f32 %v3401_v38, %v4234_v1 }
 0x4be   : > { %v1394_v36 = vadd.f32 %v1393_v31, %v1236_v35 }
 0x4c0   : > { %3402 = vtanh.f32 %v1394_v36 }
 0x4ca   : > { %v3403_v40 = vpop.eup %3402 }
 0x4cb   : > { %v1397_v45 = vmul.f32 %v3403_v40, %v1396_v39 }
 0x4cd   : > { %v4286_v48 = vadd.f32 %v1398_v46, %v1397_v45 }
 0x4cf   : > { %1401 = vst [vmem:[%s1400_s14] sm:$0xff] %v4286_v48  ;;  %1477 = vmatmul.mubr.f32.vlgmr.msra.gmra.mrb[24].mxu0 %v4286_v48  ;;  %2733 = vmatmul.mubr.f32.vlgmr.msra.gmra.mrb[16].mxu1 %v4286_v48  ;;  %s1933_s14 = scalar_lea.vmem [#allocation2], %s2397_s30 }
 0x4d0   : > { %3131 = vmatpush1.bf16.msra.mxu0 %v3883_v14  ;;  %3162 = vmatpush3.bf16.msra.mxu1 %v3934_v42 }
 0x4d1   : > { %3133 = vmatprep.subr.bf16.mxu0 %v3887_v16  ;;  %3163 = vmatprep.subr.bf16.mxu1 %v3615_v37 }
 0x4d2   : > { %1651 = vmatprep.mubr.f32.mxu0 %v3614_v0  ;;  %2767 = vmatprep.mubr.msk.f32.mxu1 %vm3616_vm1, %v3614_v0 }
 0x4d4   : > { %3135 = vmatpush1.bf16.msra.mxu0 %v3901_v24  ;;  %3165 = vmatpush3.bf16.msra.mxu1 %v3952_v51 }
 0x4d5   : > { %3137 = vmatprep.subr.bf16.mxu0 %v3904_v26  ;;  %3166 = vmatprep.subr.bf16.mxu1 %v3615_v37 }
 0x4d8   : > { %3139 = vmatpush1.bf16.msra.mxu0 %v3916_v32  ;;  %3168 = vmatpush3.bf16.msra.mxu1 %v3978_v62 }
 0x4d9   : > { %3141 = vmatprep.subr.bf16.mxu0 %v3919_v33  ;;  %3169 = vmatprep.subr.bf16.mxu1 %v3615_v37 }
 0x4dc   : > { %3143 = vmatpush1.bf16.msra.mxu0 %v3941_v44  ;;  %3171 = vmatpush3.bf16.msra.mxu1 %v4001_v9 }
 0x4dd   : > { %3145 = vmatprep.subr.bf16.mxu0 %v3946_v47  ;;  %3172 = vmatprep.subr.bf16.mxu1 %v3615_v37 }
 0x4e0   : > { %3147 = vmatpush1.bf16.msra.mxu0 %v3966_v56  ;;  %3174 = vmatpush3.bf16.msra.mxu1 %v4021_v20 }
 0x4e1   : > { %3149 = vmatprep.subr.bf16.mxu0 %v3972_v58  ;;  %3175 = vmatprep.subr.bf16.mxu1 %v3615_v37 }
 0x4e4   : > { %3151 = vmatpush1.bf16.msra.mxu0 %v3989_v3  ;;  %3177 = vmatpush3.bf16.msra.mxu1 %v4033_v25 }
 0x4e5   : > { %3153 = vmatprep.subr.bf16.mxu0 %v3995_v5  ;;  %3178 = vmatprep.subr.bf16.mxu1 %v3615_v37 }
 0x4e8   : > { %3155 = vmatpush1.bf16.msra.mxu0 %v4013_v15  ;;  %3180 = vmatpush3.bf16.msra.mxu1 %v4042_v29 }
 0x4e9   : > { %3157 = vmatprep.subr.bf16.mxu0 %v4016_v17  ;;  %3181 = vmatprep.subr.bf16.mxu1 %v3615_v37 }
 0x4ec   : > { %3159 = vmatpush1.bf16.msra.mxu0 %v4029_v23  ;;  %3183 = vmatpush3.bf16.msra.mxu1 %v4052_v34 }
 0x4ed   : > { %3185 = vmatprep.subr.bf16.mxu0 %v3879_v11  ;;  %3216 = vmatprep.subr.bf16.mxu1 %v3615_v37 }
 0x5a2   : > { %v1478_v50 = vpop.f32.mrb[24].mxu0  ;;  %v1549_v52 = vpop.f32.mrb[16].mxu1 }
 0x5a3   : > { %v1553_v54 = vadd.f32 %v1478_v50, %v1409_v49  ;;  %v1480_v55 = vpop.f32.mrb[25].mxu0  ;;  %v2734_v57 = vpop.f32.mrb[17].mxu1  ;;  %v1567_v6 = vadd.f32 %v4121_v21, %v1549_v52 }
 0x5a4   : > { %v1560_v60 = vadd.f32 %v1480_v55, %v1410_v53  ;;  %v1586_v55 = vld [vmem:[%s1583_s2 + $0x10] sm:$0xff] }
 0x5a5   : > { %v2372_v59 = vmul.f32 -1.442695, %v1553_v54 }
 0x5a6   : > { %v2373_v61 = vmul.f32 -1.442695, %v1560_v60 }
 0x5a7   : > { %3404 = vpow2.f32 %v2372_v59 }
 0x5a8   : > { %3406 = vpow2.f32 %v2373_v61 }
 0x5b1   : > { %v3405_v63 = vpop.eup %3404 }
 0x5b2   : > { %v1557_v1 = vadd.f32 1.0, %v3405_v63  ;;  %v3407_v2 = vpop.eup %3406 }
 0x5b3   : > { %v1564_v4 = vadd.f32 1.0, %v3407_v2  ;;  %v1934_v2 = vld [vmem:[%s1933_s14] sm:$0xff] }
 0x5b4   : > { %3408 = vrcp.f32 %v1557_v1 }
 0x5b5   : > { %3410 = vrcp.f32 %v1564_v4 }
 0x5be   : > { %v3409_v7 = vpop.eup %3408 }
 0x5bf   : > { %v1568_v8 = vmul.f32 %v3409_v7, %v1567_v6  ;;  %v3411_v13 = vpop.eup %3410 }
 0x5c0   : > { %v1571_v18 = vsub.f32 1.0, %v3411_v13  ;;  %v1573_v19 = vmul.f32 %v3411_v13, %v4286_v48  ;;  %v1935_v13 = vld [vmem:[%s1933_s14 + $0x8] sm:$0xff] }
 0x5c1   : > { %v1569_v12 = vadd.f32 %v1568_v8, %v1411_v10 }
 0x5c3   : > { %3412 = vtanh.f32 %v1569_v12 }
 0x5cd   : > { %v3413_v41 = vpop.eup %3412 }
 0x5ce   : > { %v1572_v43 = vmul.f32 %v3413_v41, %v1571_v18 }
 0x5d0   : > { %v4338_v22 = vadd.f32 %v1573_v19, %v1572_v43 }
 0x5d2   : > { %1576 = vst [vmem:[%s1575_s17] sm:$0xff] %v4338_v22  ;;  %1652 = vmatmul.mubr.f32.vlgmr.msra.gmra.mrb[26].mxu0 %v4338_v22  ;;  %2768 = vmatmul.mubr.f32.vlgmr.msra.gmra.mrb[18].mxu1 %v4338_v22 }
 0x5d3   : > { %3187 = vmatpush1.bf16.msra.mxu0 %v3883_v14  ;;  %3218 = vmatpush3.bf16.msra.mxu1 %v3934_v42 }
 0x5d4   : > { %3189 = vmatprep.subr.bf16.mxu0 %v3887_v16  ;;  %3219 = vmatprep.subr.bf16.mxu1 %v3615_v37 }
 0x5d5   : > { %1826 = vmatprep.mubr.f32.mxu0 %v3614_v0  ;;  %2802 = vmatprep.mubr.msk.f32.mxu1 %vm3616_vm1, %v3614_v0 }
 0x5d7   : > { %3191 = vmatpush1.bf16.msra.mxu0 %v3901_v24  ;;  %3221 = vmatpush3.bf16.msra.mxu1 %v3952_v51 }
 0x5d8   : > { %3193 = vmatprep.subr.bf16.mxu0 %v3904_v26  ;;  %3222 = vmatprep.subr.bf16.mxu1 %v3615_v37 }
 0x5db   : > { %3195 = vmatpush1.bf16.msra.mxu0 %v3916_v32  ;;  %3224 = vmatpush3.bf16.msra.mxu1 %v3978_v62 }
 0x5dc   : > { %3197 = vmatprep.subr.bf16.mxu0 %v3919_v33  ;;  %3225 = vmatprep.subr.bf16.mxu1 %v3615_v37 }
 0x5df   : > { %3199 = vmatpush1.bf16.msra.mxu0 %v3941_v44  ;;  %3227 = vmatpush3.bf16.msra.mxu1 %v4001_v9 }
 0x5e0   : > { %3201 = vmatprep.subr.bf16.mxu0 %v3946_v47  ;;  %3228 = vmatprep.subr.bf16.mxu1 %v3615_v37 }
 0x5e3   : > { %3203 = vmatpush1.bf16.msra.mxu0 %v3966_v56  ;;  %3230 = vmatpush3.bf16.msra.mxu1 %v4021_v20 }
 0x5e4   : > { %3205 = vmatprep.subr.bf16.mxu0 %v3972_v58  ;;  %3231 = vmatprep.subr.bf16.mxu1 %v3615_v37 }
 0x5e7   : > { %3207 = vmatpush1.bf16.msra.mxu0 %v3989_v3  ;;  %3233 = vmatpush3.bf16.msra.mxu1 %v4033_v25 }
 0x5e8   : > { %3209 = vmatprep.subr.bf16.mxu0 %v3995_v5  ;;  %3234 = vmatprep.subr.bf16.mxu1 %v3615_v37 }
 0x5eb   : > { %3211 = vmatpush1.bf16.msra.mxu0 %v4013_v15  ;;  %3236 = vmatpush3.bf16.msra.mxu1 %v4042_v29 }
 0x5ec   : > { %3213 = vmatprep.subr.bf16.mxu0 %v4016_v17  ;;  %3237 = vmatprep.subr.bf16.mxu1 %v3615_v37 }
 0x5ef   : > { %3215 = vmatpush1.bf16.msra.mxu0 %v4029_v23  ;;  %3239 = vmatpush3.bf16.msra.mxu1 %v4052_v34 }
 0x5f0   : > { %3241 = vmatprep.subr.bf16.mxu0 %v3879_v11  ;;  %3272 = vmatprep.subr.bf16.mxu1 %v3615_v37  ;;  %v1585_v11 = vld [vmem:[%s1583_s2 + $0x8] sm:$0xff] }
 0x6a5   : > { %v1653_v28 = vpop.f32.mrb[26].mxu0  ;;  %v1724_v30 = vpop.f32.mrb[18].mxu1 }
 0x6a6   : > { %v1728_v31 = vadd.f32 %v1653_v28, %v1584_v27  ;;  %v1655_v35 = vpop.f32.mrb[27].mxu0  ;;  %v2769_v36 = vpop.f32.mrb[19].mxu1  ;;  %v1742_v50 = vadd.f32 %v4121_v21, %v1724_v30 }
 0x6a7   : > { %v1735_v39 = vadd.f32 %v1655_v35, %v1585_v11  ;;  %v1936_v35 = vld [vmem:[%s1933_s14 + $0x10] sm:$0xff] }
 0x6a8   : > { %v2376_v38 = vmul.f32 -1.442695, %v1728_v31 }
 0x6a9   : > { %v2377_v40 = vmul.f32 -1.442695, %v1735_v39 }
 0x6aa   : > { %3414 = vpow2.f32 %v2376_v38 }
 0x6ab   : > { %3416 = vpow2.f32 %v2377_v40 }
 0x6b4   : > { %v3415_v45 = vpop.eup %3414 }
 0x6b5   : > { %v1732_v46 = vadd.f32 1.0, %v3415_v45  ;;  %v3417_v48 = vpop.eup %3416 }
 0x6b6   : > { %v1739_v49 = vadd.f32 1.0, %v3417_v48 }
 0x6b7   : > { %3418 = vrcp.f32 %v1732_v46 }
 0x6b8   : > { %3420 = vrcp.f32 %v1739_v49 }
 0x6c1   : > { %v3419_v52 = vpop.eup %3418 }
 0x6c2   : > { %v1743_v54 = vmul.f32 %v3419_v52, %v1742_v50  ;;  %v3421_v59 = vpop.eup %3420 }
 0x6c3   : > { %v1746_v53 = vsub.f32 1.0, %v3421_v59  ;;  %v1748_v63 = vmul.f32 %v3421_v59, %v4338_v22 }
 0x6c4   : > { %v1744_v57 = vadd.f32 %v1743_v54, %v1586_v55 }
 0x6c6   : > { %3422 = vtanh.f32 %v1744_v57 }
 0x6d0   : > { %v3423_v60 = vpop.eup %3422 }
 0x6d1   : > { %v1747_v61 = vmul.f32 %v3423_v60, %v1746_v53 }
 0x6d3   : > { %v4390_v1 = vadd.f32 %v1748_v63, %v1747_v61 }
 0x6d5   : > { %1751 = vst [vmem:[%s1750_s16] sm:$0xff] %v4390_v1  ;;  %1827 = vmatmul.mubr.f32.vlgmr.msra.gmra.mrb[28].mxu0 %v4390_v1  ;;  %2803 = vmatmul.mubr.f32.vlgmr.msra.gmra.mrb[20].mxu1 %v4390_v1 }
 0x6d6   : > { %3243 = vmatpush1.bf16.msra.mxu0 %v3883_v14  ;;  %3274 = vmatpush3.bf16.msra.mxu1 %v3934_v42 }
 0x6d7   : > { %3245 = vmatprep.subr.bf16.mxu0 %v3887_v16  ;;  %3275 = vmatprep.subr.bf16.mxu1 %v3615_v37 }
 0x6d8   : > { %2001 = vmatprep.mubr.f32.mxu0 %v3614_v0  ;;  %2837 = vmatprep.mubr.msk.f32.mxu1 %vm3616_vm1, %v3614_v0  ;;  %v1759_v0 = vld [vmem:[%s1758_s11] sm:$0xff] }
 0x6da   : > { %3247 = vmatpush1.bf16.msra.mxu0 %v3901_v24  ;;  %3277 = vmatpush3.bf16.msra.mxu1 %v3952_v51 }
 0x6db   : > { %3249 = vmatprep.subr.bf16.mxu0 %v3904_v26  ;;  %3278 = vmatprep.subr.bf16.mxu1 %v3615_v37 }
 0x6de   : > { %3251 = vmatpush1.bf16.msra.mxu0 %v3916_v32  ;;  %3280 = vmatpush3.bf16.msra.mxu1 %v3978_v62 }
 0x6df   : > { %3253 = vmatprep.subr.bf16.mxu0 %v3919_v33  ;;  %3281 = vmatprep.subr.bf16.mxu1 %v3615_v37 }
 0x6e2   : > { %3255 = vmatpush1.bf16.msra.mxu0 %v3941_v44  ;;  %3283 = vmatpush3.bf16.msra.mxu1 %v4001_v9  ;;  %v1761_v9 = vld [vmem:[%s1758_s11 + $0x10] sm:$0xff] }
 0x6e3   : > { %3257 = vmatprep.subr.bf16.mxu0 %v3946_v47  ;;  %3284 = vmatprep.subr.bf16.mxu1 %v3615_v37 }
 0x6e6   : > { %3259 = vmatpush1.bf16.msra.mxu0 %v3966_v56  ;;  %3286 = vmatpush3.bf16.msra.mxu1 %v4021_v20 }
 0x6e7   : > { %3261 = vmatprep.subr.bf16.mxu0 %v3972_v58  ;;  %3287 = vmatprep.subr.bf16.mxu1 %v3615_v37 }
 0x6ea   : > { %3263 = vmatpush1.bf16.msra.mxu0 %v3989_v3  ;;  %3289 = vmatpush3.bf16.msra.mxu1 %v4033_v25 }
 0x6eb   : > { %3265 = vmatprep.subr.bf16.mxu0 %v3995_v5  ;;  %3290 = vmatprep.subr.bf16.mxu1 %v3615_v37 }
 0x6ee   : > { %3267 = vmatpush1.bf16.msra.mxu0 %v4013_v15  ;;  %3292 = vmatpush3.bf16.msra.mxu1 %v4042_v29 }
 0x6ef   : > { %3269 = vmatprep.subr.bf16.mxu0 %v4016_v17  ;;  %3293 = vmatprep.subr.bf16.mxu1 %v3615_v37  ;;  %v1760_v37 = vld [vmem:[%s1758_s11 + $0x8] sm:$0xff] }
 0x6f2   : > { %3271 = vmatpush1.bf16.msra.mxu0 %v4029_v23  ;;  %3295 = vmatpush3.bf16.msra.mxu1 %v4052_v34 }
 0x7a8   : > { %v1828_v14 = vpop.f32.mrb[28].mxu0  ;;  %v1899_v16 = vpop.f32.mrb[20].mxu1 }
 0x7a9   : > { %v1903_v24 = vadd.f32 %v1828_v14, %v1759_v0  ;;  %v1830_v26 = vpop.f32.mrb[29].mxu0  ;;  %v2804_v32 = vpop.f32.mrb[21].mxu1  ;;  %v1917_v62 = vadd.f32 %v4121_v21, %v1899_v16 }
 0x7aa   : > { %v1910_v42 = vadd.f32 %v1830_v26, %v1760_v37 }
 0x7ab   : > { %v2380_v33 = vmul.f32 -1.442695, %v1903_v24 }
 0x7ac   : > { %v2381_v44 = vmul.f32 -1.442695, %v1910_v42 }
 0x7ad   : > { %3424 = vpow2.f32 %v2380_v33 }
 0x7ae   : > { %3426 = vpow2.f32 %v2381_v44 }
 0x7b7   : > { %v3425_v47 = vpop.eup %3424 }
 0x7b8   : > { %v1907_v51 = vadd.f32 1.0, %v3425_v47  ;;  %v3427_v56 = vpop.eup %3426 }
 0x7b9   : > { %v1914_v58 = vadd.f32 1.0, %v3427_v56 }
 0x7ba   : > { %3428 = vrcp.f32 %v1907_v51 }
 0x7bb   : > { %3430 = vrcp.f32 %v1914_v58 }
 0x7c4   : > { %v3429_v3 = vpop.eup %3428 }
 0x7c5   : > { %v1918_v5 = vmul.f32 %v3429_v3, %v1917_v62  ;;  %v3431_v17 = vpop.eup %3430 }
 0x7c6   : > { %v1921_v20 = vsub.f32 1.0, %v3431_v17  ;;  %v1923_v29 = vmul.f32 %v3431_v17, %v4390_v1 }
 0x7c7   : > { %v1919_v15 = vadd.f32 %v1918_v5, %v1761_v9 }
 0x7c9   : > { %3432 = vtanh.f32 %v1919_v15 }
 0x7d3   : > { %v3433_v23 = vpop.eup %3432 }
 0x7d4   : > { %v1922_v25 = vmul.f32 %v3433_v23, %v1921_v20 }
 0x7d6   : > { %v1924_v34 = vadd.f32 %v1923_v29, %v1922_v25 }
 0x7d8   : > { %1926 = vst [vmem:[%s1925_s7] sm:$0xff] %v1924_v34  ;;  %2002 = vmatmul.mubr.f32.vlgmr.msra.gmra.mrb[30].mxu0 %v1924_v34  ;;  %2838 = vmatmul.mubr.f32.vlgmr.msra.gmra.mrb[22].mxu1 %v1924_v34 }
 0x8ab   : > { %v2003_v4 = vpop.f32.mrb[30].mxu0  ;;  %v2074_v6 = vpop.f32.mrb[22].mxu1 }
 0x8ac   : > { %v2078_v7 = vadd.f32 %v2003_v4, %v1934_v2  ;;  %v2005_v8 = vpop.f32.mrb[31].mxu0  ;;  %v2839_v10 = vpop.f32.mrb[23].mxu1  ;;  %v2092_v28 = vadd.f32 %v4121_v21, %v2074_v6 }
 0x8ad   : > { %v2085_v18 = vadd.f32 %v2005_v8, %v1935_v13 }
 0x8ae   : > { %v2384_v12 = vmul.f32 -1.442695, %v2078_v7 }
 0x8af   : > { %v2385_v41 = vmul.f32 -1.442695, %v2085_v18 }
 0x8b0   : > { %3434 = vpow2.f32 %v2384_v12 }
 0x8b1   : > { %3436 = vpow2.f32 %v2385_v41 }
 0x8ba   : > { %v3435_v43 = vpop.eup %3434 }
 0x8bb   : > { %v2082_v19 = vadd.f32 1.0, %v3435_v43  ;;  %v3437_v22 = vpop.eup %3436 }
 0x8bc   : > { %v2089_v27 = vadd.f32 1.0, %v3437_v22 }
 0x8bd   : > { %3438 = vrcp.f32 %v2082_v19 }
 0x8be   : > { %3440 = vrcp.f32 %v2089_v27 }
 0x8c7   : > { %v3439_v30 = vpop.eup %3438 }
 0x8c8   : > { %v2093_v31 = vmul.f32 %v3439_v30, %v2092_v28  ;;  %v3441_v38 = vpop.eup %3440 }
 0x8c9   : > { %v2096_v11 = vsub.f32 1.0, %v3441_v38  ;;  %v2098_v45 = vmul.f32 %v3441_v38, %v1924_v34 }
 0x8ca   : > { %v2094_v36 = vadd.f32 %v2093_v31, %v1936_v35 }
 0x8cc   : > { %3442 = vtanh.f32 %v2094_v36 }
 0x8d5   : > { %2108 = sbr.rel (!%p4513_p11) target bundleno = 2280 (0x8e8), region = 60 }
 0x8d6   : > { %v3443_v39 = vpop.eup %3442 }
 0x8d7   : > { %v2097_v40 = vmul.f32 %v3443_v39, %v2096_v11 }
 0x8d9   : > { %v2099_v46 = vadd.f32 %v2098_v45, %v2097_v40 }
 0x8db   : > { %2101 = vst [vmem:[%s2100_s9] sm:$0xff] %v2099_v46 }
 0x8e2   : > { %v2152_v21 = vld [vmem:[%s4125_s27] sm:$0xff]  ;;  %v2154_v48 = vld [vmem:[%s4125_s27 + $0x8] sm:$0xff]  ;;  %v2156_v49 = vld [vmem:[%s4125_s27 + $0x10] sm:$0xff] }
 0x8e3   : > { %v2158_v50 = vld [vmem:[%s4125_s27 + $0x18] sm:$0xff]  ;;  %v2160_v52 = vld [vmem:[%s4125_s27 + $0x20] sm:$0xff]  ;;  %v2162_v54 = vld [vmem:[%s4125_s27 + $0x28] sm:$0xff]  ;;  %2153 = vst [vmem:[%s2110_s8] sm:$0xff] %v2152_v21 }
 0x8e4   : > { %2155 = vst [vmem:[%s2110_s8 + $0x10] sm:$0xff] %v2154_v48  ;;  %2157 = vst [vmem:[%s2110_s8 + $0x20] sm:$0xff] %v2156_v49  ;;  %v2164_v55 = vld [vmem:[%s4125_s27 + $0x30] sm:$0xff]  ;;  %v2166_v57 = vld [vmem:[%s4125_s27 + $0x38] sm:$0xff] }
 0x8e5   : > { %2159 = vst [vmem:[%s2110_s8 + $0x30] sm:$0xff] %v2158_v50  ;;  %2161 = vst [vmem:[%s2110_s8 + $0x40] sm:$0xff] %v2160_v52 }
 0x8e6   : > { %2163 = vst [vmem:[%s2110_s8 + $0x50] sm:$0xff] %v2162_v54  ;;  %2165 = vst [vmem:[%s2110_s8 + $0x60] sm:$0xff] %v2164_v55 }
 0x8e7   : > { %2167 = vst [vmem:[%s2110_s8 + $0x70] sm:$0xff] %v2166_v57 }
 0x8e8 PF: > { %s4514_s21 = sld [smem:[#allocation15_spill]]  ;;  %s4515_s22 = sld [smem:[#allocation14_spill]] }
 0x8e9   : > { %s4516_s20 = sld [smem:[#allocation16_spill]]  ;;  %s4517_s18 = smov %s3598_s19 }
 0x8ee   : > { %p21_p2 = scmp.ge.s32.totalorder %s4514_s21, 4   ;;  %s4518_s19 = smov %s4515_s22 }
 0x8f0   :  { %23 = sbr.rel (!%p21_p2) target bundleno = 10 (0xa), region = 171 }
 0x8f7   :  { %2183 = vsyncpa [#allocation4], 1 }
 0x8f8   :  { %2185 = vsyncpa [#allocation4 + $0x1], 1 }
 0x8f9   :  { %2186 = vsyncpa [#allocation6], 1 }
 0x8fa   :  { %2188 = vsyncpa [#allocation6 + $0x1], 1 }
 0x8fb   :  { %2189 = vsyncpa [#allocation9], 1 }
 0x8fc   :  { %2191 = vsyncpa [#allocation9 + $0x1], 1 }

// kernel: bigru_forward.4
= control target key start
LH: loop header
LB: loop body
LE: loop exit
PB: predicated region body
PF: predicated region fallthrough
CT: control target
= control target key end

     0   :  { %10 = vsyncpa [#allocation4], 0  ;;  %s4473_s0 = inlined_call_operand.vmem [shape: f32[64,256], index: 0, kind: input, shape index: {}]   ;;  %s4474_s1 = inlined_call_operand.hbm [shape: f32[2,256,384], index: 1, kind: input, shape index: {}]   ;;  %s4475_s2 = inlined_call_operand.vmem [shape: f32[2,128,384], index: 2, kind: input, shape index: {}]   ;;  %s4476_s3 = inlined_call_operand.vmem [shape: f32[2,1,384], index: 3, kind: input, shape index: {}]   ;;  %s4477_s4 = inlined_call_operand.vmem [shape: f32[2,1,128], index: 4, kind: input, shape index: {}]   ;;  %s4478_s5 = inlined_call_operand.vmem [shape: f32[64,256], index: 5, kind: output, shape index: {}]  }
   0x1   :  { %12 = vsyncpa [#allocation4 + $0x1], 0  ;;  %s3612_s18 = smov 0   ;;  %s3614_s19 = smov 0  }
   0x2   :  { %s3616_s20 = smov 0   ;;  %s3618_s21 = smov 0  }
   0x3 LB: > { %s3631_s22 = sadd.s32 4294967295, %s3574_s21   ;;  %s3634_s23 = sadd.s32 1, %s3574_s21   ;;  %s3574_s21 = sphi %s3618_s21, %s4496_s21   ;;  %s3570_s20 = sphi %s3616_s20, %s4495_s20   ;;  %s3566_s19 = sphi %s3614_s19, %s4494_s19   ;;  %s3562_s18 = sphi %s3612_s18, %s4493_s18  }
   0x4   : > { %s43_s24 = ssub.s32 %s3574_s21, %s3634_s23  ;;  %s46_s25 = sadd.s32 1, %s3570_s20 }
   0x5   : > { %p44_p0 = scmp.eq.s32.totalorder %s43_s24, 0  ;;  %p53_p1 = scmp.ne.s32.totalorder %s3570_s20, %s3566_s19 }
   0x6   : > { %p54_p2 = scmp.eq.s32.totalorder %s3574_s21, 0  ;;  %p59_p3 = scmp.ne.s32.totalorder %s3566_s19, %s3562_s18 }
   0x7   : > { %s3644_s26 = scalar_select %p44_p0, %s3570_s20, %s46_s25  }
   0x8   : > { %p55_p4 = por %p54_p2, %p53_p1  ;;  %p4479_p5 = scmp.eq.s32.totalorder %s3631_s22, 0 }
   0x9   : > { %p161_p6 = scmp.eq.s32.totalorder %s3631_s22, 1  ;;  %p3392_p8 = scmp.lt.s32.totalorder %s3574_s21, 2 }
   0xa   : > { %p3650_p7 = por %p4479_p5, %p59_p3  ;;  %s190_s29 = sand.u32 1, %s3570_s20  }
   0xb   : > { %p3655_p9 = por %p161_p6, %p53_p1  ;;  %s3381_s30 = smul.u32 768, %s190_s29 }
   0xc   : > { %s3382_s6 = smul.u32 12288, %s3574_s21  ;;  %p3661_p10 = pnand %p3392_p8, %p55_p4 }
   0xd   : > { %s4481_s28 = scalar_select %p3655_p9, 1, 0 }
   0xe   : > { %s3668_s10 = scalar_lea.hbm %s4474_s1, %s3382_s6  ;;  %s194_s11 = scalar_lea.vmem [#allocation3], %s3381_s30 }
   0xf   : > { %s201_s12 = sshll.u32 %s194_s11, 4  ;;  %s3673_s13 = scalar_lea.sflag [#allocation4], %s190_s29  ;;  %s3670_s12 = int_to_ptr.vmem [resolvable:$true] %s201_s12 }
  0x10   : > { %s3510_s14 = scalar_lea.hbm %s3668_s10, 12288  ;;  %p3512_p13 = pneg %p3661_p10 }
  0x11   : > { %p3511_p12 = scmp.ne.s32.totalorder %s3668_s10, %s3510_s14  ;;  %s3515_s17 = scalar_lea.hbm %s4474_s1, 24576 }
  0x12   : > { %p3516_p2 = scmp.lt.u32.totalorder %s3668_s10, %s4474_s1  ;;  %p3517_p3 = scmp.lt.u32.totalorder %s3515_s17, %s3510_s14 }
  0x13   : > { %p3513_p0 = pnand %p3512_p13, %p3511_p12  ;;  %p3519_p6 = scmp.lt.u32.totalorder %s3510_s14, %s3668_s10 }
  0x14   : > { %p3518_p4 = por %p3517_p3, %p3516_p2 }
  0x15   : > { %p3514_p1 = pneg %p3513_p0 }
  0x16   : > { %p3520_p8 = por %p3519_p6, %p3518_p4 }
  0x18   : > { %p3521_p5 = pnand %p3520_p8, %p3514_p1 }
  0x1a   : > { %3524 = shalt.err (!%p3521_p5)
}
  0x1b   : > { %s3525_s25 = scalar_lea.vmem %s3670_s12, 12288  ;;  %s3576_s29 = smov [#allocation3]  }
  0x1c   : > { %p3526_p12 = scmp.ne.s32.totalorder %s3670_s12, %s3525_s25  ;;  %s3530_s30 = sshll.u32 %s3576_s29, 4  ;;  %s3531_s30 = int_to_ptr.vmem [resolvable:$false] %s3530_s30 }
  0x1d   : > { %s3532_s6 = scalar_lea.vmem %s3531_s30, 24576  ;;  %p3533_p9 = scmp.lt.s32.totalorder %s3670_s12, %s3531_s30 }
  0x1e   : > { %p3528_p0 = pnand %p3526_p12, %p3512_p13  ;;  %p3534_p2 = scmp.lt.s32.totalorder %s3532_s6, %s3525_s25 }
  0x20   : > { %p3529_p11 = pneg %p3528_p0  ;;  %p3535_p3 = por %p3534_p2, %p3533_p9 }
  0x22   : > { %p3536_p4 = pnand %p3535_p3, %p3529_p11 }
  0x24   : > { %3539 = shalt.err (!%p3536_p4)
}
  0x25   : > { %s3577_s8 = smov 384   ;;  %s3578_s9 = smov 24  }
  0x26   : > { %3391 = dma.hbm_to_vmem [thread:$0]  (!%p3661_p10), %s3668_s10, 12288, %s3670_s12, %s3673_s13, %s3577_s8, %s3577_s8, %s3578_s9  }
  0x27   : > { %p230_p5 = scmp.lt.s32.totalorder %s3574_s21, 3  ;;  %p4483_p13 = scmp.ge.s32.totalorder %s3574_s21, 1 }
  0x29   : > { %p231_p1 = pnand %p4483_p13, %p230_p5 }
  0x2a   : > { %s3705_s11 = sand.u32 (!%p231_p1), 1, %s3566_s19  }
  0x2b   : > { %234 = sbr.rel (%p231_p1) target bundleno = 2242 (0x8c2), region = 40  ;;  %s237_s15 = scalar_lea.sflag (!%p231_p1), [#allocation4], %s3705_s11 }
  0x2c   : > { %s3383_s14 = smul.u32 (!%p231_p1), 768, %s3705_s11 }
  0x2e   : > { %s3709_s16 = scalar_lea.vmem (!%p231_p1), [#allocation3], %s3383_s14 }
  0x32   : > { %3557 = dma.done.wait (%p3650_p7), %s237_s15, 12288  }
  0x33   : > { %3559 = vsyncadd (%p3650_p7), %s237_s15, 4294955008  ;;  %v307_v0 = vld [vmem:[%s3709_s16 + $0x8] sm:$0xff]  ;;  %v310_v1 = vld [vmem:[%s3709_s16 + $0x20] sm:$0xff]  ;;  %p278_p7 = scmp.lt.s32.totalorder %s3631_s22, 1  ;;  %vm3581_vm0 = vmmov 0   ;;  %p4484_p9 = scmp.eq.s32.totalorder %s3631_s22, 0 }
  0x34   : > { %v306_v2 = vld [vmem:[%s3709_s16] sm:$0xff]  ;;  %v2837_v3 = vpack.c.bf16 %v310_v1, %v307_v0  ;;  %v309_v4 = vld [vmem:[%s3709_s16 + $0x18] sm:$0xff]  ;;  %v316_v6 = vld [vmem:[%s3709_s16 + $0x50] sm:$0xff]  ;;  %s2318_s15 = sshll.u32 %s3705_s11, 6  ;;  %p4492_p3 = scmp.ne.s32.totalorder %s4481_s28, 0 }
  0x35   : > { %v313_v5 = vld [vmem:[%s3709_s16 + $0x38] sm:$0xff]  ;;  %v2839_v7 = vpack.c.bf16 %v309_v4, %v306_v2  ;;  %v312_v9 = vld [vmem:[%s3709_s16 + $0x30] sm:$0xff]  ;;  %v315_v10 = vld [vmem:[%s3709_s16 + $0x48] sm:$0xff]  ;;  %s3786_s7 = scalar_select %p278_p7, %s3631_s22, 1 }
  0x36   : > { %v2841_v8 = vpack.c.bf16 %v316_v6, %v313_v5  ;;  %v319_v11 = vld [vmem:[%s3709_s16 + $0x68] sm:$0xff]  ;;  %2838 = vmatprep.subr.bf16.mxu0 %v2837_v3  ;;  %v322_v12 = vld [vmem:[%s3709_s16 + $0x80] sm:$0xff]  ;;  %v2843_v13 = vpack.c.bf16 %v315_v10, %v312_v9  ;;  %v356_v14 = vld [vmem:[%s3709_s16 + $0x190] sm:$0xff]  ;;  %s4107_s25 = scalar_select %p4484_p9, 0, 7 }
  0x37   : > { %2840 = vmatpush1.bf16.msra.mxu0 %v2839_v7  ;;  %v359_v15 = vld [vmem:[%s3709_s16 + $0x1a8] sm:$0xff]  ;;  %v308_v16 = vld [vmem:[%s3709_s16 + $0x10] sm:$0xff]  ;;  %v2845_v17 = vpack.c.bf16 %v322_v12, %v319_v11  ;;  %v318_v18 = vld [vmem:[%s3709_s16 + $0x60] sm:$0xff]  ;;  %s3384_s10 = smul.u32 384, %s3786_s7  ;;  %p4485_p10 = pmov %p4484_p9 }
  0x38   : > { %2842 = vmatprep.subr.bf16.mxu0 %v2841_v8  ;;  %v321_v19 = vld [vmem:[%s3709_s16 + $0x78] sm:$0xff]  ;;  %v2901_v20 = vpack.c.bf16 %v359_v15, %v356_v14  ;;  %v311_v21 = vld [vmem:[%s3709_s16 + $0x28] sm:$0xff]  ;;  %v328_v24 = vld [vmem:[%s3709_s16 + $0xb0] sm:$0xff]  ;;  %s2320_s29 = sshll.u32 %s4107_s25, 3  ;;  %p4486_p11 = pmov %p4484_p9 }
  0x39   : > { %v2903_v22 = vpack.c.bf16 %v311_v21, %v308_v16  ;;  %v325_v23 = vld [vmem:[%s3709_s16 + $0x98] sm:$0xff]  ;;  %v362_v25 = vld [vmem:[%s3709_s16 + $0x1c0] sm:$0xff]  ;;  %v2847_v29 = vpack.c.bf16 %v321_v19, %v318_v18  ;;  %v324_v30 = vld [vmem:[%s3709_s16 + $0x90] sm:$0xff]  ;;  %s3802_s17 = scalar_lea.vmem %s4475_s2, %s3384_s10  ;;  %s713_s30 = sshra.s32 %s2320_s29, 3 }
  0x3a   : > { %2902 = vmatprep.subr.bf16.mxu1 %v2901_v20  ;;  %v365_v26 = vld [vmem:[%s3709_s16 + $0x1d8] sm:$0xff]  ;;  %v314_v27 = vld [vmem:[%s3709_s16 + $0x40] sm:$0xff]  ;;  %v327_v31 = vld [vmem:[%s3709_s16 + $0xa8] sm:$0xff]  ;;  %v2849_v34 = vpack.c.bf16 %v328_v24, %v325_v23  ;;  %s2357_s6 = smul.u32 24, %s713_s30  ;;  %p4487_p6 = pmov %p4484_p9 }
  0x3b   : > { %v317_v28 = vld [vmem:[%s3709_s16 + $0x58] sm:$0xff]  ;;  %2844 = vmatpush1.bf16.msra.mxu0 %v2843_v13  ;;  %2904 = vmatpush3.bf16.msra.mxu1 %v2903_v22  ;;  %v2905_v32 = vpack.c.bf16 %v365_v26, %v362_v25  ;;  %v331_v35 = vld [vmem:[%s3709_s16 + $0xc8] sm:$0xff]  ;;  %v368_v36 = vld [vmem:[%s3709_s16 + $0x1f0] sm:$0xff]  ;;  %v2851_v42 = vpack.c.bf16 %v327_v31, %v324_v30  ;;  %s4167_s11 = scalar_select %p4485_p10, 1, 6 }
  0x3c   : > { %v2907_v33 = vpack.c.bf16 %v317_v28, %v314_v27  ;;  %2846 = vmatprep.subr.bf16.mxu0 %v2845_v17  ;;  %v371_v37 = vld [vmem:[%s3709_s16 + $0x208] sm:$0xff]  ;;  %v334_v38 = vld [vmem:[%s3709_s16 + $0xe0] sm:$0xff]  ;;  %v320_v40 = vld [vmem:[%s3709_s16 + $0x70] sm:$0xff]  ;;  %s717_s8 = scalar_lea.vmem [#allocation2], %s2357_s6  ;;  %p4488_p8 = pmov %p4487_p6 }
  0x3d   : > { %2906 = vmatprep.subr.bf16.mxu1 %v2905_v32  ;;  %v2909_v39 = vpack.c.bf16 %v371_v37, %v368_v36  ;;  %v323_v41 = vld [vmem:[%s3709_s16 + $0x88] sm:$0xff]  ;;  %v330_v43 = vld [vmem:[%s3709_s16 + $0xc0] sm:$0xff]  ;;  %v377_v46 = vld [vmem:[%s3709_s16 + $0x238] sm:$0xff]  ;;  %v2853_v47 = vpack.c.bf16 %v334_v38, %v331_v35  ;;  %s2325_s27 = sshll.u32 %s4167_s11, 3  ;;  %p4489_p12 = pmov %p4487_p6 }
  0x3e   : > { %v2911_v44 = vpack.c.bf16 %v323_v41, %v320_v40  ;;  %v374_v45 = vld [vmem:[%s3709_s16 + $0x220] sm:$0xff]  ;;  %v333_v48 = vld [vmem:[%s3709_s16 + $0xd8] sm:$0xff]  ;;  %v340_v53 = vld [vmem:[%s3709_s16 + $0x110] sm:$0xff]  ;;  %s894_s10 = sshra.s32 %s2325_s27, 3  ;;  %p4490_p0 = pmov %p4487_p6 }
  0x3f   : > { %2848 = vmatpush1.bf16.msra.mxu0 %v2847_v29  ;;  %2908 = vmatpush3.bf16.msra.mxu1 %v2907_v33  ;;  %v2913_v49 = vpack.c.bf16 %v377_v46, %v374_v45  ;;  %v326_v50 = vld [vmem:[%s3709_s16 + $0xa0] sm:$0xff]  ;;  %v329_v51 = vld [vmem:[%s3709_s16 + $0xb8] sm:$0xff]  ;;  %v380_v54 = vld [vmem:[%s3709_s16 + $0x250] sm:$0xff]  ;;  %v2855_v56 = vpack.c.bf16 %v333_v48, %v330_v43  ;;  %s2358_s12 = smul.u32 24, %s894_s10 }
  0x40   : > { %2850 = vmatprep.subr.bf16.mxu0 %v2849_v34  ;;  %2910 = vmatprep.subr.bf16.mxu1 %v2909_v39  ;;  %v337_v52 = vld [vmem:[%s3709_s16 + $0xf8] sm:$0xff]  ;;  %v383_v55 = vld [vmem:[%s3709_s16 + $0x268] sm:$0xff]  ;;  %v336_v57 = vld [vmem:[%s3709_s16 + $0xf0] sm:$0xff]  ;;  %v2915_v59 = vpack.c.bf16 %v329_v51, %v326_v50  ;;  %s4219_s18 = scalar_select %p4486_p11, 2, 5 }
  0x41   : > { %v339_v58 = vld [vmem:[%s3709_s16 + $0x108] sm:$0xff]  ;;  %v2857_v60 = vpack.c.bf16 %v340_v53, %v337_v52  ;;  %v2917_v62 = vpack.c.bf16 %v383_v55, %v380_v54  ;;  %v332_v63 = vld [vmem:[%s3709_s16 + $0xd0] sm:$0xff]  ;;  %v346_v1 = vld [vmem:[%s3709_s16 + $0x140] sm:$0xff]  ;;  %s4323_s11 = scalar_select %p4488_p8, 4, 3 }
  0x42   : > { %v343_v61 = vld [vmem:[%s3709_s16 + $0x128] sm:$0xff]  ;;  %v386_v2 = vld [vmem:[%s3709_s16 + $0x280] sm:$0xff]  ;;  %v389_v3 = vld [vmem:[%s3709_s16 + $0x298] sm:$0xff]  ;;  %v2859_v4 = vpack.c.bf16 %v339_v58, %v336_v57  ;;  %p4491_p2 = pmov %p4490_p0 }
  0x43   : > { %2852 = vmatpush1.bf16.msra.mxu0 %v2851_v42  ;;  %2912 = vmatpush3.bf16.msra.mxu1 %v2911_v44  ;;  %v335_v0 = vld [vmem:[%s3709_s16 + $0xe8] sm:$0xff]  ;;  %v342_v5 = vld [vmem:[%s3709_s16 + $0x120] sm:$0xff]  ;;  %v345_v6 = vld [vmem:[%s3709_s16 + $0x138] sm:$0xff]  ;;  %v2861_v8 = vpack.c.bf16 %v346_v1, %v343_v61  ;;  %v2921_v10 = vpack.c.bf16 %v389_v3, %v386_v2 }
  0x44   : > { %2854 = vmatprep.subr.bf16.mxu0 %v2853_v47  ;;  %2914 = vmatprep.subr.bf16.mxu1 %v2913_v49  ;;  %v2919_v7 = vpack.c.bf16 %v335_v0, %v332_v63  ;;  %v349_v9 = vld [vmem:[%s3709_s16 + $0x158] sm:$0xff]  ;;  %v338_v11 = vld [vmem:[%s3709_s16 + $0x100] sm:$0xff]  ;;  %v352_v13 = vld [vmem:[%s3709_s16 + $0x170] sm:$0xff]  ;;  %v2863_v16 = vpack.c.bf16 %v345_v6, %v342_v5 }
  0x45   : > { %v341_v12 = vld [vmem:[%s3709_s16 + $0x118] sm:$0xff]  ;;  %v392_v14 = vld [vmem:[%s3709_s16 + $0x2b0] sm:$0xff]  ;;  %v395_v15 = vld [vmem:[%s3709_s16 + $0x2c8] sm:$0xff]  ;;  %v2865_v21 = vpack.c.bf16 %v352_v13, %v349_v9 }
  0x46   : > { %v348_v17 = vld [vmem:[%s3709_s16 + $0x150] sm:$0xff]  ;;  %v351_v18 = vld [vmem:[%s3709_s16 + $0x168] sm:$0xff]  ;;  %v2923_v19 = vpack.c.bf16 %v341_v12, %v338_v11  ;;  %v2925_v23 = vpack.c.bf16 %v395_v15, %v392_v14  ;;  %v358_v26 = vld [vmem:[%s3709_s16 + $0x1a0] sm:$0xff] }
  0x47   : > { %2856 = vmatpush1.bf16.msra.mxu0 %v2855_v56  ;;  %2916 = vmatpush3.bf16.msra.mxu1 %v2915_v59  ;;  %v291_v20 = vld [vmem:[%s4473_s0 + $0x8] sm:$0xff]  ;;  %v344_v24 = vld [vmem:[%s3709_s16 + $0x130] sm:$0xff]  ;;  %v398_v27 = vld [vmem:[%s3709_s16 + $0x2e0] sm:$0xff]  ;;  %v2867_v29 = vpack.c.bf16 %v351_v18, %v348_v17 }
  0x48   : > { %2858 = vmatprep.subr.bf16.mxu0 %v2857_v60  ;;  %2918 = vmatprep.subr.bf16.mxu1 %v2917_v62  ;;  %v355_v22 = vld [vmem:[%s3709_s16 + $0x188] sm:$0xff]  ;;  %v401_v28 = vld [vmem:[%s3709_s16 + $0x2f8] sm:$0xff]  ;;  %v354_v30 = vld [vmem:[%s3709_s16 + $0x180] sm:$0xff] }
  0x49   : > { %v347_v25 = vld [vmem:[%s3709_s16 + $0x148] sm:$0xff]  ;;  %596 = vmatprep.mubr.f32.mxu1 %v291_v20  ;;  %483 = vmatprep.mubr.f32.mxu0 %v291_v20  ;;  %v2869_v32 = vpack.c.bf16 %v358_v26, %v355_v22  ;;  %v357_v33 = vld [vmem:[%s3709_s16 + $0x198] sm:$0xff]  ;;  %v2929_v34 = vpack.c.bf16 %v401_v28, %v398_v27  ;;  %v350_v35 = vld [vmem:[%s3709_s16 + $0x160] sm:$0xff] }
  0x4a   : > { %v2927_v31 = vpack.c.bf16 %v347_v25, %v344_v24  ;;  %v353_v36 = vld [vmem:[%s3709_s16 + $0x178] sm:$0xff]  ;;  %v364_v38 = vld [vmem:[%s3709_s16 + $0x1d0] sm:$0xff]  ;;  %v2871_v39 = vpack.c.bf16 %v357_v33, %v354_v30  ;;  %v363_v43 = vld [vmem:[%s3709_s16 + $0x1c8] sm:$0xff] }
  0x4b   : > { %2860 = vmatpush1.bf16.msra.mxu0 %v2859_v4  ;;  %2920 = vmatpush3.bf16.msra.mxu1 %v2919_v7  ;;  %v361_v37 = vld [vmem:[%s3709_s16 + $0x1b8] sm:$0xff]  ;;  %v2931_v40 = vpack.c.bf16 %v353_v36, %v350_v35  ;;  %v360_v42 = vld [vmem:[%s3709_s16 + $0x1b0] sm:$0xff]  ;;  %v367_v44 = vld [vmem:[%s3709_s16 + $0x1e8] sm:$0xff] }
  0x4c   : > { %2862 = vmatprep.subr.bf16.mxu0 %v2861_v8  ;;  %2922 = vmatprep.subr.bf16.mxu1 %v2921_v10  ;;  %v2873_v41 = vpack.c.bf16 %v364_v38, %v361_v37  ;;  %v370_v45 = vld [vmem:[%s3709_s16 + $0x200] sm:$0xff]  ;;  %v369_v47 = vld [vmem:[%s3709_s16 + $0x1f8] sm:$0xff]  ;;  %v2875_v48 = vpack.c.bf16 %v363_v43, %v360_v42  ;;  %v376_v51 = vld [vmem:[%s3709_s16 + $0x230] sm:$0xff] }
  0x4d   : > { %v366_v46 = vld [vmem:[%s3709_s16 + $0x1e0] sm:$0xff]  ;;  %v373_v50 = vld [vmem:[%s3709_s16 + $0x218] sm:$0xff]  ;;  %v2877_v52 = vpack.c.bf16 %v370_v45, %v367_v44  ;;  %v662_v54 = vld [vmem:[%s3802_s17 + $0x8] sm:$0xff] }
  0x4e   : > { %v3809_v49 = vld [vmem:[%s4473_s0] sm:$0xff]  ;;  %v3816_v53 = vld [vmem:[%s4473_s0 + $0x18] sm:$0xff]  ;;  %v671_v61 = vld [vmem:[%s3802_s17 + $0x50] sm:$0xff]  ;;  %v2879_v0 = vpack.c.bf16 %v369_v47, %v366_v46  ;;  %v2881_v5 = vpack.c.bf16 %v376_v51, %v373_v50 }
  0x4f   : > { %2864 = vmatpush1.bf16.msra.mxu0 %v2863_v16  ;;  %2924 = vmatpush3.bf16.msra.mxu1 %v2923_v19  ;;  %v665_v55 = vld [vmem:[%s3802_s17 + $0x20] sm:$0xff]  ;;  %v664_v58 = vld [vmem:[%s3802_s17 + $0x18] sm:$0xff]  ;;  %v667_v62 = vld [vmem:[%s3802_s17 + $0x30] sm:$0xff] }
  0x50   : > { %2866 = vmatprep.subr.bf16.mxu0 %v2865_v21  ;;  %2926 = vmatprep.subr.bf16.mxu1 %v2925_v23  ;;  %v3820_v56 = vpack.c.bf16 %v665_v55, %v662_v54  ;;  %v661_v57 = vld [vmem:[%s3802_s17] sm:$0xff]  ;;  %v668_v59 = vld [vmem:[%s3802_s17 + $0x38] sm:$0xff]  ;;  %v670_v63 = vld [vmem:[%s3802_s17 + $0x48] sm:$0xff] }
  0x51   : > { %v3826_v60 = vpack.c.bf16 %v664_v58, %v661_v57  ;;  %v3835_v1 = vld [vmem:[%s4473_s0 + $0x10] sm:$0xff]  ;;  %v3837_v2 = vpack.c.bf16 %v671_v61, %v668_v59  ;;  %v674_v3 = vld [vmem:[%s3802_s17 + $0x68] sm:$0xff]  ;;  %v677_v4 = vld [vmem:[%s3802_s17 + $0x80] sm:$0xff]  ;;  %v3852_v11 = vpack.c.bf16 %v670_v63, %v667_v62 }
  0x52   : > { %v372_v6 = vld [vmem:[%s3709_s16 + $0x210] sm:$0xff]  ;;  %v375_v7 = vld [vmem:[%s3709_s16 + $0x228] sm:$0xff]  ;;  %v382_v10 = vld [vmem:[%s3709_s16 + $0x260] sm:$0xff]  ;;  %v3856_v12 = vpack.c.bf16 %v677_v4, %v674_v3 }
  0x53   : > { %2868 = vmatpush1.bf16.msra.mxu0 %v2867_v29  ;;  %2928 = vmatpush3.bf16.msra.mxu1 %v2927_v31  ;;  %v3846_v8 = vld [vmem:[%s4473_s0 + $0x28] sm:$0xff]  ;;  %v673_v13 = vld [vmem:[%s3802_s17 + $0x60] sm:$0xff]  ;;  %v676_v14 = vld [vmem:[%s3802_s17 + $0x78] sm:$0xff]  ;;  %v2883_v15 = vpack.c.bf16 %v375_v7, %v372_v6 }
  0x54   : > { %2870 = vmatprep.subr.bf16.mxu0 %v2869_v32  ;;  %2930 = vmatprep.subr.bf16.mxu1 %v2929_v34  ;;  %v379_v9 = vld [vmem:[%s3709_s16 + $0x248] sm:$0xff]  ;;  %v3864_v16 = vld [vmem:[%s4473_s0 + $0x20] sm:$0xff]  ;;  %v680_v17 = vld [vmem:[%s3802_s17 + $0x98] sm:$0xff]  ;;  %v3878_v25 = vpack.c.bf16 %v676_v14, %v673_v13 }
  0x55   : > { %v683_v18 = vld [vmem:[%s3802_s17 + $0xb0] sm:$0xff]  ;;  %v2885_v19 = vpack.c.bf16 %v382_v10, %v379_v9  ;;  %v378_v20 = vld [vmem:[%s3709_s16 + $0x240] sm:$0xff]  ;;  %v381_v21 = vld [vmem:[%s3709_s16 + $0x258] sm:$0xff] }
  0x56   : > { %v3873_v22 = vld [vmem:[%s4473_s0 + $0x38] sm:$0xff]  ;;  %v388_v24 = vld [vmem:[%s3709_s16 + $0x290] sm:$0xff]  ;;  %v3882_v26 = vpack.c.bf16 %v683_v18, %v680_v17  ;;  %v682_v28 = vld [vmem:[%s3802_s17 + $0xa8] sm:$0xff]  ;;  %v2887_v29 = vpack.c.bf16 %v381_v21, %v378_v20 }
  0x57   : > { %2872 = vmatpush1.bf16.msra.mxu0 %v2871_v39  ;;  %2932 = vmatpush3.bf16.msra.mxu1 %v2931_v40  ;;  %v385_v23 = vld [vmem:[%s3709_s16 + $0x278] sm:$0xff]  ;;  %v679_v27 = vld [vmem:[%s3802_s17 + $0x90] sm:$0xff]  ;;  %v686_v31 = vld [vmem:[%s3802_s17 + $0xc8] sm:$0xff] }
  0x58   : > { %2874 = vmatprep.subr.bf16.mxu0 %v2873_v41  ;;  %2934 = vmatprep.subr.bf16.mxu1 %v3820_v56  ;;  %v3890_v30 = vld [vmem:[%s4473_s0 + $0x30] sm:$0xff]  ;;  %v689_v32 = vld [vmem:[%s3802_s17 + $0xe0] sm:$0xff]  ;;  %v2889_v33 = vpack.c.bf16 %v388_v24, %v385_v23  ;;  %v387_v35 = vld [vmem:[%s3709_s16 + $0x288] sm:$0xff]  ;;  %v3904_v39 = vpack.c.bf16 %v682_v28, %v679_v27 }
  0x59   : > { %v384_v34 = vld [vmem:[%s3709_s16 + $0x270] sm:$0xff]  ;;  %v3899_v36 = vld [vmem:[%s4473_s0 + $0x48] sm:$0xff]  ;;  %v394_v38 = vld [vmem:[%s3709_s16 + $0x2c0] sm:$0xff]  ;;  %v3908_v40 = vpack.c.bf16 %v689_v32, %v686_v31  ;;  %v3579_v31 = vmov 0.0|0.0  }
  0x5a   : > { %597 = vmatmul.mubr.f32.vlgmr.msra.gmra.mrb[0].mxu1 %v3809_v49  ;;  %v391_v37 = vld [vmem:[%s3709_s16 + $0x2a8] sm:$0xff]  ;;  %v685_v41 = vld [vmem:[%s3802_s17 + $0xc0] sm:$0xff]  ;;  %v688_v42 = vld [vmem:[%s3802_s17 + $0xd8] sm:$0xff]  ;;  %v2891_v43 = vpack.c.bf16 %v387_v35, %v384_v34 }
  0x5b   : > { %2876 = vmatpush1.bf16.msra.mxu0 %v2875_v48  ;;  %601 = vmatprep.mubr.f32.mxu1 %v3816_v53  ;;  %v3916_v44 = vld [vmem:[%s4473_s0 + $0x40] sm:$0xff]  ;;  %v692_v45 = vld [vmem:[%s3802_s17 + $0xf8] sm:$0xff]  ;;  %v695_v46 = vld [vmem:[%s3802_s17 + $0x110] sm:$0xff]  ;;  %v2893_v47 = vpack.c.bf16 %v394_v38, %v391_v37  ;;  %v3930_v55 = vpack.c.bf16 %v688_v42, %v685_v41  ;;  %v3580_v42 = vmov 0.0  }
  0x5c   : > { %2878 = vmatprep.subr.bf16.mxu0 %v2877_v52  ;;  %2936 = vmatpush1.bf16.msra.mxu1 %v3826_v60  ;;  %v390_v48 = vld [vmem:[%s3709_s16 + $0x2a0] sm:$0xff]  ;;  %v393_v50 = vld [vmem:[%s3709_s16 + $0x2b8] sm:$0xff]  ;;  %v400_v54 = vld [vmem:[%s3709_s16 + $0x2f0] sm:$0xff]  ;;  %v3934_v57 = vpack.c.bf16 %v695_v46, %v692_v45 }
  0x5d   : > { %2938 = vmatprep.subr.bf16.mxu1 %v3837_v2  ;;  %v3925_v51 = vld [vmem:[%s4473_s0 + $0x58] sm:$0xff]  ;;  %v691_v58 = vld [vmem:[%s3802_s17 + $0xf0] sm:$0xff]  ;;  %v694_v59 = vld [vmem:[%s3802_s17 + $0x108] sm:$0xff]  ;;  %v2895_v61 = vpack.c.bf16 %v393_v50, %v390_v48 }
  0x5e   : > { %602 = vmatmul.mubr.f32.gmra.mrb[2].mxu1 %v3835_v1  ;;  %v397_v52 = vld [vmem:[%s3709_s16 + $0x2d8] sm:$0xff]  ;;  %v3942_v62 = vld [vmem:[%s4473_s0 + $0x50] sm:$0xff]  ;;  %v698_v63 = vld [vmem:[%s3802_s17 + $0x128] sm:$0xff]  ;;  %v3954_v7 = vpack.c.bf16 %v694_v59, %v691_v58 }
  0x5f   : > { %2880 = vmatpush1.bf16.msra.mxu0 %v2879_v0  ;;  %606 = vmatprep.mubr.f32.mxu1 %v3846_v8  ;;  %v701_v0 = vld [vmem:[%s3802_s17 + $0x140] sm:$0xff]  ;;  %v2897_v3 = vpack.c.bf16 %v400_v54, %v397_v52  ;;  %v396_v4 = vld [vmem:[%s3709_s16 + $0x2d0] sm:$0xff]  ;;  %v3951_v6 = vld [vmem:[%s4473_s0 + $0x68] sm:$0xff]  ;;  %v404_v52 = vlaneseq }
  0x60   : > { %2882 = vmatprep.subr.bf16.mxu0 %v2881_v5  ;;  %2940 = vmatpush1.bf16.msra.mxu1 %v3852_v11  ;;  %v399_v5 = vld [vmem:[%s3709_s16 + $0x2e8] sm:$0xff]  ;;  %v3958_v9 = vpack.c.bf16 %v701_v0, %v698_v63  ;;  %v697_v10 = vld [vmem:[%s3802_s17 + $0x120] sm:$0xff]  ;;  %v700_v13 = vld [vmem:[%s3802_s17 + $0x138] sm:$0xff]  ;;  %s289_s16 = scalar_lea.vmem %s4477_s4, %s3786_s7 }
  0x61   : > { %2942 = vmatprep.subr.bf16.mxu1 %v3856_v12  ;;  %v2899_v14 = vpack.c.bf16 %v399_v5, %v396_v4  ;;  %v3971_v17 = vld [vmem:[%s4473_s0 + $0x78] sm:$0xff]  ;;  %v663_v18 = vld [vmem:[%s3802_s17 + $0x10] sm:$0xff]  ;;  %v3976_v20 = vpack.c.bf16 %v700_v13, %v697_v10  ;;  %v706_v27 = vld [vmem:[%s3802_s17 + $0x168] sm:$0xff]  ;;  %v405_v54 = vshrl.u32 %v404_v52, 7 }
  0x62   : > { %607 = vmatmul.mubr.f32.gmra.mrb[4].mxu1 %v3864_v16  ;;  %v704_v21 = vld [vmem:[%s3802_s17 + $0x158] sm:$0xff]  ;;  %v707_v23 = vld [vmem:[%s3802_s17 + $0x170] sm:$0xff]  ;;  %v678_v41 = vld [vmem:[%s3802_s17 + $0x88] sm:$0xff] }
  0x63   : > { %2884 = vmatpush1.bf16.msra.mxu0 %v2883_v15  ;;  %611 = vmatprep.mubr.f32.mxu1 %v3873_v22  ;;  %v3966_v15 = vld [vmem:[%s4473_s0 + $0x60] sm:$0xff]  ;;  %v703_v24 = vld [vmem:[%s3802_s17 + $0x150] sm:$0xff]  ;;  %v3993_v32 = vpack.c.bf16 %v707_v23, %v704_v21  ;;  %v672_v34 = vld [vmem:[%s3802_s17 + $0x58] sm:$0xff]  ;;  %v414_v58 = vsub.s32 2, %v405_v54 }
  0x64   : > { %2886 = vmatprep.subr.bf16.mxu0 %v2885_v19  ;;  %2944 = vmatpush1.bf16.msra.mxu1 %v3878_v25  ;;  %v666_v19 = vld [vmem:[%s3802_s17 + $0x28] sm:$0xff]  ;;  %v3988_v28 = vld [vmem:[%s4473_s0 + $0x70] sm:$0xff]  ;;  %v3998_v35 = vpack.c.bf16 %v706_v27, %v703_v24  ;;  %v696_v46 = vld [vmem:[%s3802_s17 + $0x118] sm:$0xff] }
  0x65   : > { %2946 = vmatprep.subr.bf16.mxu1 %v3882_v26  ;;  %v675_v38 = vld [vmem:[%s3802_s17 + $0x70] sm:$0xff]  ;;  %v690_v45 = vld [vmem:[%s3802_s17 + $0xe8] sm:$0xff]  ;;  %v705_v48 = vld [vmem:[%s3802_s17 + $0x160] sm:$0xff] }
  0x66   : > { %612 = vmatmul.mubr.f32.gmra.mrb[6].mxu1 %v3890_v30  ;;  %v708_v50 = vld [vmem:[%s3802_s17 + $0x178] sm:$0xff] }
  0x67   : > { %2888 = vmatpush1.bf16.msra.mxu0 %v2887_v29  ;;  %616 = vmatprep.mubr.f32.mxu1 %v3899_v36  ;;  %v3990_v29 = vpack.c.bf16 %v666_v19, %v663_v18 }
  0x68   : > { %2890 = vmatprep.subr.bf16.mxu0 %v2889_v33  ;;  %2948 = vmatpush1.bf16.msra.mxu1 %v3904_v39  ;;  %v669_v33 = vld [vmem:[%s3802_s17 + $0x40] sm:$0xff] }
  0x69   : > { %2950 = vmatprep.subr.bf16.mxu1 %v3908_v40  ;;  %v4004_v37 = vpack.c.bf16 %v672_v34, %v669_v33 }
  0x6a   : > { %617 = vmatmul.mubr.f32.gmra.mrb[8].mxu1 %v3916_v44 }
  0x6b   : > { %2892 = vmatpush1.bf16.msra.mxu0 %v2891_v43  ;;  %621 = vmatprep.mubr.f32.mxu1 %v3925_v51  ;;  %v684_v43 = vld [vmem:[%s3802_s17 + $0xb8] sm:$0xff] }
  0x6c   : > { %2894 = vmatprep.subr.bf16.mxu0 %v2893_v47  ;;  %2952 = vmatpush1.bf16.msra.mxu1 %v3930_v55  ;;  %v702_v47 = vld [vmem:[%s3802_s17 + $0x148] sm:$0xff] }
  0x6d   : > { %2954 = vmatprep.subr.bf16.mxu1 %v3934_v57 }
  0x6e   : > { %622 = vmatmul.mubr.f32.gmra.mrb[10].mxu1 %v3942_v62 }
  0x6f   : > { %2896 = vmatpush1.bf16.msra.mxu0 %v2895_v61  ;;  %626 = vmatprep.mubr.f32.mxu1 %v3951_v6 }
  0x70   : > { %2898 = vmatprep.subr.bf16.mxu0 %v2897_v3  ;;  %2956 = vmatpush1.bf16.msra.mxu1 %v3954_v7 }
  0x71   : > { %2958 = vmatprep.subr.bf16.mxu1 %v3958_v9 }
  0x72   : > { %627 = vmatmul.mubr.f32.gmra.mrb[12].mxu1 %v3966_v15 }
  0x73   : > { %2900 = vmatpush1.bf16.msra.mxu0 %v2899_v14  ;;  %631 = vmatprep.mubr.f32.mxu1 %v3971_v17 }
  0x74   : > { %2965 = vmatprep.subr.bf16.mxu0 %v3579_v31  ;;  %2960 = vmatpush1.bf16.msra.mxu1 %v3976_v20 }
  0x75   : > { %2962 = vmatprep.subr.bf16.mxu1 %v3993_v32 }
  0x76   : > { %484 = vmatmul.mubr.f32.vlgmr.msra.gmra.mrb[0].mxu0 %v3809_v49  ;;  %632 = vmatmul.mubr.f32.gmra.mrb[14].mxu1 %v3988_v28  ;;  %v4016_v49 = vpack.c.bf16 %v678_v41, %v675_v38  ;;  %v406_v38 = vsub.s32 0, %v405_v54 }
  0x77   : > { %489 = vmatprep.mubr.f32.mxu0 %v3816_v53  ;;  %2967 = vmatpush3.bf16.msra.mxu0 %v3990_v29  ;;  %v681_v53 = vld [vmem:[%s3802_s17 + $0xa0] sm:$0xff] }
  0x78   : > { %2968 = vmatprep.subr.bf16.mxu0 %v3579_v31  ;;  %2964 = vmatpush1.bf16.msra.mxu1 %v3998_v35 }
  0x79   : > { %785 = vmatprep.mubr.f32.mxu1 %v3580_v42  ;;  %2990 = vmatprep.subr.bf16.mxu1 %v3820_v56 }
  0x7a   : > { %490 = vmatmul.mubr.f32.gmra.mrb[2].mxu0 %v3835_v1  ;;  %v4028_v1 = vpack.c.bf16 %v684_v43, %v681_v53  ;;  %v410_v53 = vsub.s32 1, %v405_v54 }
  0x7b   : > { %495 = vmatprep.mubr.f32.mxu0 %v3846_v8  ;;  %2970 = vmatpush3.bf16.msra.mxu0 %v4004_v37  ;;  %v687_v8 = vld [vmem:[%s3802_s17 + $0xd0] sm:$0xff] }
  0x7c   : > { %786 = vmatmul.mubr.f32.vlgmr.msra.gmra.mrb[16].mxu1 %v3580_v42  ;;  %2971 = vmatprep.subr.bf16.mxu0 %v3579_v31 }
  0x7d   : > { %2992 = vmatpush1.bf16.msra.mxu1 %v3826_v60  ;;  %966 = vmatprep.mubr.f32.mxu1 %v3580_v42 }
  0x7e   : > { %496 = vmatmul.mubr.f32.gmra.mrb[4].mxu0 %v3864_v16  ;;  %2994 = vmatprep.subr.bf16.mxu1 %v3837_v2  ;;  %v4038_v16 = vpack.c.bf16 %v690_v45, %v687_v8 }
  0x7f   : > { %501 = vmatprep.mubr.f32.mxu0 %v3873_v22  ;;  %2973 = vmatpush3.bf16.msra.mxu0 %v4016_v49  ;;  %v693_v22 = vld [vmem:[%s3802_s17 + $0x100] sm:$0xff] }
  0x80   : > { %2974 = vmatprep.subr.bf16.mxu0 %v3579_v31 }
  0x81   : > { %2996 = vmatpush1.bf16.msra.mxu1 %v3852_v11 }
  0x82   : > { %502 = vmatmul.mubr.f32.gmra.mrb[6].mxu0 %v3890_v30  ;;  %2998 = vmatprep.subr.bf16.mxu1 %v3856_v12  ;;  %v4048_v30 = vpack.c.bf16 %v696_v46, %v693_v22 }
  0x83   : > { %507 = vmatprep.mubr.f32.mxu0 %v3899_v36  ;;  %2976 = vmatpush3.bf16.msra.mxu0 %v4028_v1  ;;  %v699_v36 = vld [vmem:[%s3802_s17 + $0x130] sm:$0xff]  ;;  %s3385_s17 = smul.u32 3, %s3786_s7  ;;  %s4120_s7 = scalar_lea.vmem [#allocation5], %s2318_s15 }
  0x84   : > { %2977 = vmatprep.subr.bf16.mxu0 %v3579_v31  ;;  %s890_s21 = scalar_lea.vmem %s4120_s7, %s2320_s29 [#allocation5]  ;;  %s1065_s13 = scalar_lea.vmem %s4120_s7, %s2325_s27 [#allocation5] }
  0x85   : > { %3000 = vmatpush1.bf16.msra.mxu1 %v3878_v25  ;;  %s286_s24 = scalar_lea.vmem %s4476_s3, %s3385_s17  ;;  %s898_s17 = scalar_lea.vmem [#allocation2], %s2358_s12 }
  0x86   : > { %508 = vmatmul.mubr.f32.gmra.mrb[8].mxu0 %v3916_v44  ;;  %3002 = vmatprep.subr.bf16.mxu1 %v3882_v26  ;;  %v4058_v44 = vpack.c.bf16 %v702_v47, %v699_v36  ;;  %v402_v59 = vld [vmem:[%s286_s24] sm:$0x7]  ;;  %s2329_s24 = sshll.u32 %s4219_s18, 3  ;;  %s2337_s27 = sshll.u32 %s4323_s11, 3 }
  0x87   : > { %513 = vmatprep.mubr.f32.mxu0 %v3925_v51  ;;  %2979 = vmatpush3.bf16.msra.mxu0 %v4038_v16  ;;  %v4068_v51 = vpack.c.bf16 %v708_v50, %v705_v48  ;;  %v407_v22 = vrot.slane %v402_v59, %v406_v38  ;;  %v411_v36 = vrot.slane %v402_v59, %v410_v53  ;;  %s1069_s25 = sshra.s32 %s2329_s24, 3  ;;  %s1240_s6 = scalar_lea.vmem %s4120_s7, %s2329_s24 [#allocation5] }
  0x88   : > { %2980 = vmatprep.subr.bf16.mxu0 %v3579_v31  ;;  %s2359_s29 = smul.u32 24, %s1069_s25  ;;  %s1419_s10 = sshra.s32 %s2337_s27, 3 }
  0x89   : > { %3004 = vmatpush1.bf16.msra.mxu1 %v3904_v39  ;;  %s2361_s12 = smul.u32 24, %s1419_s10 }
  0x8a   : > { %514 = vmatmul.mubr.f32.gmra.mrb[10].mxu0 %v3942_v62  ;;  %3006 = vmatprep.subr.bf16.mxu1 %v3908_v40  ;;  %v415_v62 = vrot.slane %v402_v59, %v414_v58  ;;  %s1073_s30 = scalar_lea.vmem [#allocation2], %s2359_s29 }
  0x8b   : > { %519 = vmatprep.mubr.f32.mxu0 %v3951_v6  ;;  %2982 = vmatpush3.bf16.msra.mxu0 %v4048_v30  ;;  %s4375_s18 = scalar_select %p4489_p12, 5, 2 }
  0x8c   : > { %2983 = vmatprep.subr.bf16.mxu0 %v3579_v31  ;;  %s4437_s11 = scalar_select %p4491_p2, 7, 0 }
  0x8d   : > { %3008 = vmatpush1.bf16.msra.mxu1 %v3930_v55  ;;  %s2341_s24 = sshll.u32 %s4375_s18, 3  ;;  %s2354_s18 = sshll.u32 (%p4492_p3), %s3631_s22, 3 }
  0x8e   : > { %520 = vmatmul.mubr.f32.gmra.mrb[12].mxu0 %v3966_v15  ;;  %3010 = vmatprep.subr.bf16.mxu1 %v3934_v57  ;;  %s1594_s25 = sshra.s32 %s2341_s24, 3 }
  0x8f   : > { %525 = vmatprep.mubr.f32.mxu0 %v3971_v17  ;;  %2985 = vmatpush3.bf16.msra.mxu0 %v4058_v44  ;;  %s2362_s29 = smul.u32 24, %s1594_s25 }
  0x90   : > { %2986 = vmatprep.subr.bf16.mxu0 %v3579_v31 }
  0x91   : > { %3012 = vmatpush1.bf16.msra.mxu1 %v3954_v7 }
  0x92   : > { %526 = vmatmul.mubr.f32.gmra.mrb[14].mxu0 %v3988_v28  ;;  %3014 = vmatprep.subr.bf16.mxu1 %v3958_v9 }
  0x93   : > { %2988 = vmatpush3.bf16.msra.mxu0 %v4068_v51  ;;  %2589 = vmatprep.mubr.msk.f32.mxu0 %vm3581_vm0, %v3580_v42 }
  0x94   : > { %3021 = vmatprep.subr.bf16.mxu0 %v3579_v31 }
  0x95   : > { %3016 = vmatpush1.bf16.msra.mxu1 %v3976_v20 }
  0x96   : > { %2590 = vmatmul.mubr.f32.vlgmr.msra.gmra.mrb[16].mxu0 %v3580_v42  ;;  %3018 = vmatprep.subr.bf16.mxu1 %v3993_v32 }
  0x97   : > { %3023 = vmatpush3.bf16.msra.mxu0 %v3990_v29  ;;  %2624 = vmatprep.mubr.msk.f32.mxu0 %vm3581_vm0, %v3580_v42 }
  0x98   : > { %3024 = vmatprep.subr.bf16.mxu0 %v3579_v31 }
  0x99   : > { %3020 = vmatpush1.bf16.msra.mxu1 %v3998_v35 }
  0x9a   : > { %3046 = vmatprep.subr.bf16.mxu1 %v3820_v56 }
  0x9b   : > { %3026 = vmatpush3.bf16.msra.mxu0 %v4004_v37 }
  0x9c   : > { %3027 = vmatprep.subr.bf16.mxu0 %v3579_v31 }
  0x9f   : > { %3029 = vmatpush3.bf16.msra.mxu0 %v4016_v49 }
  0xa0   : > { %3030 = vmatprep.subr.bf16.mxu0 %v3579_v31 }
  0xa3   : > { %3032 = vmatpush3.bf16.msra.mxu0 %v4028_v1 }
  0xa4   : > { %3033 = vmatprep.subr.bf16.mxu0 %v3579_v31 }
  0xa7   : > { %3035 = vmatpush3.bf16.msra.mxu0 %v4038_v16 }
  0xa8   : > { %3036 = vmatprep.subr.bf16.mxu0 %v3579_v31 }
  0xab   : > { %3038 = vmatpush3.bf16.msra.mxu0 %v4048_v30 }
  0xac   : > { %3039 = vmatprep.subr.bf16.mxu0 %v3579_v31 }
  0xaf   : > { %3041 = vmatpush3.bf16.msra.mxu0 %v4058_v44 }
  0xb0   : > { %3042 = vmatprep.subr.bf16.mxu0 %v3579_v31 }
  0xb3   : > { %3044 = vmatpush3.bf16.msra.mxu0 %v4068_v51 }
  0xb4   : > { %3077 = vmatprep.subr.bf16.mxu0 %v3579_v31 }
 0x12d   : > { %v2397_v61 = vpop.f32.mrb[0].mxu1 }
 0x12e   : > { %v2398_v63 = vpop.f32.mrb[1].mxu1 }
 0x12f   : > { %v2399_v0 = vadd.f32 %v2398_v63, %v2397_v61 }
 0x131   : > { %v599_v3 = vadd.f32 %v2399_v0, %v415_v62  ;;  %v2400_v4 = vpop.f32.mrb[2].mxu1 }
 0x132   : > { %v2401_v5 = vpop.f32.mrb[3].mxu1 }
 0x133   : > { %639 = vst [vmem:[#allocation2 + $0x10] sm:$0xff] %v599_v3  ;;  %v2402_v6 = vadd.f32 %v2401_v5, %v2400_v4 }
 0x135   : > { %v604_v10 = vadd.f32 %v2402_v6, %v415_v62  ;;  %v2403_v13 = vpop.f32.mrb[4].mxu1 }
 0x136   : > { %v2404_v14 = vpop.f32.mrb[5].mxu1 }
 0x137   : > { %642 = vst [vmem:[#allocation2 + $0x28] sm:$0xff] %v604_v10  ;;  %v2405_v15 = vadd.f32 %v2404_v14, %v2403_v13 }
 0x139   : > { %v609_v17 = vadd.f32 %v2405_v15, %v415_v62  ;;  %v2406_v18 = vpop.f32.mrb[6].mxu1 }
 0x13a   : > { %v2407_v19 = vpop.f32.mrb[7].mxu1 }
 0x13b   : > { %645 = vst [vmem:[#allocation2 + $0x40] sm:$0xff] %v609_v17  ;;  %v2408_v21 = vadd.f32 %v2407_v19, %v2406_v18 }
 0x13d   : > { %v614_v23 = vadd.f32 %v2408_v21, %v415_v62  ;;  %v2409_v24 = vpop.f32.mrb[8].mxu1 }
 0x13e   : > { %v2410_v27 = vpop.f32.mrb[9].mxu1 }
 0x13f   : > { %648 = vst [vmem:[#allocation2 + $0x58] sm:$0xff] %v614_v23  ;;  %v2411_v28 = vadd.f32 %v2410_v27, %v2409_v24 }
 0x141   : > { %v619_v33 = vadd.f32 %v2411_v28, %v415_v62  ;;  %v2412_v34 = vpop.f32.mrb[10].mxu1 }
 0x142   : > { %v2413_v41 = vpop.f32.mrb[11].mxu1 }
 0x143   : > { %651 = vst [vmem:[#allocation2 + $0x70] sm:$0xff] %v619_v33  ;;  %v2414_v43 = vadd.f32 %v2413_v41, %v2412_v34 }
 0x145   : > { %v624_v8 = vadd.f32 %v2414_v43, %v415_v62  ;;  %v2415_v45 = vpop.f32.mrb[12].mxu1 }
 0x146   : > { %v2416_v46 = vpop.f32.mrb[13].mxu1 }
 0x147   : > { %654 = vst [vmem:[#allocation2 + $0x88] sm:$0xff] %v624_v8  ;;  %v2417_v47 = vadd.f32 %v2416_v46, %v2415_v45 }
 0x149   : > { %v485_v48 = vpop.f32.mrb[0].mxu0  ;;  %v629_v50 = vadd.f32 %v2417_v47, %v415_v62  ;;  %v2418_v52 = vpop.f32.mrb[14].mxu1 }
 0x14a   : > { %v486_v58 = vadd.f32 %v485_v48, %v407_v22  ;;  %v487_v61 = vpop.f32.mrb[1].mxu0  ;;  %v2419_v63 = vpop.f32.mrb[15].mxu1 }
 0x14b   : > { %v488_v0 = vadd.f32 %v487_v61, %v411_v36  ;;  %657 = vst [vmem:[#allocation2 + $0xa0] sm:$0xff] %v629_v50  ;;  %v2420_v3 = vadd.f32 %v2419_v63, %v2418_v52 }
 0x14c   : > { %637 = vst [vmem:[#allocation2] sm:$0xff] %v486_v58 }
 0x14d   : > { %638 = vst [vmem:[#allocation2 + $0x8] sm:$0xff] %v488_v0  ;;  %v491_v54 = vpop.f32.mrb[2].mxu0  ;;  %v634_v4 = vadd.f32 %v2420_v3, %v415_v62 }
 0x14e   : > { %v492_v5 = vadd.f32 %v491_v54, %v407_v22  ;;  %v493_v6 = vpop.f32.mrb[3].mxu0 }
 0x14f   : > { %v494_v10 = vadd.f32 %v493_v6, %v411_v36  ;;  %660 = vst [vmem:[#allocation2 + $0xb8] sm:$0xff] %v634_v4  ;;  %v787_v59 = vpop.f32.mrb[16].mxu1 }
 0x150   : > { %640 = vst [vmem:[#allocation2 + $0x18] sm:$0xff] %v492_v5  ;;  %v789_v13 = vpop.f32.mrb[17].mxu1 }
 0x151   : > { %641 = vst [vmem:[#allocation2 + $0x20] sm:$0xff] %v494_v10  ;;  %v497_v14 = vpop.f32.mrb[4].mxu0  ;;  %v4116_v10 = vld [vmem:[%s289_s16] ss:$0 sm:$0xff] }
 0x152   : > { %v498_v15 = vadd.f32 %v497_v14, %v407_v22  ;;  %v499_v17 = vpop.f32.mrb[5].mxu0 }
 0x153   : > { %v500_v18 = vadd.f32 %v499_v17, %v411_v36 }
 0x154   : > { %643 = vst [vmem:[#allocation2 + $0x30] sm:$0xff] %v498_v15 }
 0x155   : > { %644 = vst [vmem:[#allocation2 + $0x38] sm:$0xff] %v500_v18  ;;  %v503_v19 = vpop.f32.mrb[6].mxu0 }
 0x156   : > { %v504_v21 = vadd.f32 %v503_v19, %v407_v22  ;;  %v505_v23 = vpop.f32.mrb[7].mxu0 }
 0x157   : > { %v506_v24 = vadd.f32 %v505_v23, %v411_v36 }
 0x158   : > { %646 = vst [vmem:[#allocation2 + $0x48] sm:$0xff] %v504_v21 }
 0x159   : > { %647 = vst [vmem:[#allocation2 + $0x50] sm:$0xff] %v506_v24  ;;  %v509_v62 = vpop.f32.mrb[8].mxu0 }
 0x15a   : > { %v510_v27 = vadd.f32 %v509_v62, %v407_v22  ;;  %v511_v28 = vpop.f32.mrb[9].mxu0 }
 0x15b   : > { %v512_v33 = vadd.f32 %v511_v28, %v411_v36 }
 0x15c   : > { %649 = vst [vmem:[#allocation2 + $0x60] sm:$0xff] %v510_v27 }
 0x15d   : > { %650 = vst [vmem:[#allocation2 + $0x68] sm:$0xff] %v512_v33  ;;  %v515_v34 = vpop.f32.mrb[10].mxu0 }
 0x15e   : > { %v516_v38 = vadd.f32 %v515_v34, %v407_v22  ;;  %v517_v41 = vpop.f32.mrb[11].mxu0 }
 0x15f   : > { %v518_v53 = vadd.f32 %v517_v41, %v411_v36 }
 0x160   : > { %652 = vst [vmem:[#allocation2 + $0x78] sm:$0xff] %v516_v38 }
 0x161   : > { %653 = vst [vmem:[#allocation2 + $0x80] sm:$0xff] %v518_v53  ;;  %v521_v43 = vpop.f32.mrb[12].mxu0 }
 0x162   : > { %v522_v8 = vadd.f32 %v521_v43, %v407_v22  ;;  %v523_v45 = vpop.f32.mrb[13].mxu0 }
 0x163   : > { %v524_v46 = vadd.f32 %v523_v45, %v411_v36 }
 0x164   : > { %655 = vst [vmem:[#allocation2 + $0x90] sm:$0xff] %v522_v8 }
 0x165   : > { %656 = vst [vmem:[#allocation2 + $0x98] sm:$0xff] %v524_v46  ;;  %v527_v47 = vpop.f32.mrb[14].mxu0 }
 0x166   : > { %v528_v48 = vadd.f32 %v527_v47, %v407_v22  ;;  %v529_v50 = vpop.f32.mrb[15].mxu0 }
 0x167   : > { %v530_v52 = vadd.f32 %v529_v50, %v411_v36 }
 0x168   : > { %658 = vst [vmem:[#allocation2 + $0xa8] sm:$0xff] %v528_v48 }
 0x169   : > { %659 = vst [vmem:[#allocation2 + $0xb0] sm:$0xff] %v530_v52  ;;  %v858_v58 = vpop.f32.mrb[16].mxu0 }
 0x16a   : > { %v2591_v61 = vpop.f32.mrb[17].mxu0 }
 0x170   : > { %v718_v63 = vld [vmem:[%s717_s8] sm:$0xff]  ;;  %v719_v3 = vld [vmem:[%s717_s8 + $0x8] sm:$0xff]  ;;  %v720_v17 = vld [vmem:[%s717_s8 + $0x10] sm:$0xff]  ;;  %s4271_s8 = scalar_select %p4487_p6, 3, 4 }
 0x171   : > { %v862_v0 = vadd.f32 %v787_v59, %v718_v63  ;;  %v869_v4 = vadd.f32 %v789_v13, %v719_v3  ;;  %v882_v59 = vadd.f32 %v4116_v10, %v858_v58  ;;  %v899_v28 = vld [vmem:[%s898_s17] sm:$0xff]  ;;  %v900_v8 = vld [vmem:[%s898_s17 + $0x8] sm:$0xff] }
 0x172   : > { %s2333_s9 = sshll.u32 %s4271_s8, 3 }
 0x173   : > { %v2322_v54 = vmul.f32 -1.442695, %v862_v0  ;;  %v2323_v5 = vmul.f32 -1.442695, %v869_v4  ;;  %v901_v0 = vld [vmem:[%s898_s17 + $0x10] sm:$0xff]  ;;  %s1244_s14 = sshra.s32 %s2333_s9, 3 }
 0x174   : > { %s2360_s16 = smul.u32 24, %s1244_s14  ;;  %s1423_s17 = scalar_lea.vmem [#allocation2], %s2361_s12 }
 0x175   : > { %3430 = vpow2.f32 %v2322_v54  ;;  %s4425_s8 = scalar_select %p4490_p0, 6, 1 }
 0x176   : > { %3432 = vpow2.f32 %v2323_v5  ;;  %s1248_s15 = scalar_lea.vmem [#allocation2], %s2360_s16 }
 0x17f   : > { %v3431_v22 = vpop.eup %3430 }
 0x180   : > { %v866_v36 = vadd.f32 1.0, %v3431_v22  ;;  %v3433_v6 = vpop.eup %3432 }
 0x181   : > { %v873_v14 = vadd.f32 1.0, %v3433_v6 }
 0x182   : > { %3434 = vrcp.f32 %v866_v36 }
 0x183   : > { %3436 = vrcp.f32 %v873_v14  ;;  %v1074_v14 = vld [vmem:[%s1073_s30] sm:$0xff] }
 0x18c   : > { %v3435_v15 = vpop.eup %3434 }
 0x18d   : > { %v883_v13 = vmul.f32 %v3435_v15, %v882_v59  ;;  %v3437_v19 = vpop.eup %3436 }
 0x18e   : > { %v886_v21 = vsub.f32 1.0, %v3437_v19  ;;  %v888_v62 = vmul.f32 0.0, %v3437_v19 }
 0x18f   : > { %v884_v18 = vadd.f32 %v883_v13, %v720_v17 }
 0x191   : > { %3438 = vtanh.f32 %v884_v18 }
 0x19b   : > { %v3439_v23 = vpop.eup %3438 }
 0x19c   : > { %v887_v24 = vmul.f32 %v3439_v23, %v886_v21  ;;  %v1075_v21 = vld [vmem:[%s1073_s30 + $0x8] sm:$0xff] }
 0x19e   : > { %v4125_v27 = vadd.f32 %v888_v62, %v887_v24 }
 0x1a0   : > { %891 = vst [vmem:[%s890_s21] sm:$0xff] %v4125_v27  ;;  %967 = vmatmul.mubr.f32.vlgmr.msra.gmra.mrb[18].mxu1 %v4125_v27  ;;  %2625 = vmatmul.mubr.f32.vlgmr.msra.gmra.mrb[18].mxu0 %v4125_v27  ;;  %s1415_s21 = scalar_lea.vmem %s4120_s7, %s2333_s9 [#allocation5]  ;;  %s2345_s9 = sshll.u32 %s4425_s8, 3 }
 0x1a1   : > { %3048 = vmatpush1.bf16.msra.mxu1 %v3826_v60  ;;  %3079 = vmatpush3.bf16.msra.mxu0 %v3990_v29  ;;  %s1769_s14 = sshra.s32 %s2345_s9, 3 }
 0x1a2   : > { %3050 = vmatprep.subr.bf16.mxu1 %v3837_v2  ;;  %3080 = vmatprep.subr.bf16.mxu0 %v3579_v31  ;;  %s2363_s16 = smul.u32 24, %s1769_s14 }
 0x1a3   : > { %1141 = vmatprep.mubr.f32.mxu1 %v3580_v42  ;;  %2659 = vmatprep.mubr.msk.f32.mxu0 %vm3581_vm0, %v3580_v42 }
 0x1a5   : > { %3052 = vmatpush1.bf16.msra.mxu1 %v3852_v11  ;;  %3082 = vmatpush3.bf16.msra.mxu0 %v4004_v37 }
 0x1a6   : > { %3054 = vmatprep.subr.bf16.mxu1 %v3856_v12  ;;  %3083 = vmatprep.subr.bf16.mxu0 %v3579_v31 }
 0x1a9   : > { %3056 = vmatpush1.bf16.msra.mxu1 %v3878_v25  ;;  %3085 = vmatpush3.bf16.msra.mxu0 %v4016_v49 }
 0x1aa   : > { %3058 = vmatprep.subr.bf16.mxu1 %v3882_v26  ;;  %3086 = vmatprep.subr.bf16.mxu0 %v3579_v31 }
 0x1ad   : > { %3060 = vmatpush1.bf16.msra.mxu1 %v3904_v39  ;;  %3088 = vmatpush3.bf16.msra.mxu0 %v4028_v1 }
 0x1ae   : > { %3062 = vmatprep.subr.bf16.mxu1 %v3908_v40  ;;  %3089 = vmatprep.subr.bf16.mxu0 %v3579_v31 }
 0x1b1   : > { %3064 = vmatpush1.bf16.msra.mxu1 %v3930_v55  ;;  %3091 = vmatpush3.bf16.msra.mxu0 %v4038_v16 }
 0x1b2   : > { %3066 = vmatprep.subr.bf16.mxu1 %v3934_v57  ;;  %3092 = vmatprep.subr.bf16.mxu0 %v3579_v31 }
 0x1b5   : > { %3068 = vmatpush1.bf16.msra.mxu1 %v3954_v7  ;;  %3094 = vmatpush3.bf16.msra.mxu0 %v4048_v30 }
 0x1b6   : > { %3070 = vmatprep.subr.bf16.mxu1 %v3958_v9  ;;  %3095 = vmatprep.subr.bf16.mxu0 %v3579_v31 }
 0x1b9   : > { %3072 = vmatpush1.bf16.msra.mxu1 %v3976_v20  ;;  %3097 = vmatpush3.bf16.msra.mxu0 %v4058_v44 }
 0x1ba   : > { %3074 = vmatprep.subr.bf16.mxu1 %v3993_v32  ;;  %3098 = vmatprep.subr.bf16.mxu0 %v3579_v31 }
 0x1bd   : > { %3076 = vmatpush1.bf16.msra.mxu1 %v3998_v35  ;;  %3100 = vmatpush3.bf16.msra.mxu0 %v4068_v51 }
 0x1be   : > { %3102 = vmatprep.subr.bf16.mxu1 %v3820_v56  ;;  %3133 = vmatprep.subr.bf16.mxu0 %v3579_v31 }
 0x273   : > { %v968_v33 = vpop.f32.mrb[18].mxu1  ;;  %v1039_v34 = vpop.f32.mrb[18].mxu0 }
 0x274   : > { %v1043_v38 = vadd.f32 %v968_v33, %v899_v28  ;;  %v970_v41 = vpop.f32.mrb[19].mxu1  ;;  %v2626_v53 = vpop.f32.mrb[19].mxu0  ;;  %v1057_v58 = vadd.f32 %v4116_v10, %v1039_v34 }
 0x275   : > { %v1050_v45 = vadd.f32 %v970_v41, %v900_v8  ;;  %v1076_v53 = vld [vmem:[%s1073_s30 + $0x10] sm:$0xff]  ;;  %s1598_s30 = scalar_lea.vmem [#allocation2], %s2362_s29  ;;  %s2125_s29 = scalar_lea.vmem (%p4492_p3), %s4478_s5, %s2354_s18 }
 0x276   : > { %v2327_v43 = vmul.f32 -1.442695, %v1043_v38 }
 0x277   : > { %v2328_v46 = vmul.f32 -1.442695, %v1050_v45 }
 0x278   : > { %3440 = vpow2.f32 %v2327_v43 }
 0x279   : > { %3442 = vpow2.f32 %v2328_v46 }
 0x282   : > { %v3441_v47 = vpop.eup %3440 }
 0x283   : > { %v1047_v48 = vadd.f32 1.0, %v3441_v47  ;;  %v3443_v50 = vpop.eup %3442 }
 0x284   : > { %v1054_v52 = vadd.f32 1.0, %v3443_v50 }
 0x285   : > { %3444 = vrcp.f32 %v1047_v48 }
 0x286   : > { %3446 = vrcp.f32 %v1054_v52  ;;  %v1249_v52 = vld [vmem:[%s1248_s15] sm:$0xff] }
 0x28f   : > { %v3445_v61 = vpop.eup %3444 }
 0x290   : > { %v1058_v63 = vmul.f32 %v3445_v61, %v1057_v58  ;;  %v3447_v54 = vpop.eup %3446 }
 0x291   : > { %v1061_v4 = vsub.f32 1.0, %v3447_v54  ;;  %v1063_v36 = vmul.f32 %v3447_v54, %v4125_v27 }
 0x292   : > { %v1059_v3 = vadd.f32 %v1058_v63, %v901_v0 }
 0x294   : > { %3448 = vtanh.f32 %v1059_v3 }
 0x29e   : > { %v3449_v5 = vpop.eup %3448 }
 0x29f   : > { %v1062_v22 = vmul.f32 %v3449_v5, %v1061_v4  ;;  %v1250_v4 = vld [vmem:[%s1248_s15 + $0x8] sm:$0xff] }
 0x2a1   : > { %v4177_v6 = vadd.f32 %v1063_v36, %v1062_v22 }
 0x2a3   : > { %1066 = vst [vmem:[%s1065_s13] sm:$0xff] %v4177_v6  ;;  %1142 = vmatmul.mubr.f32.vlgmr.msra.gmra.mrb[20].mxu1 %v4177_v6  ;;  %2660 = vmatmul.mubr.f32.vlgmr.msra.gmra.mrb[20].mxu0 %v4177_v6  ;;  %s1590_s13 = scalar_lea.vmem %s4120_s7, %s2337_s27 [#allocation5]  ;;  %s2349_s27 = sshll.u32 %s4437_s11, 3 }
 0x2a4   : > { %3104 = vmatpush1.bf16.msra.mxu1 %v3826_v60  ;;  %3135 = vmatpush3.bf16.msra.mxu0 %v3990_v29  ;;  %s1944_s10 = sshra.s32 %s2349_s27, 3 }
 0x2a5   : > { %3106 = vmatprep.subr.bf16.mxu1 %v3837_v2  ;;  %3136 = vmatprep.subr.bf16.mxu0 %v3579_v31  ;;  %s2364_s12 = smul.u32 24, %s1944_s10 }
 0x2a6   : > { %1316 = vmatprep.mubr.f32.mxu1 %v3580_v42  ;;  %2694 = vmatprep.mubr.msk.f32.mxu0 %vm3581_vm0, %v3580_v42 }
 0x2a8   : > { %3108 = vmatpush1.bf16.msra.mxu1 %v3852_v11  ;;  %3138 = vmatpush3.bf16.msra.mxu0 %v4004_v37 }
 0x2a9   : > { %3110 = vmatprep.subr.bf16.mxu1 %v3856_v12  ;;  %3139 = vmatprep.subr.bf16.mxu0 %v3579_v31 }
 0x2ac   : > { %3112 = vmatpush1.bf16.msra.mxu1 %v3878_v25  ;;  %3141 = vmatpush3.bf16.msra.mxu0 %v4016_v49 }
 0x2ad   : > { %3114 = vmatprep.subr.bf16.mxu1 %v3882_v26  ;;  %3142 = vmatprep.subr.bf16.mxu0 %v3579_v31 }
 0x2b0   : > { %3116 = vmatpush1.bf16.msra.mxu1 %v3904_v39  ;;  %3144 = vmatpush3.bf16.msra.mxu0 %v4028_v1 }
 0x2b1   : > { %3118 = vmatprep.subr.bf16.mxu1 %v3908_v40  ;;  %3145 = vmatprep.subr.bf16.mxu0 %v3579_v31 }
 0x2b4   : > { %3120 = vmatpush1.bf16.msra.mxu1 %v3930_v55  ;;  %3147 = vmatpush3.bf16.msra.mxu0 %v4038_v16 }
 0x2b5   : > { %3122 = vmatprep.subr.bf16.mxu1 %v3934_v57  ;;  %3148 = vmatprep.subr.bf16.mxu0 %v3579_v31 }
 0x2b8   : > { %3124 = vmatpush1.bf16.msra.mxu1 %v3954_v7  ;;  %3150 = vmatpush3.bf16.msra.mxu0 %v4048_v30 }
 0x2b9   : > { %3126 = vmatprep.subr.bf16.mxu1 %v3958_v9  ;;  %3151 = vmatprep.subr.bf16.mxu0 %v3579_v31 }
 0x2bc   : > { %3128 = vmatpush1.bf16.msra.mxu1 %v3976_v20  ;;  %3153 = vmatpush3.bf16.msra.mxu0 %v4058_v44 }
 0x2bd   : > { %3130 = vmatprep.subr.bf16.mxu1 %v3993_v32  ;;  %3154 = vmatprep.subr.bf16.mxu0 %v3579_v31 }
 0x2c0   : > { %3132 = vmatpush1.bf16.msra.mxu1 %v3998_v35  ;;  %3156 = vmatpush3.bf16.msra.mxu0 %v4068_v51 }
 0x2c1   : > { %3158 = vmatprep.subr.bf16.mxu1 %v3820_v56  ;;  %3189 = vmatprep.subr.bf16.mxu0 %v3579_v31 }
 0x376   : > { %v1143_v59 = vpop.f32.mrb[20].mxu1  ;;  %v1214_v15 = vpop.f32.mrb[20].mxu0 }
 0x377   : > { %v1218_v13 = vadd.f32 %v1143_v59, %v1074_v14  ;;  %v1145_v17 = vpop.f32.mrb[21].mxu1  ;;  %v2661_v18 = vpop.f32.mrb[21].mxu0  ;;  %v1232_v34 = vadd.f32 %v4116_v10, %v1214_v15 }
 0x378   : > { %v1225_v23 = vadd.f32 %v1145_v17, %v1075_v21  ;;  %v1251_v18 = vld [vmem:[%s1248_s15 + $0x10] sm:$0xff]  ;;  %s1773_s15 = scalar_lea.vmem [#allocation2], %s2363_s16 }
 0x379   : > { %v2331_v19 = vmul.f32 -1.442695, %v1218_v13 }
 0x37a   : > { %v2332_v24 = vmul.f32 -1.442695, %v1225_v23 }
 0x37b   : > { %3450 = vpow2.f32 %v2331_v19 }
 0x37c   : > { %3452 = vpow2.f32 %v2332_v24 }
 0x385   : > { %v3451_v62 = vpop.eup %3450 }
 0x386   : > { %v1222_v27 = vadd.f32 1.0, %v3451_v62  ;;  %v3453_v28 = vpop.eup %3452 }
 0x387   : > { %v1229_v33 = vadd.f32 1.0, %v3453_v28 }
 0x388   : > { %3454 = vrcp.f32 %v1222_v27 }
 0x389   : > { %3456 = vrcp.f32 %v1229_v33  ;;  %v1424_v33 = vld [vmem:[%s1423_s17] sm:$0xff] }
 0x392   : > { %v3455_v38 = vpop.eup %3454 }
 0x393   : > { %v1233_v41 = vmul.f32 %v3455_v38, %v1232_v34  ;;  %v3457_v8 = vpop.eup %3456 }
 0x394   : > { %v1236_v45 = vsub.f32 1.0, %v3457_v8  ;;  %v1238_v48 = vmul.f32 %v3457_v8, %v4177_v6 }
 0x395   : > { %v1234_v43 = vadd.f32 %v1233_v41, %v1076_v53 }
 0x397   : > { %3458 = vtanh.f32 %v1234_v43 }
 0x3a1   : > { %v3459_v46 = vpop.eup %3458 }
 0x3a2   : > { %v1237_v47 = vmul.f32 %v3459_v46, %v1236_v45  ;;  %v1425_v45 = vld [vmem:[%s1423_s17 + $0x8] sm:$0xff] }
 0x3a4   : > { %v4229_v50 = vadd.f32 %v1238_v48, %v1237_v47 }
 0x3a6   : > { %1241 = vst [vmem:[%s1240_s6] sm:$0xff] %v4229_v50  ;;  %1317 = vmatmul.mubr.f32.vlgmr.msra.gmra.mrb[22].mxu1 %v4229_v50  ;;  %2695 = vmatmul.mubr.f32.vlgmr.msra.gmra.mrb[22].mxu0 %v4229_v50  ;;  %s1765_s6 = scalar_lea.vmem %s4120_s7, %s2341_s24 [#allocation5] }
 0x3a7   : > { %3160 = vmatpush1.bf16.msra.mxu1 %v3826_v60  ;;  %3191 = vmatpush3.bf16.msra.mxu0 %v3990_v29 }
 0x3a8   : > { %3162 = vmatprep.subr.bf16.mxu1 %v3837_v2  ;;  %3192 = vmatprep.subr.bf16.mxu0 %v3579_v31 }
 0x3a9   : > { %1491 = vmatprep.mubr.f32.mxu1 %v3580_v42  ;;  %2729 = vmatprep.mubr.msk.f32.mxu0 %vm3581_vm0, %v3580_v42 }
 0x3ab   : > { %3164 = vmatpush1.bf16.msra.mxu1 %v3852_v11  ;;  %3194 = vmatpush3.bf16.msra.mxu0 %v4004_v37 }
 0x3ac   : > { %3166 = vmatprep.subr.bf16.mxu1 %v3856_v12  ;;  %3195 = vmatprep.subr.bf16.mxu0 %v3579_v31 }
 0x3af   : > { %3168 = vmatpush1.bf16.msra.mxu1 %v3878_v25  ;;  %3197 = vmatpush3.bf16.msra.mxu0 %v4016_v49 }
 0x3b0   : > { %3170 = vmatprep.subr.bf16.mxu1 %v3882_v26  ;;  %3198 = vmatprep.subr.bf16.mxu0 %v3579_v31 }
 0x3b3   : > { %3172 = vmatpush1.bf16.msra.mxu1 %v3904_v39  ;;  %3200 = vmatpush3.bf16.msra.mxu0 %v4028_v1 }
 0x3b4   : > { %3174 = vmatprep.subr.bf16.mxu1 %v3908_v40  ;;  %3201 = vmatprep.subr.bf16.mxu0 %v3579_v31 }
 0x3b7   : > { %3176 = vmatpush1.bf16.msra.mxu1 %v3930_v55  ;;  %3203 = vmatpush3.bf16.msra.mxu0 %v4038_v16 }
 0x3b8   : > { %3178 = vmatprep.subr.bf16.mxu1 %v3934_v57  ;;  %3204 = vmatprep.subr.bf16.mxu0 %v3579_v31 }
 0x3bb   : > { %3180 = vmatpush1.bf16.msra.mxu1 %v3954_v7  ;;  %3206 = vmatpush3.bf16.msra.mxu0 %v4048_v30 }
 0x3bc   : > { %3182 = vmatprep.subr.bf16.mxu1 %v3958_v9  ;;  %3207 = vmatprep.subr.bf16.mxu0 %v3579_v31 }
 0x3bf   : > { %3184 = vmatpush1.bf16.msra.mxu1 %v3976_v20  ;;  %3209 = vmatpush3.bf16.msra.mxu0 %v4058_v44 }
 0x3c0   : > { %3186 = vmatprep.subr.bf16.mxu1 %v3993_v32  ;;  %3210 = vmatprep.subr.bf16.mxu0 %v3579_v31 }
 0x3c3   : > { %3188 = vmatpush1.bf16.msra.mxu1 %v3998_v35  ;;  %3212 = vmatpush3.bf16.msra.mxu0 %v4068_v51 }
 0x3c4   : > { %3214 = vmatprep.subr.bf16.mxu1 %v3820_v56  ;;  %3245 = vmatprep.subr.bf16.mxu0 %v3579_v31 }
 0x479   : > { %v1318_v58 = vpop.f32.mrb[22].mxu1  ;;  %v1389_v61 = vpop.f32.mrb[22].mxu0 }
 0x47a   : > { %v1393_v63 = vadd.f32 %v1318_v58, %v1249_v52  ;;  %v1320_v0 = vpop.f32.mrb[23].mxu1  ;;  %v2696_v3 = vpop.f32.mrb[23].mxu0  ;;  %v1407_v15 = vadd.f32 %v4116_v10, %v1389_v61 }
 0x47b   : > { %v1400_v5 = vadd.f32 %v1320_v0, %v1250_v4  ;;  %v1426_v3 = vld [vmem:[%s1423_s17 + $0x10] sm:$0xff]  ;;  %s1948_s17 = scalar_lea.vmem [#allocation2], %s2364_s12 }
 0x47c   : > { %v2335_v54 = vmul.f32 -1.442695, %v1393_v63 }
 0x47d   : > { %v2336_v22 = vmul.f32 -1.442695, %v1400_v5 }
 0x47e   : > { %3460 = vpow2.f32 %v2335_v54 }
 0x47f   : > { %3462 = vpow2.f32 %v2336_v22 }
 0x488   : > { %v3461_v36 = vpop.eup %3460 }
 0x489   : > { %v1397_v6 = vadd.f32 1.0, %v3461_v36  ;;  %v3463_v14 = vpop.eup %3462 }
 0x48a   : > { %v1404_v59 = vadd.f32 1.0, %v3463_v14 }
 0x48b   : > { %3464 = vrcp.f32 %v1397_v6 }
 0x48c   : > { %3466 = vrcp.f32 %v1404_v59  ;;  %v1599_v59 = vld [vmem:[%s1598_s30] sm:$0xff] }
 0x495   : > { %v3465_v13 = vpop.eup %3464 }
 0x496   : > { %v1408_v17 = vmul.f32 %v3465_v13, %v1407_v15  ;;  %v3467_v21 = vpop.eup %3466 }
 0x497   : > { %v1411_v23 = vsub.f32 1.0, %v3467_v21  ;;  %v1413_v27 = vmul.f32 %v3467_v21, %v4229_v50 }
 0x498   : > { %v1409_v19 = vadd.f32 %v1408_v17, %v1251_v18 }
 0x49a   : > { %3468 = vtanh.f32 %v1409_v19 }
 0x4a4   : > { %v3469_v24 = vpop.eup %3468 }
 0x4a5   : > { %v1412_v62 = vmul.f32 %v3469_v24, %v1411_v23 }
 0x4a7   : > { %v4281_v28 = vadd.f32 %v1413_v27, %v1412_v62 }
 0x4a9   : > { %1416 = vst [vmem:[%s1415_s21] sm:$0xff] %v4281_v28  ;;  %1492 = vmatmul.mubr.f32.vlgmr.msra.gmra.mrb[24].mxu1 %v4281_v28  ;;  %2730 = vmatmul.mubr.f32.vlgmr.msra.gmra.mrb[24].mxu0 %v4281_v28  ;;  %s1940_s21 = scalar_lea.vmem %s4120_s7, %s2345_s9 [#allocation5] }
 0x4aa   : > { %3216 = vmatpush1.bf16.msra.mxu1 %v3826_v60  ;;  %3247 = vmatpush3.bf16.msra.mxu0 %v3990_v29 }
 0x4ab   : > { %3218 = vmatprep.subr.bf16.mxu1 %v3837_v2  ;;  %3248 = vmatprep.subr.bf16.mxu0 %v3579_v31 }
 0x4ac   : > { %1666 = vmatprep.mubr.f32.mxu1 %v3580_v42  ;;  %2764 = vmatprep.mubr.msk.f32.mxu0 %vm3581_vm0, %v3580_v42 }
 0x4ae   : > { %3220 = vmatpush1.bf16.msra.mxu1 %v3852_v11  ;;  %3250 = vmatpush3.bf16.msra.mxu0 %v4004_v37 }
 0x4af   : > { %3222 = vmatprep.subr.bf16.mxu1 %v3856_v12  ;;  %3251 = vmatprep.subr.bf16.mxu0 %v3579_v31 }
 0x4b2   : > { %3224 = vmatpush1.bf16.msra.mxu1 %v3878_v25  ;;  %3253 = vmatpush3.bf16.msra.mxu0 %v4016_v49 }
 0x4b3   : > { %3226 = vmatprep.subr.bf16.mxu1 %v3882_v26  ;;  %3254 = vmatprep.subr.bf16.mxu0 %v3579_v31 }
 0x4b6   : > { %3228 = vmatpush1.bf16.msra.mxu1 %v3904_v39  ;;  %3256 = vmatpush3.bf16.msra.mxu0 %v4028_v1 }
 0x4b7   : > { %3230 = vmatprep.subr.bf16.mxu1 %v3908_v40  ;;  %3257 = vmatprep.subr.bf16.mxu0 %v3579_v31 }
 0x4ba   : > { %3232 = vmatpush1.bf16.msra.mxu1 %v3930_v55  ;;  %3259 = vmatpush3.bf16.msra.mxu0 %v4038_v16 }
 0x4bb   : > { %3234 = vmatprep.subr.bf16.mxu1 %v3934_v57  ;;  %3260 = vmatprep.subr.bf16.mxu0 %v3579_v31 }
 0x4be   : > { %3236 = vmatpush1.bf16.msra.mxu1 %v3954_v7  ;;  %3262 = vmatpush3.bf16.msra.mxu0 %v4048_v30 }
 0x4bf   : > { %3238 = vmatprep.subr.bf16.mxu1 %v3958_v9  ;;  %3263 = vmatprep.subr.bf16.mxu0 %v3579_v31 }
 0x4c2   : > { %3240 = vmatpush1.bf16.msra.mxu1 %v3976_v20  ;;  %3265 = vmatpush3.bf16.msra.mxu0 %v4058_v44 }
 0x4c3   : > { %3242 = vmatprep.subr.bf16.mxu1 %v3993_v32  ;;  %3266 = vmatprep.subr.bf16.mxu0 %v3579_v31 }
 0x4c6   : > { %3244 = vmatpush1.bf16.msra.mxu1 %v3998_v35  ;;  %3268 = vmatpush3.bf16.msra.mxu0 %v4068_v51 }
 0x4c7   : > { %3270 = vmatprep.subr.bf16.mxu1 %v3820_v56  ;;  %3301 = vmatprep.subr.bf16.mxu0 %v3579_v31 }
 0x57c   : > { %v1493_v34 = vpop.f32.mrb[24].mxu1  ;;  %v1564_v38 = vpop.f32.mrb[24].mxu0 }
 0x57d   : > { %v1568_v41 = vadd.f32 %v1493_v34, %v1424_v33  ;;  %v1495_v53 = vpop.f32.mrb[25].mxu1  ;;  %v2731_v43 = vpop.f32.mrb[25].mxu0  ;;  %v1582_v61 = vadd.f32 %v4116_v10, %v1564_v38 }
 0x57e   : > { %v1575_v46 = vadd.f32 %v1495_v53, %v1425_v45  ;;  %v1601_v53 = vld [vmem:[%s1598_s30 + $0x10] sm:$0xff] }
 0x57f   : > { %v2339_v8 = vmul.f32 -1.442695, %v1568_v41 }
 0x580   : > { %v2340_v47 = vmul.f32 -1.442695, %v1575_v46 }
 0x581   : > { %3470 = vpow2.f32 %v2339_v8 }
 0x582   : > { %3472 = vpow2.f32 %v2340_v47 }
 0x58b   : > { %v3471_v48 = vpop.eup %3470 }
 0x58c   : > { %v1572_v50 = vadd.f32 1.0, %v3471_v48  ;;  %v3473_v52 = vpop.eup %3472 }
 0x58d   : > { %v1579_v58 = vadd.f32 1.0, %v3473_v52  ;;  %v1949_v52 = vld [vmem:[%s1948_s17] sm:$0xff] }
 0x58e   : > { %3474 = vrcp.f32 %v1572_v50 }
 0x58f   : > { %3476 = vrcp.f32 %v1579_v58 }
 0x598   : > { %v3475_v63 = vpop.eup %3474 }
 0x599   : > { %v1583_v0 = vmul.f32 %v3475_v63, %v1582_v61  ;;  %v3477_v4 = vpop.eup %3476 }
 0x59a   : > { %v1586_v5 = vsub.f32 1.0, %v3477_v4  ;;  %v1588_v6 = vmul.f32 %v3477_v4, %v4281_v28  ;;  %v1950_v4 = vld [vmem:[%s1948_s17 + $0x8] sm:$0xff] }
 0x59b   : > { %v1584_v54 = vadd.f32 %v1583_v0, %v1426_v3 }
 0x59d   : > { %3478 = vtanh.f32 %v1584_v54 }
 0x5a7   : > { %v3479_v22 = vpop.eup %3478 }
 0x5a8   : > { %v1587_v36 = vmul.f32 %v3479_v22, %v1586_v5 }
 0x5aa   : > { %v4333_v14 = vadd.f32 %v1588_v6, %v1587_v36 }
 0x5ac   : > { %1591 = vst [vmem:[%s1590_s13] sm:$0xff] %v4333_v14  ;;  %1667 = vmatmul.mubr.f32.vlgmr.msra.gmra.mrb[26].mxu1 %v4333_v14  ;;  %2765 = vmatmul.mubr.f32.vlgmr.msra.gmra.mrb[26].mxu0 %v4333_v14  ;;  %s2115_s13 = scalar_lea.vmem %s4120_s7, %s2349_s27 [#allocation5] }
 0x5ad   : > { %3272 = vmatpush1.bf16.msra.mxu1 %v3826_v60  ;;  %3303 = vmatpush3.bf16.msra.mxu0 %v3990_v29 }
 0x5ae   : > { %3274 = vmatprep.subr.bf16.mxu1 %v3837_v2  ;;  %3304 = vmatprep.subr.bf16.mxu0 %v3579_v31 }
 0x5af   : > { %1841 = vmatprep.mubr.f32.mxu1 %v3580_v42  ;;  %2799 = vmatprep.mubr.msk.f32.mxu0 %vm3581_vm0, %v3580_v42 }
 0x5b1   : > { %3276 = vmatpush1.bf16.msra.mxu1 %v3852_v11  ;;  %3306 = vmatpush3.bf16.msra.mxu0 %v4004_v37 }
 0x5b2   : > { %3278 = vmatprep.subr.bf16.mxu1 %v3856_v12  ;;  %3307 = vmatprep.subr.bf16.mxu0 %v3579_v31 }
 0x5b5   : > { %3280 = vmatpush1.bf16.msra.mxu1 %v3878_v25  ;;  %3309 = vmatpush3.bf16.msra.mxu0 %v4016_v49 }
 0x5b6   : > { %3282 = vmatprep.subr.bf16.mxu1 %v3882_v26  ;;  %3310 = vmatprep.subr.bf16.mxu0 %v3579_v31 }
 0x5b9   : > { %3284 = vmatpush1.bf16.msra.mxu1 %v3904_v39  ;;  %3312 = vmatpush3.bf16.msra.mxu0 %v4028_v1 }
 0x5ba   : > { %3286 = vmatprep.subr.bf16.mxu1 %v3908_v40  ;;  %3313 = vmatprep.subr.bf16.mxu0 %v3579_v31 }
 0x5bd   : > { %3288 = vmatpush1.bf16.msra.mxu1 %v3930_v55  ;;  %3315 = vmatpush3.bf16.msra.mxu0 %v4038_v16 }
 0x5be   : > { %3290 = vmatprep.subr.bf16.mxu1 %v3934_v57  ;;  %3316 = vmatprep.subr.bf16.mxu0 %v3579_v31 }
 0x5c1   : > { %3292 = vmatpush1.bf16.msra.mxu1 %v3954_v7  ;;  %3318 = vmatpush3.bf16.msra.mxu0 %v4048_v30 }
 0x5c2   : > { %3294 = vmatprep.subr.bf16.mxu1 %v3958_v9  ;;  %3319 = vmatprep.subr.bf16.mxu0 %v3579_v31 }
 0x5c5   : > { %3296 = vmatpush1.bf16.msra.mxu1 %v3976_v20  ;;  %3321 = vmatpush3.bf16.msra.mxu0 %v4058_v44 }
 0x5c6   : > { %3298 = vmatprep.subr.bf16.mxu1 %v3993_v32  ;;  %3322 = vmatprep.subr.bf16.mxu0 %v3579_v31 }
 0x5c9   : > { %3300 = vmatpush1.bf16.msra.mxu1 %v3998_v35  ;;  %3324 = vmatpush3.bf16.msra.mxu0 %v4068_v51 }
 0x5ca   : > { %3326 = vmatprep.subr.bf16.mxu1 %v3820_v56  ;;  %3357 = vmatprep.subr.bf16.mxu0 %v3579_v31  ;;  %v1600_v56 = vld [vmem:[%s1598_s30 + $0x8] sm:$0xff] }
 0x67f   : > { %v1668_v15 = vpop.f32.mrb[26].mxu1  ;;  %v1739_v13 = vpop.f32.mrb[26].mxu0 }
 0x680   : > { %v1743_v17 = vadd.f32 %v1668_v15, %v1599_v59  ;;  %v1670_v18 = vpop.f32.mrb[27].mxu1  ;;  %v2766_v19 = vpop.f32.mrb[27].mxu0  ;;  %v1757_v34 = vadd.f32 %v4116_v10, %v1739_v13 }
 0x681   : > { %v1750_v23 = vadd.f32 %v1670_v18, %v1600_v56  ;;  %v1951_v18 = vld [vmem:[%s1948_s17 + $0x10] sm:$0xff] }
 0x682   : > { %v2343_v21 = vmul.f32 -1.442695, %v1743_v17 }
 0x683   : > { %v2344_v24 = vmul.f32 -1.442695, %v1750_v23 }
 0x684   : > { %3480 = vpow2.f32 %v2343_v21 }
 0x685   : > { %3482 = vpow2.f32 %v2344_v24 }
 0x68e   : > { %v3481_v62 = vpop.eup %3480 }
 0x68f   : > { %v1747_v27 = vadd.f32 1.0, %v3481_v62  ;;  %v3483_v28 = vpop.eup %3482 }
 0x690   : > { %v1754_v33 = vadd.f32 1.0, %v3483_v28 }
 0x691   : > { %3484 = vrcp.f32 %v1747_v27 }
 0x692   : > { %3486 = vrcp.f32 %v1754_v33 }
 0x69b   : > { %v3485_v38 = vpop.eup %3484 }
 0x69c   : > { %v1758_v41 = vmul.f32 %v3485_v38, %v1757_v34  ;;  %v3487_v8 = vpop.eup %3486 }
 0x69d   : > { %v1761_v45 = vsub.f32 1.0, %v3487_v8  ;;  %v1763_v48 = vmul.f32 %v3487_v8, %v4333_v14 }
 0x69e   : > { %v1759_v43 = vadd.f32 %v1758_v41, %v1601_v53 }
 0x6a0   : > { %3488 = vtanh.f32 %v1759_v43 }
 0x6aa   : > { %v3489_v46 = vpop.eup %3488 }
 0x6ab   : > { %v1762_v47 = vmul.f32 %v3489_v46, %v1761_v45 }
 0x6ad   : > { %v4385_v50 = vadd.f32 %v1763_v48, %v1762_v47 }
 0x6af   : > { %1766 = vst [vmem:[%s1765_s6] sm:$0xff] %v4385_v50  ;;  %1842 = vmatmul.mubr.f32.vlgmr.msra.gmra.mrb[28].mxu1 %v4385_v50  ;;  %2800 = vmatmul.mubr.f32.vlgmr.msra.gmra.mrb[28].mxu0 %v4385_v50 }
 0x6b0   : > { %3328 = vmatpush1.bf16.msra.mxu1 %v3826_v60  ;;  %3359 = vmatpush3.bf16.msra.mxu0 %v3990_v29  ;;  %v1774_v60 = vld [vmem:[%s1773_s15] sm:$0xff] }
 0x6b1   : > { %3330 = vmatprep.subr.bf16.mxu1 %v3837_v2  ;;  %3360 = vmatprep.subr.bf16.mxu0 %v3579_v31 }
 0x6b2   : > { %2016 = vmatprep.mubr.f32.mxu1 %v3580_v42  ;;  %2834 = vmatprep.mubr.msk.f32.mxu0 %vm3581_vm0, %v3580_v42 }
 0x6b4   : > { %3332 = vmatpush1.bf16.msra.mxu1 %v3852_v11  ;;  %3362 = vmatpush3.bf16.msra.mxu0 %v4004_v37  ;;  %v1776_v37 = vld [vmem:[%s1773_s15 + $0x10] sm:$0xff] }
 0x6b5   : > { %3334 = vmatprep.subr.bf16.mxu1 %v3856_v12  ;;  %3363 = vmatprep.subr.bf16.mxu0 %v3579_v31 }
 0x6b8   : > { %3336 = vmatpush1.bf16.msra.mxu1 %v3878_v25  ;;  %3365 = vmatpush3.bf16.msra.mxu0 %v4016_v49 }
 0x6b9   : > { %3338 = vmatprep.subr.bf16.mxu1 %v3882_v26  ;;  %3366 = vmatprep.subr.bf16.mxu0 %v3579_v31 }
 0x6bc   : > { %3340 = vmatpush1.bf16.msra.mxu1 %v3904_v39  ;;  %3368 = vmatpush3.bf16.msra.mxu0 %v4028_v1 }
 0x6bd   : > { %3342 = vmatprep.subr.bf16.mxu1 %v3908_v40  ;;  %3369 = vmatprep.subr.bf16.mxu0 %v3579_v31  ;;  %v1775_v40 = vld [vmem:[%s1773_s15 + $0x8] sm:$0xff] }
 0x6c0   : > { %3344 = vmatpush1.bf16.msra.mxu1 %v3930_v55  ;;  %3371 = vmatpush3.bf16.msra.mxu0 %v4038_v16 }
 0x6c1   : > { %3346 = vmatprep.subr.bf16.mxu1 %v3934_v57  ;;  %3372 = vmatprep.subr.bf16.mxu0 %v3579_v31 }
 0x6c4   : > { %3348 = vmatpush1.bf16.msra.mxu1 %v3954_v7  ;;  %3374 = vmatpush3.bf16.msra.mxu0 %v4048_v30 }
 0x6c5   : > { %3350 = vmatprep.subr.bf16.mxu1 %v3958_v9  ;;  %3375 = vmatprep.subr.bf16.mxu0 %v3579_v31 }
 0x6c8   : > { %3352 = vmatpush1.bf16.msra.mxu1 %v3976_v20  ;;  %3377 = vmatpush3.bf16.msra.mxu0 %v4058_v44 }
 0x6c9   : > { %3354 = vmatprep.subr.bf16.mxu1 %v3993_v32  ;;  %3378 = vmatprep.subr.bf16.mxu0 %v3579_v31 }
 0x6cc   : > { %3356 = vmatpush1.bf16.msra.mxu1 %v3998_v35  ;;  %3380 = vmatpush3.bf16.msra.mxu0 %v4068_v51 }
 0x782   : > { %v1843_v2 = vpop.f32.mrb[28].mxu1  ;;  %v1914_v11 = vpop.f32.mrb[28].mxu0 }
 0x783   : > { %v1918_v12 = vadd.f32 %v1843_v2, %v1774_v60  ;;  %v1845_v25 = vpop.f32.mrb[29].mxu1  ;;  %v2801_v26 = vpop.f32.mrb[29].mxu0  ;;  %v1932_v31 = vadd.f32 %v4116_v10, %v1914_v11 }
 0x784   : > { %v1925_v55 = vadd.f32 %v1845_v25, %v1775_v40 }
 0x785   : > { %v2347_v39 = vmul.f32 -1.442695, %v1918_v12 }
 0x786   : > { %v2348_v57 = vmul.f32 -1.442695, %v1925_v55 }
 0x787   : > { %3490 = vpow2.f32 %v2347_v39 }
 0x788   : > { %3492 = vpow2.f32 %v2348_v57 }
 0x791   : > { %v3491_v7 = vpop.eup %3490 }
 0x792   : > { %v1922_v9 = vadd.f32 1.0, %v3491_v7  ;;  %v3493_v20 = vpop.eup %3492 }
 0x793   : > { %v1929_v29 = vadd.f32 1.0, %v3493_v20 }
 0x794   : > { %3494 = vrcp.f32 %v1922_v9 }
 0x795   : > { %3496 = vrcp.f32 %v1929_v29 }
 0x79e   : > { %v3495_v32 = vpop.eup %3494 }
 0x79f   : > { %v1933_v35 = vmul.f32 %v3495_v32, %v1932_v31  ;;  %v3497_v49 = vpop.eup %3496 }
 0x7a0   : > { %v1936_v1 = vsub.f32 1.0, %v3497_v49  ;;  %v1938_v44 = vmul.f32 %v3497_v49, %v4385_v50 }
 0x7a1   : > { %v1934_v42 = vadd.f32 %v1933_v35, %v1776_v37 }
 0x7a3   : > { %3498 = vtanh.f32 %v1934_v42 }
 0x7ad   : > { %v3499_v16 = vpop.eup %3498 }
 0x7ae   : > { %v1937_v30 = vmul.f32 %v3499_v16, %v1936_v1 }
 0x7b0   : > { %v1939_v51 = vadd.f32 %v1938_v44, %v1937_v30 }
 0x7b2   : > { %1941 = vst [vmem:[%s1940_s21] sm:$0xff] %v1939_v51  ;;  %2017 = vmatmul.mubr.f32.vlgmr.msra.gmra.mrb[30].mxu1 %v1939_v51  ;;  %2835 = vmatmul.mubr.f32.vlgmr.msra.gmra.mrb[30].mxu0 %v1939_v51 }
 0x885   : > { %v2018_v58 = vpop.f32.mrb[30].mxu1  ;;  %v2089_v61 = vpop.f32.mrb[30].mxu0 }
 0x886   : > { %v2093_v63 = vadd.f32 %v2018_v58, %v1949_v52  ;;  %v2020_v0 = vpop.f32.mrb[31].mxu1  ;;  %v2836_v3 = vpop.f32.mrb[31].mxu0  ;;  %v2107_v15 = vadd.f32 %v4116_v10, %v2089_v61 }
 0x887   : > { %v2100_v5 = vadd.f32 %v2020_v0, %v1950_v4 }
 0x888   : > { %v2351_v54 = vmul.f32 -1.442695, %v2093_v63 }
 0x889   : > { %v2352_v22 = vmul.f32 -1.442695, %v2100_v5 }
 0x88a   : > { %3500 = vpow2.f32 %v2351_v54 }
 0x88b   : > { %3502 = vpow2.f32 %v2352_v22 }
 0x894   : > { %v3501_v36 = vpop.eup %3500 }
 0x895   : > { %v2097_v6 = vadd.f32 1.0, %v3501_v36  ;;  %v3503_v14 = vpop.eup %3502 }
 0x896   : > { %v2104_v59 = vadd.f32 1.0, %v3503_v14 }
 0x897   : > { %3504 = vrcp.f32 %v2097_v6 }
 0x898   : > { %3506 = vrcp.f32 %v2104_v59 }
 0x8a1   : > { %v3505_v13 = vpop.eup %3504 }
 0x8a2   : > { %v2108_v17 = vmul.f32 %v3505_v13, %v2107_v15  ;;  %v3507_v21 = vpop.eup %3506 }
 0x8a3   : > { %v2111_v56 = vsub.f32 1.0, %v3507_v21  ;;  %v2113_v62 = vmul.f32 %v3507_v21, %v1939_v51 }
 0x8a4   : > { %v2109_v19 = vadd.f32 %v2108_v17, %v1951_v18 }
 0x8a6   : > { %3508 = vtanh.f32 %v2109_v19 }
 0x8af   : > { %2123 = sbr.rel (!%p4492_p3) target bundleno = 2242 (0x8c2), region = 48 }
 0x8b0   : > { %v3509_v23 = vpop.eup %3508 }
 0x8b1   : > { %v2112_v24 = vmul.f32 %v3509_v23, %v2111_v56 }
 0x8b3   : > { %v2114_v27 = vadd.f32 %v2113_v62, %v2112_v24 }
 0x8b5   : > { %2116 = vst [vmem:[%s2115_s13] sm:$0xff] %v2114_v27 }
 0x8bc   : > { %v2167_v10 = vld [vmem:[%s4120_s7] sm:$0xff]  ;;  %v2169_v28 = vld [vmem:[%s4120_s7 + $0x8] sm:$0xff]  ;;  %v2171_v33 = vld [vmem:[%s4120_s7 + $0x10] sm:$0xff] }
 0x8bd   : > { %v2173_v34 = vld [vmem:[%s4120_s7 + $0x18] sm:$0xff]  ;;  %v2175_v38 = vld [vmem:[%s4120_s7 + $0x20] sm:$0xff]  ;;  %v2177_v41 = vld [vmem:[%s4120_s7 + $0x28] sm:$0xff]  ;;  %2168 = vst [vmem:[%s2125_s29] sm:$0xff] %v2167_v10 }
 0x8be   : > { %2170 = vst [vmem:[%s2125_s29 + $0x10] sm:$0xff] %v2169_v28  ;;  %2172 = vst [vmem:[%s2125_s29 + $0x20] sm:$0xff] %v2171_v33  ;;  %v2179_v53 = vld [vmem:[%s4120_s7 + $0x30] sm:$0xff]  ;;  %v2181_v43 = vld [vmem:[%s4120_s7 + $0x38] sm:$0xff] }
 0x8bf   : > { %2174 = vst [vmem:[%s2125_s29 + $0x30] sm:$0xff] %v2173_v34  ;;  %2176 = vst [vmem:[%s2125_s29 + $0x40] sm:$0xff] %v2175_v38 }
 0x8c0   : > { %2178 = vst [vmem:[%s2125_s29 + $0x50] sm:$0xff] %v2177_v41  ;;  %2180 = vst [vmem:[%s2125_s29 + $0x60] sm:$0xff] %v2179_v53 }
 0x8c1   : > { %2182 = vst [vmem:[%s2125_s29 + $0x70] sm:$0xff] %v2181_v43 }
 0x8c2 PF: > { %p15_p4 = scmp.ge.s32.totalorder %s3634_s23, 4   ;;  %s4493_s18 = smov %s3566_s19 }
 0x8c3   : > { %s4494_s19 = smov %s3570_s20  ;;  %s4495_s20 = smov %s3644_s26 }
 0x8c4   : > { %s4496_s21 = smov %s3634_s23  ;;  %17 = sbr.rel (!%p15_p4) target bundleno = 3 (0x3), region = 143 }
 0x8cb   :  { %2198 = vsyncpa [#allocation4], 1 }
 0x8cc   :  { %2200 = vsyncpa [#allocation4 + $0x1], 1 }

</bundles_post_ra>
